<compile_context>
chip_gen: v7x
topology: tpu7x:2x2x1
jax: 0.10.0
libtpu: 0.0.40
codegen_flags: <defaults>
</compile_context>

<pallas_src>
import functools

import jax
import jax.numpy as jnp
from jax.experimental import pallas as pl
from jax.experimental.pallas import tpu as pltpu

PRIOR_SIG = 0.15
DGN_GROUPS = 10
DGN_LAMBDA = 0.01
DGN_EPS = 1e-5

# Operands of the heavy edge-network matmuls go through the MXU in bf16
# (f32 accumulation).  Node-level / elementwise math stays f32.
MXU_DTYPE = jnp.bfloat16


# ----------------------------------------------------------------------------
# Kernel 1: simple fused linear (+ optional ReLU)  -- used for the pre-FC layer
# ----------------------------------------------------------------------------
def _linear_kernel(x_ref, w_ref, b_ref, o_ref, *, activation):
    acc = jnp.dot(x_ref[...], w_ref[...], preferred_element_type=jnp.float32)
    acc = acc + b_ref[...]
    if activation == "relu":
        acc = jnp.maximum(acc, 0.0)
    o_ref[...] = acc.astype(o_ref.dtype)


def linear(x, w, b, activation=None):
    m, k = x.shape
    k2, n = w.shape
    assert k == k2
    b2 = b.reshape(1, n).astype(jnp.float32)
    return pl.pallas_call(
        functools.partial(_linear_kernel, activation=activation),
        out_shape=jax.ShapeDtypeStruct((m, n), jnp.float32),
        grid=(1,),
        in_specs=[
            pl.BlockSpec((m, k), lambda i: (0, 0)),
            pl.BlockSpec((k, n), lambda i: (0, 0)),
            pl.BlockSpec((1, n), lambda i: (0, 0)),
        ],
        out_specs=pl.BlockSpec((m, n), lambda i: (0, 0)),
    )(x.astype(jnp.float32), w.astype(jnp.float32), b2)


# ----------------------------------------------------------------------------
# Kernel 2: fused NNConv (gather + edge network + per-edge message + mean aggr + root)
# ----------------------------------------------------------------------------
def _nnconv_kernel(src_ref, dst_ref, invd_ref,    # per-edge-tile index / weight arrays
                   ea_ref,                        # edge_attr tile [TE, Fe]
                   xn_ref,                        # node features [N, C] (resident)
                   w1_ref, b1_ref,                # edge-net layer 1
                   rep_ref, til_ref, w2f_ref, b2r_ref,  # edge-net layer 2 (factored)
                   rootw_ref, rootb_ref,          # NNConv root weight / bias
                   o_ref):                        # output [N, C] (resident accumulator)
    step = pl.program_id(0)
    te = ea_ref.shape[0]
    n_nodes = xn_ref.shape[0]

    @pl.when(step == 0)
    def _init():
        # root path: out = x @ root_w + bias; messages accumulate on top of it.
        o_ref[...] = (jnp.dot(xn_ref[...], rootw_ref[...],
                              preferred_element_type=jnp.float32) + rootb_ref[...])

    # ---- in-kernel source gather: xs[e, :] = x[src[e], :] via one-hot matmul ----
    # TODO(synk): for very large node counts this one-hot [TE, N] gather/scatter scales
    # with N per tile; a node-tiled two-level variant would be needed then.
    node_iota = jax.lax.broadcasted_iota(jnp.int32, (te, n_nodes), 1)
    gsel = (node_iota == src_ref[...]).astype(jnp.float32)              # [TE, N]
    xs = jnp.dot(gsel, xn_ref[...], preferred_element_type=jnp.float32)  # [TE, C]

    # ---- edge network layer 1 (bf16 MXU operands, f32 accumulate) + ReLU ----
    h1 = jnp.dot(ea_ref[...].astype(MXU_DTYPE), w1_ref[...],
                 preferred_element_type=jnp.float32) + b1_ref[...]
    h1 = jnp.maximum(h1, 0.0)

    # ---- edge network layer 2 fused with the per-edge message contraction ----
    # The (E, C, C) edge weights are never materialized:
    #   msg[e, n] = sum_k x_src[e,k] * (h1[e,:] @ W2 + b2)[k*C + n]
    #             = (z @ W2F)[e, n] + (x_src @ B2)[e, n]
    # where z[e, j*C+k] = h1[e,j] * x_src[e,k]; rep/til are fixed 0/1 expansion matrices
    # (stored bf16 -> these expansion matmuls run at full bf16 MXU rate).
    h1r = jnp.dot(h1.astype(MXU_DTYPE), rep_ref[...],
                  preferred_element_type=jnp.float32)
    xt = jnp.dot(xs.astype(MXU_DTYPE), til_ref[...],
                 preferred_element_type=jnp.float32)
    z = (h1r * xt).astype(MXU_DTYPE)
    msg = jnp.dot(z, w2f_ref[...], preferred_element_type=jnp.float32)
    msg = msg + jnp.dot(xs, b2r_ref[...], preferred_element_type=jnp.float32)  # [TE, C]

    # ---- mean scatter-aggregation as a weighted one-hot matmul on the MXU ----
    # scat[n, e] = (n == dst[e]) * 1/deg(n); padded edges have invd == 0.
    nid = jax.lax.broadcasted_iota(jnp.int32, (n_nodes, te), 0)
    scat = jnp.where(nid == dst_ref[...], invd_ref[...], 0.0)           # [N, TE] f32
    o_ref[...] += jnp.dot(scat, msg, preferred_element_type=jnp.float32)


def _edge_tiling(num_edges, te_target=256):
    """Pick an E tile that keeps per-step VMEM a few MiB on v5e/v6e/v7x."""
    if num_edges >= te_target:
        te = te_target
        e_pad = ((num_edges + te - 1) // te) * te
    else:
        e_pad = max(8, ((num_edges + 7) // 8) * 8)
        te = e_pad
    return e_pad, te


def nnconv_fused(src_col, dst_row, invd_row, ea_pad, x_nodes, p, *, te):
    e_pad, fe = ea_pad.shape
    n_nodes, c = x_nodes.shape
    d3 = p["nn_w1"].shape[1]

    # structural 0/1 matrices + weight reshapes (constants, folded by XLA)
    rep = jnp.repeat(jnp.eye(d3, dtype=MXU_DTYPE), c, axis=1)       # [d3, d3*c]
    til = jnp.tile(jnp.eye(c, dtype=MXU_DTYPE), (1, d3))            # [c,  d3*c]
    w2f = p["nn_w2"].reshape(d3 * c, c).astype(MXU_DTYPE)           # [d3*c, c]
    b2r = p["nn_b2"].reshape(c, c).astype(jnp.float32)              # [c, c]
    w1 = p["nn_w1"].astype(MXU_DTYPE)
    b1 = p["nn_b1"].reshape(1, d3).astype(jnp.float32)
    rootw = p["root_w"].astype(jnp.float32)
    rootb = p["root_b"].reshape(1, c).astype(jnp.float32)

    return pl.pallas_call(
        _nnconv_kernel,
        out_shape=jax.ShapeDtypeStruct((n_nodes, c), jnp.float32),
        grid=(e_pad // te,),
        in_specs=[
            pl.BlockSpec((te, 1), lambda e: (e, 0)),           # src column tile
            pl.BlockSpec((1, te), lambda e: (0, e)),           # dst row tile
            pl.BlockSpec((1, te), lambda e: (0, e)),           # 1/deg(dst) row tile
            pl.BlockSpec((te, fe), lambda e: (e, 0)),          # edge_attr tile
            pl.BlockSpec((n_nodes, c), lambda e: (0, 0)),      # node features
            pl.BlockSpec((fe, d3), lambda e: (0, 0)),          # w1
            pl.BlockSpec((1, d3), lambda e: (0, 0)),           # b1
            pl.BlockSpec((d3, d3 * c), lambda e: (0, 0)),      # rep
            pl.BlockSpec((c, d3 * c), lambda e: (0, 0)),       # til
            pl.BlockSpec((d3 * c, c), lambda e: (0, 0)),       # w2f
            pl.BlockSpec((c, c), lambda e: (0, 0)),            # b2 reshaped
            pl.BlockSpec((c, c), lambda e: (0, 0)),            # root_w
            pl.BlockSpec((1, c), lambda e: (0, 0)),            # root_b
        ],
        out_specs=pl.BlockSpec((n_nodes, c), lambda e: (0, 0)),
        compiler_params=pltpu.CompilerParams(
            dimension_semantics=("arbitrary",)),   # output resident across E tiles
    )(src_col, dst_row, invd_row, ea_pad, x_nodes.astype(jnp.float32),
      w1, b1, rep, til, w2f, b2r, rootw, rootb)


# ----------------------------------------------------------------------------
# Kernel 3: fused DiffGroupNorm + ReLU + GRU cell + residual
# ----------------------------------------------------------------------------
def _dgn_gru_kernel(m_ref, h_ref, prev_ref, dgnw_ref, repg_ref, tilg_ref, sums_ref,
                    wir_ref, wiz_ref, win_ref, whr_ref, whz_ref, whn_ref,
                    bir_ref, biz_ref, bin_ref, bhr_ref, bhz_ref, bhn_ref,
                    out_ref, hnew_ref):
    m = m_ref[...]
    inv_n = 1.0 / m.shape[0]

    # ---- DiffGroupNorm (training-mode BN, biased var, affine = identity at init) ----
    logits = jnp.dot(m, dgnw_ref[...], preferred_element_type=jnp.float32)   # [N, G]
    logits = logits - jnp.max(logits, axis=-1, keepdims=True)
    es = jnp.exp(logits)
    s = es / jnp.sum(es, axis=-1, keepdims=True)                             # softmax
    # flattened [N, G*C]: t[n, g*C+c] = s[n, g] * m[n, c]   (no HBM round-trip)
    t = (jnp.dot(s, repg_ref[...], preferred_element_type=jnp.float32) *
         jnp.dot(m, tilg_ref[...], preferred_element_type=jnp.float32))
    mean = jnp.sum(t, axis=0, keepdims=True) * inv_n
    d = t - mean
    var = jnp.sum(d * d, axis=0, keepdims=True) * inv_n                      # biased var
    inv_sd = jax.lax.rsqrt(var + DGN_EPS)
    dgn_add = jnp.dot(d * inv_sd, sums_ref[...],
                      preferred_element_type=jnp.float32)                    # sum over g
    mact = jnp.maximum(m + DGN_LAMBDA * dgn_add, 0.0)                        # + ReLU
    # dropout(p=0.0) is a no-op

    # ---- GRU cell (torch gate order r, z, n; seq_len == 1) ----
    h = h_ref[...]
    gir = jnp.dot(mact, wir_ref[...], preferred_element_type=jnp.float32) + bir_ref[...]
    giz = jnp.dot(mact, wiz_ref[...], preferred_element_type=jnp.float32) + biz_ref[...]
    gin = jnp.dot(mact, win_ref[...], preferred_element_type=jnp.float32) + bin_ref[...]
    ghr = jnp.dot(h, whr_ref[...], preferred_element_type=jnp.float32) + bhr_ref[...]
    ghz = jnp.dot(h, whz_ref[...], preferred_element_type=jnp.float32) + bhz_ref[...]
    ghn = jnp.dot(h, whn_ref[...], preferred_element_type=jnp.float32) + bhn_ref[...]
    r = jax.nn.sigmoid(gir + ghr)
    z = jax.nn.sigmoid(giz + ghz)
    n = jnp.tanh(gin + r * ghn)
    h_new = (1.0 - z) * n + z * h

    hnew_ref[...] = h_new
    out_ref[...] = h_new + prev_ref[...]      # residual add


def dgn_gru_fused(m, h, prev, p):
    # TODO(synk): whole node dimension is one VMEM block (BatchNorm needs global stats);
    # a two-pass tiled variant would be needed for very large node counts.
    n_nodes, c = m.shape
    g = p["dgn_lin_w"].shape[1]

    repg = jnp.repeat(jnp.eye(g, dtype=jnp.float32), c, axis=1)   # [g, g*c]
    tilg = jnp.tile(jnp.eye(c, dtype=jnp.float32), (1, g))        # [c, g*c]
    sums = jnp.tile(jnp.eye(c, dtype=jnp.float32), (g, 1))        # [g*c, c]

    wih, whh = p["gru_w_ih"], p["gru_w_hh"]
    bih, bhh = p["gru_b_ih"], p["gru_b_hh"]
    wir, wiz, win = wih[:, :c], wih[:, c:2 * c], wih[:, 2 * c:]
    whr, whz, whn = whh[:, :c], whh[:, c:2 * c], whh[:, 2 * c:]
    bir, biz, bin_ = (bih[:c].reshape(1, c), bih[c:2 * c].reshape(1, c),
                      bih[2 * c:].reshape(1, c))
    bhr, bhz, bhn = (bhh[:c].reshape(1, c), bhh[c:2 * c].reshape(1, c),
                     bhh[2 * c:].reshape(1, c))

    args = (m, h, prev, p["dgn_lin_w"], repg, tilg, sums,
            wir, wiz, win, whr, whz, whn, bir, biz, bin_, bhr, bhz, bhn)
    args = tuple(a.astype(jnp.float32) for a in args)

    out_new, h_new = pl.pallas_call(
        _dgn_gru_kernel,
        out_shape=(jax.ShapeDtypeStruct((n_nodes, c), jnp.float32),
                   jax.ShapeDtypeStruct((n_nodes, c), jnp.float32)),
        grid=(1,),
        in_specs=[pl.BlockSpec(a.shape, lambda i: (0, 0)) for a in args],
        out_specs=(pl.BlockSpec((n_nodes, c), lambda i: (0, 0)),
                   pl.BlockSpec((n_nodes, c), lambda i: (0, 0))),
    )(*args)
    return out_new, h_new


# ----------------------------------------------------------------------------
# Kernel 4: fused global_mean_pool + post BayesLinear (ReLU) + lin_out
# ----------------------------------------------------------------------------
def _pool_post_kernel(batch_ref, wn_ref, xn_ref, wpost_ref, bpost_ref,
                      wout_ref, bout_ref, o_ref):
    num_graphs = o_ref.shape[0]
    n_nodes = xn_ref.shape[0]

    # segment mean as one weighted one-hot matmul: sel[g, n] = (batch[n]==g) / count(g)
    gid = jax.lax.broadcasted_iota(jnp.int32, (num_graphs, n_nodes), 0)
    sel = jnp.where(gid == batch_ref[...], wn_ref[...], 0.0)              # [G, N]
    pooled = jnp.dot(sel, xn_ref[...], preferred_element_type=jnp.float32)  # [G, C]

    post = jnp.dot(pooled, wpost_ref[...],
                   preferred_element_type=jnp.float32) + bpost_ref[...]
    post = jnp.maximum(post, 0.0)
    o_ref[...] = (jnp.dot(post, wout_ref[...], preferred_element_type=jnp.float32)
                  + bout_ref[...])


def pool_post_fused(batch_row, wn_row, x_nodes, p_post, p_out, *, num_graphs):
    n_nodes, c = x_nodes.shape
    d2 = p_post["W"].shape[1]
    od = p_out["W"].shape[1]
    return pl.pallas_call(
        _pool_post_kernel,
        out_shape=jax.ShapeDtypeStruct((num_graphs, od), jnp.float32),
        grid=(1,),
        in_specs=[
            pl.BlockSpec((1, n_nodes), lambda i: (0, 0)),
            pl.BlockSpec((1, n_nodes), lambda i: (0, 0)),
            pl.BlockSpec((n_nodes, c), lambda i: (0, 0)),
            pl.BlockSpec((c, d2), lambda i: (0, 0)),
            pl.BlockSpec((1, d2), lambda i: (0, 0)),
            pl.BlockSpec((d2, od), lambda i: (0, 0)),
            pl.BlockSpec((1, od), lambda i: (0, 0)),
        ],
        out_specs=pl.BlockSpec((num_graphs, od), lambda i: (0, 0)),
    )(batch_row, wn_row, x_nodes.astype(jnp.float32),
      p_post["W"].astype(jnp.float32),
      p_post["b"].reshape(1, d2).astype(jnp.float32),
      p_out["W"].astype(jnp.float32),
      p_out["b"].reshape(1, od).astype(jnp.float32))


# ----------------------------------------------------------------------------
# BayesLinear KL (sample=False path) -- pure weight function, plain JAX
# ----------------------------------------------------------------------------
def bayes_kl(w, b):
    c = jnp.log(PRIOR_SIG * jnp.sqrt(2.0 * jnp.pi))
    return (jnp.sum(0.5 * (w / PRIOR_SIG) ** 2 + c)
            + jnp.sum(0.5 * (b / PRIOR_SIG) ** 2 + c))


# ----------------------------------------------------------------------------
# Full forward pass
# ----------------------------------------------------------------------------
def mpnn_bayes_forward(params, x, edge_index, edge_attr, batch, num_graphs):
    n_nodes = x.shape[0]
    num_edges = edge_attr.shape[0]
    src, dst = edge_index[0], edge_index[1]

    # ---- pre FC (BayesLinear, sample=False) + relu ----
    pre = params["pre"][0]
    out = linear(x, pre["W"], pre["b"], activation="relu")
    tkl = bayes_kl(pre["W"], pre["b"])
    prev_out = out
    h = out                                            # GRU hidden state

    # ---- edge-side constants shared by all GC layers ----
    deg = jnp.zeros((n_nodes,), jnp.float32).at[dst].add(1.0)
    invd_e = (1.0 / jnp.maximum(deg, 1.0))[dst]        # [E], 1/deg(dst(e)) for mean aggr
    e_pad, te = _edge_tiling(num_edges)
    pe = e_pad - num_edges
    ea_pad = jnp.pad(edge_attr.astype(jnp.float32), ((0, pe), (0, 0)))
    src_col = jnp.pad(src.astype(jnp.int32), ((0, pe),)).reshape(e_pad, 1)
    dst_row = jnp.pad(dst.astype(jnp.int32), ((0, pe),)).reshape(1, e_pad)
    invd_row = jnp.pad(invd_e, ((0, pe),)).reshape(1, e_pad)  # padded edges -> weight 0

    # ---- GC layers: fused NNConv kernel + fused DGN/ReLU/GRU kernel ----
    for p in params["convs"]:
        m = nnconv_fused(src_col, dst_row, invd_row, ea_pad, out, p, te=te)
        out, h = dgn_gru_fused(m, h, prev_out, p)
        prev_out = out

    # ---- global_mean_pool + post FC + output (one fused kernel) ----
    counts = jnp.zeros((num_graphs,), jnp.float32).at[batch].add(1.0)
    invc = 1.0 / jnp.maximum(counts, 1.0)
    wn_row = invc[batch].reshape(1, n_nodes)
    batch_row = batch.astype(jnp.int32).reshape(1, n_nodes)
    p_post = params["post"][0]
    p_out = params["lin_out"]
    y = pool_post_fused(batch_row, wn_row, out, p_post, p_out, num_graphs=num_graphs)
    tkl = tkl + bayes_kl(p_post["W"], p_post["b"]) + bayes_kl(p_out["W"], p_out["b"])

    if y.shape[1] == 1:
        return y.reshape(-1), tkl
    return y, tkl


# ----------------------------------------------------------------------------
# Deterministic parameter initialization (shapes from MPNN_Bayes.__init__)
# ----------------------------------------------------------------------------
def init_params(key, num_features, num_edge_features, dim1, dim2, dim3,
                gc_count, output_dim):
    keys = iter(jax.random.split(key, 64))

    def unif(shape, lo=-0.02, hi=0.02):
        return jax.random.uniform(next(keys), shape, jnp.float32, lo, hi)

    def nrm(shape, scale=0.1):
        return scale * jax.random.normal(next(keys), shape, jnp.float32)

    params = {
        "pre": [{"W": unif((num_features, dim1)), "b": unif((dim1,))}],
        "convs": [],
        "post": [{"W": unif((dim1, dim2)), "b": unif((dim2,))}],
        "lin_out": {"W": unif((dim2, output_dim)), "b": unif((output_dim,))},
    }
    for _ in range(gc_count):
        params["convs"].append({
            "nn_w1": nrm((num_edge_features, dim3)), "nn_b1": nrm((dim3,)),
            "nn_w2": nrm((dim3, dim1 * dim1)),       "nn_b2": nrm((dim1 * dim1,)),
            "root_w": nrm((dim1, dim1)),             "root_b": nrm((dim1,)),
            "gru_w_ih": nrm((dim1, 3 * dim1)),       "gru_b_ih": nrm((3 * dim1,)),
            "gru_w_hh": nrm((dim1, 3 * dim1)),       "gru_b_hh": nrm((3 * dim1,)),
            "dgn_lin_w": nrm((dim1, DGN_GROUPS)),
        })
    return params


# ----------------------------------------------------------------------------
# Example run
# ----------------------------------------------------------------------------
if __name__ == "__main__":
    # Small synthetic graph batch: 2 graphs x 8 nodes, ring topology per graph.
    B = 2
    N_PER_GRAPH = 8
    N = B * N_PER_GRAPH
    NUM_FEATURES = 16
    NUM_EDGE_FEATURES = 8
    DIM1 = DIM2 = DIM3 = 32
    GC_COUNT = 3
    OUTPUT_DIM = 1  # data[0].y.ndim == 0 branch

    key = jax.random.PRNGKey(0)
    kx, ke, kp = jax.random.split(key, 3)

    x = jax.random.normal(kx, (N, NUM_FEATURES), jnp.float32)

    src, dst = [], []
    for g in range(B):
        base = g * N_PER_GRAPH
        for i in range(N_PER_GRAPH):
            j = (i + 1) % N_PER_GRAPH
            src += [base + i, base + j]
            dst += [base + j, base + i]
    edge_index = jnp.array([src, dst], dtype=jnp.int32)
    E = edge_index.shape[1]
    edge_attr = jax.random.normal(ke, (E, NUM_EDGE_FEATURES), jnp.float32)
    batch = jnp.array([g for g in range(B) for _ in range(N_PER_GRAPH)], jnp.int32)

    params = init_params(kp, NUM_FEATURES, NUM_EDGE_FEATURES,
                         DIM1, DIM2, DIM3, GC_COUNT, OUTPUT_DIM)

    fwd = jax.jit(functools.partial(mpnn_bayes_forward, num_graphs=B))
    out, tkl = fwd(params, x, edge_index, edge_attr, batch)
    jax.block_until_ready((out, tkl))

    assert out.shape == (B,)
    assert jnp.isfinite(out).all() and jnp.isfinite(tkl)
    # TODO(synk): sample=True path (reparameterized noise in BayesLinear) and BatchNorm
    # running-statistics updates are not implemented (sample=False / training batch stats).
    print("KERNEL_OK")
</pallas_src>

<mosaic_0001>
module attributes {stable_mosaic.version = 11 : i64} {
  func.func private @main(%arg0: i32) attributes {dimension_semantics = [#tpu.dimension_semantics<core_parallel>], iteration_bounds = array<i64: 2>, tpu.core_type = #tpu.core_type<sc_scalar_subcore>, window_params = []} {
    return
  }
}

module attributes {stable_mosaic.version = 11 : i64} {
  func.func private @main(%arg0: i32) attributes {dimension_semantics = [#tpu.dimension_semantics<core_parallel>], iteration_bounds = array<i64: 2>, tpu.core_type = #tpu.core_type<sc_scalar_subcore>, window_params = []} {
    return
  }
}

module attributes {stable_mosaic.version = 11 : i64} {
  func.func @_linear_kernel(%arg0: i32, %arg1: memref<16x16xf32, #tpu.memory_space<vmem>>, %arg2: memref<16x32xf32, #tpu.memory_space<vmem>>, %arg3: memref<1x32xf32, #tpu.memory_space<vmem>>, %arg4: memref<16x32xf32, #tpu.memory_space<vmem>>) attributes {dimension_semantics = [#tpu.dimension_semantics<arbitrary>], iteration_bounds = array<i64: 1>, scalar_prefetch = 0 : i64, scratch_operands = 0 : i64, tpu.core_type = #tpu.core_type<tc>, window_params = [{pipeline_mode = #tpu.pipeline_mode<synchronous>, transform_indices = @transform_0, window_bounds = array<i64: 16, 16>}, {pipeline_mode = #tpu.pipeline_mode<synchronous>, transform_indices = @transform_1, window_bounds = array<i64: 16, 32>}, {pipeline_mode = #tpu.pipeline_mode<synchronous>, transform_indices = @transform_2, window_bounds = array<i64: 1, 32>}, {pipeline_mode = #tpu.pipeline_mode<synchronous>, transform_indices = @transform_3, window_bounds = array<i64: 16, 32>}]} {
    %c0 = arith.constant 0 : index
    %c0_0 = arith.constant 0 : index
    %0 = vector.load %arg1[%c0, %c0_0] : memref<16x16xf32, #tpu.memory_space<vmem>>, vector<16x16xf32>
    %c0_1 = arith.constant 0 : index
    %c0_2 = arith.constant 0 : index
    %1 = vector.load %arg2[%c0_1, %c0_2] : memref<16x32xf32, #tpu.memory_space<vmem>>, vector<16x32xf32>
    %cst = arith.constant dense<0.000000e+00> : vector<16x32xf32>
    %2 = tpu.matmul %0, %1, %cst {dimension_numbers = #tpu.dot_dimension_numbers<[1], [0], [0], [1], [0, 0, 1, 1], [], []>} : vector<16x16xf32>, vector<16x32xf32>, vector<16x32xf32> -> vector<16x32xf32>
    %c0_3 = arith.constant 0 : index
    %c0_4 = arith.constant 0 : index
    %3 = vector.load %arg3[%c0_3, %c0_4] : memref<1x32xf32, #tpu.memory_space<vmem>>, vector<1x32xf32>
    %4 = vector.broadcast %3 : vector<1x32xf32> to vector<16x32xf32>
    %5 = arith.addf %2, %4 : vector<16x32xf32>
    %cst_5 = arith.constant 0.000000e+00 : f32
    %6 = vector.broadcast %cst_5 : f32 to vector<16x32xf32>
    %7 = arith.maximumf %5, %6 : vector<16x32xf32>
    %c0_6 = arith.constant 0 : index
    %c0_7 = arith.constant 0 : index
    %8 = vector.load %arg4[%c0_6, %c0_7] : memref<16x32xf32, #tpu.memory_space<vmem>>, vector<16x32xf32>
    tpu.vector_store %arg4[%c0_6, %c0_7], %7 {strides = array<i32>} : memref<16x32xf32, #tpu.memory_space<vmem>>, vector<16x32xf32>,
    return
  }
  func.func @transform_0(%arg0: i32) -> (i32, i32) {
    %c0_i32 = arith.constant 0 : i32
    %c0_i32_0 = arith.constant 0 : i32
    %c0_i32_1 = arith.constant 0 : i32
    return %c0_i32, %c0_i32_0 : i32, i32
  }
  func.func @transform_1(%arg0: i32) -> (i32, i32) {
    %c0_i32 = arith.constant 0 : i32
    %c0_i32_0 = arith.constant 0 : i32
    %c0_i32_1 = arith.constant 0 : i32
    return %c0_i32, %c0_i32_0 : i32, i32
  }
  func.func @transform_2(%arg0: i32) -> (i32, i32) {
    %c0_i32 = arith.constant 0 : i32
    %c0_i32_0 = arith.constant 0 : i32
    %c0_i32_1 = arith.constant 0 : i32
    return %c0_i32, %c0_i32_0 : i32, i32
  }
  func.func @transform_3(%arg0: i32) -> (i32, i32) {
    %c0_i32 = arith.constant 0 : i32
    %c0_i32_0 = arith.constant 0 : i32
    %c0_i32_1 = arith.constant 0 : i32
    return %c0_i32, %c0_i32_0 : i32, i32
  }
}

module attributes {stable_mosaic.version = 11 : i64} {
  func.func @_nnconv_kernel(%arg0: i32, %arg1: memref<32x1xi32, #tpu.memory_space<vmem>>, %arg2: memref<1x32xi32, #tpu.memory_space<vmem>>, %arg3: memref<1x32xf32, #tpu.memory_space<vmem>>, %arg4: memref<32x8xf32, #tpu.memory_space<vmem>>, %arg5: memref<16x32xf32, #tpu.memory_space<vmem>>, %arg6: memref<8x32xbf16, #tpu.memory_space<vmem>>, %arg7: memref<1x32xf32, #tpu.memory_space<vmem>>, %arg8: memref<32x1024xbf16, #tpu.memory_space<vmem>>, %arg9: memref<32x1024xbf16, #tpu.memory_space<vmem>>, %arg10: memref<1024x32xbf16, #tpu.memory_space<vmem>>, %arg11: memref<32x32xf32, #tpu.memory_space<vmem>>, %arg12: memref<32x32xf32, #tpu.memory_space<vmem>>, %arg13: memref<1x32xf32, #tpu.memory_space<vmem>>, %arg14: memref<16x32xf32, #tpu.memory_space<vmem>>) attributes {dimension_semantics = [#tpu.dimension_semantics<arbitrary>], iteration_bounds = array<i64: 1>, scalar_prefetch = 0 : i64, scratch_operands = 0 : i64, tpu.core_type = #tpu.core_type<tc>, window_params = [{transform_indices = @transform_0, window_bounds = array<i64: 32, 1>}, {transform_indices = @transform_1, window_bounds = array<i64: 1, 32>}, {transform_indices = @transform_2, window_bounds = array<i64: 1, 32>}, {transform_indices = @transform_3, window_bounds = array<i64: 32, 8>}, {pipeline_mode = #tpu.pipeline_mode<synchronous>, transform_indices = @transform_4, window_bounds = array<i64: 16, 32>}, {pipeline_mode = #tpu.pipeline_mode<synchronous>, transform_indices = @transform_5, window_bounds = array<i64: 8, 32>}, {pipeline_mode = #tpu.pipeline_mode<synchronous>, transform_indices = @transform_6, window_bounds = array<i64: 1, 32>}, {pipeline_mode = #tpu.pipeline_mode<synchronous>, transform_indices = @transform_7, window_bounds = array<i64: 32, 1024>}, {pipeline_mode = #tpu.pipeline_mode<synchronous>, transform_indices = @transform_8, window_bounds = array<i64: 32, 1024>}, {pipeline_mode = #tpu.pipeline_mode<synchronous>, transform_indices = @transform_9, window_bounds = array<i64: 1024, 32>}, {pipeline_mode = #tpu.pipeline_mode<synchronous>, transform_indices = @transform_10, window_bounds = array<i64: 32, 32>}, {pipeline_mode = #tpu.pipeline_mode<synchronous>, transform_indices = @transform_11, window_bounds = array<i64: 32, 32>}, {pipeline_mode = #tpu.pipeline_mode<synchronous>, transform_indices = @transform_12, window_bounds = array<i64: 1, 32>}, {pipeline_mode = #tpu.pipeline_mode<synchronous>, transform_indices = @transform_13, window_bounds = array<i64: 16, 32>}]} {
    %c0_i32 = arith.constant 0 : i32
    %0 = arith.cmpi eq, %arg0, %c0_i32 : i32
    %1 = arith.extui %0 : i1 to i32
    %c0_i32_0 = arith.constant 0 : i32
    %2 = arith.cmpi ne, %1, %c0_i32_0 : i32
    scf.if %2 {
      %c0_34 = arith.constant 0 : index
      %c0_35 = arith.constant 0 : index
      %46 = vector.load %arg5[%c0_34, %c0_35] : memref<16x32xf32, #tpu.memory_space<vmem>>, vector<16x32xf32>
      %c0_36 = arith.constant 0 : index
      %c0_37 = arith.constant 0 : index
      %47 = vector.load %arg12[%c0_36, %c0_37] : memref<32x32xf32, #tpu.memory_space<vmem>>, vector<32x32xf32>
      %cst_38 = arith.constant dense<0.000000e+00> : vector<16x32xf32>
      %48 = tpu.matmul %46, %47, %cst_38 {dimension_numbers = #tpu.dot_dimension_numbers<[1], [0], [0], [1], [0, 0, 1, 1], [], []>} : vector<16x32xf32>, vector<32x32xf32>, vector<16x32xf32> -> vector<16x32xf32>
      %c0_39 = arith.constant 0 : index
      %c0_40 = arith.constant 0 : index
      %49 = vector.load %arg13[%c0_39, %c0_40] : memref<1x32xf32, #tpu.memory_space<vmem>>, vector<1x32xf32>
      %50 = vector.broadcast %49 : vector<1x32xf32> to vector<16x32xf32>
      %51 = arith.addf %48, %50 : vector<16x32xf32>
      %c0_41 = arith.constant 0 : index
      %c0_42 = arith.constant 0 : index
      %52 = vector.load %arg14[%c0_41, %c0_42] : memref<16x32xf32, #tpu.memory_space<vmem>>, vector<16x32xf32>
      tpu.vector_store %arg14[%c0_41, %c0_42], %51 {strides = array<i32>} : memref<16x32xf32, #tpu.memory_space<vmem>>, vector<16x32xf32>,
    } else {
    }
    %3 = tpu.iota {dimensions = array<i32: 1>} : vector<32x16xi32>
    %c0 = arith.constant 0 : index
    %c0_1 = arith.constant 0 : index
    %4 = vector.load %arg1[%c0, %c0_1] : memref<32x1xi32, #tpu.memory_space<vmem>>, vector<32x1xi32>
    %5 = vector.broadcast %4 : vector<32x1xi32> to vector<32x16xi32>
    %6 = arith.cmpi eq, %3, %5 : vector<32x16xi32>
    %7 = arith.extui %6 : vector<32x16xi1> to vector<32x16xi32>
    %8 = arith.sitofp %7 : vector<32x16xi32> to vector<32x16xf32>
    %c0_2 = arith.constant 0 : index
    %c0_3 = arith.constant 0 : index
    %9 = vector.load %arg5[%c0_2, %c0_3] : memref<16x32xf32, #tpu.memory_space<vmem>>, vector<16x32xf32>
    %cst = arith.constant dense<0.000000e+00> : vector<32x32xf32>
    %10 = tpu.matmul %8, %9, %cst {dimension_numbers = #tpu.dot_dimension_numbers<[1], [0], [0], [1], [0, 0, 1, 1], [], []>} : vector<32x16xf32>, vector<16x32xf32>, vector<32x32xf32> -> vector<32x32xf32>
    %c0_4 = arith.constant 0 : index
    %c0_5 = arith.constant 0 : index
    %11 = vector.load %arg4[%c0_4, %c0_5] : memref<32x8xf32, #tpu.memory_space<vmem>>, vector<32x8xf32>
    %12 = arith.truncf %11 : vector<32x8xf32> to vector<32x8xbf16>
    %c0_6 = arith.constant 0 : index
    %c0_7 = arith.constant 0 : index
    %13 = vector.load %arg6[%c0_6, %c0_7] : memref<8x32xbf16, #tpu.memory_space<vmem>>, vector<8x32xbf16>
    %cst_8 = arith.constant dense<0.000000e+00> : vector<32x32xf32>
    %14 = tpu.matmul %12, %13, %cst_8 {dimension_numbers = #tpu.dot_dimension_numbers<[1], [0], [0], [1], [0, 0, 1, 1], [], []>} : vector<32x8xbf16>, vector<8x32xbf16>, vector<32x32xf32> -> vector<32x32xf32>
    %c0_9 = arith.constant 0 : index
    %c0_10 = arith.constant 0 : index
    %15 = vector.load %arg7[%c0_9, %c0_10] : memref<1x32xf32, #tpu.memory_space<vmem>>, vector<1x32xf32>
    %16 = vector.broadcast %15 : vector<1x32xf32> to vector<32x32xf32>
    %17 = arith.addf %14, %16 : vector<32x32xf32>
    %cst_11 = arith.constant 0.000000e+00 : f32
    %18 = vector.broadcast %cst_11 : f32 to vector<32x32xf32>
    %19 = arith.maximumf %17, %18 : vector<32x32xf32>
    %20 = arith.truncf %19 : vector<32x32xf32> to vector<32x32xbf16>
    %c0_12 = arith.constant 0 : index
    %c0_13 = arith.constant 0 : index
    %21 = vector.load %arg8[%c0_12, %c0_13] : memref<32x1024xbf16, #tpu.memory_space<vmem>>, vector<32x1024xbf16>
    %cst_14 = arith.constant dense<0.000000e+00> : vector<32x1024xf32>
    %22 = tpu.matmul %20, %21, %cst_14 {dimension_numbers = #tpu.dot_dimension_numbers<[1], [0], [0], [1], [0, 0, 1, 1], [], []>} : vector<32x32xbf16>, vector<32x1024xbf16>, vector<32x1024xf32> -> vector<32x1024xf32>
    %23 = arith.truncf %10 : vector<32x32xf32> to vector<32x32xbf16>
    %c0_15 = arith.constant 0 : index
    %c0_16 = arith.constant 0 : index
    %24 = vector.load %arg9[%c0_15, %c0_16] : memref<32x1024xbf16, #tpu.memory_space<vmem>>, vector<32x1024xbf16>
    %cst_17 = arith.constant dense<0.000000e+00> : vector<32x1024xf32>
    %25 = tpu.matmul %23, %24, %cst_17 {dimension_numbers = #tpu.dot_dimension_numbers<[1], [0], [0], [1], [0, 0, 1, 1], [], []>} : vector<32x32xbf16>, vector<32x1024xbf16>, vector<32x1024xf32> -> vector<32x1024xf32>
    %26 = arith.mulf %22, %25 : vector<32x1024xf32>
    %27 = arith.truncf %26 : vector<32x1024xf32> to vector<32x1024xbf16>
    %c0_18 = arith.constant 0 : index
    %c0_19 = arith.constant 0 : index
    %28 = vector.load %arg10[%c0_18, %c0_19] : memref<1024x32xbf16, #tpu.memory_space<vmem>>, vector<1024x32xbf16>
    %cst_20 = arith.constant dense<0.000000e+00> : vector<32x32xf32>
    %29 = tpu.matmul %27, %28, %cst_20 {dimension_numbers = #tpu.dot_dimension_numbers<[1], [0], [0], [1], [0, 0, 1, 1], [], []>} : vector<32x1024xbf16>, vector<1024x32xbf16>, vector<32x32xf32> -> vector<32x32xf32>
    %c0_21 = arith.constant 0 : index
    %c0_22 = arith.constant 0 : index
    %30 = vector.load %arg11[%c0_21, %c0_22] : memref<32x32xf32, #tpu.memory_space<vmem>>, vector<32x32xf32>
    %cst_23 = arith.constant dense<0.000000e+00> : vector<32x32xf32>
    %31 = tpu.matmul %10, %30, %cst_23 {dimension_numbers = #tpu.dot_dimension_numbers<[1], [0], [0], [1], [0, 0, 1, 1], [], []>} : vector<32x32xf32>, vector<32x32xf32>, vector<32x32xf32> -> vector<32x32xf32>
    %32 = arith.addf %29, %31 : vector<32x32xf32>
    %33 = tpu.iota {dimensions = array<i32: 0>} : vector<16x32xi32>
    %c0_24 = arith.constant 0 : index
    %c0_25 = arith.constant 0 : index
    %34 = vector.load %arg2[%c0_24, %c0_25] : memref<1x32xi32, #tpu.memory_space<vmem>>, vector<1x32xi32>
    %35 = vector.broadcast %34 : vector<1x32xi32> to vector<16x32xi32>
    %36 = arith.cmpi eq, %33, %35 : vector<16x32xi32>
    %c0_26 = arith.constant 0 : index
    %c0_27 = arith.constant 0 : index
    %37 = vector.load %arg3[%c0_26, %c0_27] : memref<1x32xf32, #tpu.memory_space<vmem>>, vector<1x32xf32>
    %cst_28 = arith.constant 0.000000e+00 : f32
    %38 = vector.shape_cast %37 : vector<1x32xf32> to vector<1x32xf32>
    %39 = vector.broadcast %38 : vector<1x32xf32> to vector<16x32xf32>
    %40 = vector.broadcast %cst_28 : f32 to vector<16x32xf32>
    %41 = arith.select %36, %39, %40 : vector<16x32xi1>, vector<16x32xf32>
    %c0_29 = arith.constant 0 : index
    %c0_30 = arith.constant 0 : index
    %42 = vector.load %arg14[%c0_29, %c0_30] : memref<16x32xf32, #tpu.memory_space<vmem>>, vector<16x32xf32>
    %cst_31 = arith.constant dense<0.000000e+00> : vector<16x32xf32>
    %43 = tpu.matmul %41, %32, %cst_31 {dimension_numbers = #tpu.dot_dimension_numbers<[1], [0], [0], [1], [0, 0, 1, 1], [], []>} : vector<16x32xf32>, vector<32x32xf32>, vector<16x32xf32> -> vector<16x32xf32>
    %44 = arith.addf %42, %43 : vector<16x32xf32>
    %c0_32 = arith.constant 0 : index
    %c0_33 = arith.constant 0 : index
    %45 = vector.load %arg14[%c0_32, %c0_33] : memref<16x32xf32, #tpu.memory_space<vmem>>, vector<16x32xf32>
    tpu.vector_store %arg14[%c0_32, %c0_33], %44 {strides = array<i32>} : memref<16x32xf32, #tpu.memory_space<vmem>>, vector<16x32xf32>,
    return
  }
  func.func @transform_0(%arg0: i32) -> (i32, i32) {
    %c0_i32 = arith.constant 0 : i32
    %c0_i32_0 = arith.constant 0 : i32
    return %arg0, %c0_i32 : i32, i32
  }
  func.func @transform_1(%arg0: i32) -> (i32, i32) {
    %c0_i32 = arith.constant 0 : i32
    %c0_i32_0 = arith.constant 0 : i32
    return %c0_i32, %arg0 : i32, i32
  }
  func.func @transform_2(%arg0: i32) -> (i32, i32) {
    %c0_i32 = arith.constant 0 : i32
    %c0_i32_0 = arith.constant 0 : i32
    return %c0_i32, %arg0 : i32, i32
  }
  func.func @transform_3(%arg0: i32) -> (i32, i32) {
    %c0_i32 = arith.constant 0 : i32
    %c0_i32_0 = arith.constant 0 : i32
    return %arg0, %c0_i32 : i32, i32
  }
  func.func @transform_4(%arg0: i32) -> (i32, i32) {
    %c0_i32 = arith.constant 0 : i32
    %c0_i32_0 = arith.constant 0 : i32
    %c0_i32_1 = arith.constant 0 : i32
    return %c0_i32, %c0_i32_0 : i32, i32
  }
  func.func @transform_5(%arg0: i32) -> (i32, i32) {
    %c0_i32 = arith.constant 0 : i32
    %c0_i32_0 = arith.constant 0 : i32
    %c0_i32_1 = arith.constant 0 : i32
    return %c0_i32, %c0_i32_0 : i32, i32
  }
  func.func @transform_6(%arg0: i32) -> (i32, i32) {
    %c0_i32 = arith.constant 0 : i32
    %c0_i32_0 = arith.constant 0 : i32
    %c0_i32_1 = arith.constant 0 : i32
    return %c0_i32, %c0_i32_0 : i32, i32
  }
  func.func @transform_7(%arg0: i32) -> (i32, i32) {
    %c0_i32 = arith.constant 0 : i32
    %c0_i32_0 = arith.constant 0 : i32
    %c0_i32_1 = arith.constant 0 : i32
    return %c0_i32, %c0_i32_0 : i32, i32
  }
  func.func @transform_8(%arg0: i32) -> (i32, i32) {
    %c0_i32 = arith.constant 0 : i32
    %c0_i32_0 = arith.constant 0 : i32
    %c0_i32_1 = arith.constant 0 : i32
    return %c0_i32, %c0_i32_0 : i32, i32
  }
  func.func @transform_9(%arg0: i32) -> (i32, i32) {
    %c0_i32 = arith.constant 0 : i32
    %c0_i32_0 = arith.constant 0 : i32
    %c0_i32_1 = arith.constant 0 : i32
    return %c0_i32, %c0_i32_0 : i32, i32
  }
  func.func @transform_10(%arg0: i32) -> (i32, i32) {
    %c0_i32 = arith.constant 0 : i32
    %c0_i32_0 = arith.constant 0 : i32
    %c0_i32_1 = arith.constant 0 : i32
    return %c0_i32, %c0_i32_0 : i32, i32
  }
  func.func @transform_11(%arg0: i32) -> (i32, i32) {
    %c0_i32 = arith.constant 0 : i32
    %c0_i32_0 = arith.constant 0 : i32
    %c0_i32_1 = arith.constant 0 : i32
    return %c0_i32, %c0_i32_0 : i32, i32
  }
  func.func @transform_12(%arg0: i32) -> (i32, i32) {
    %c0_i32 = arith.constant 0 : i32
    %c0_i32_0 = arith.constant 0 : i32
    %c0_i32_1 = arith.constant 0 : i32
    return %c0_i32, %c0_i32_0 : i32, i32
  }
  func.func @transform_13(%arg0: i32) -> (i32, i32) {
    %c0_i32 = arith.constant 0 : i32
    %c0_i32_0 = arith.constant 0 : i32
    %c0_i32_1 = arith.constant 0 : i32
    return %c0_i32, %c0_i32_0 : i32, i32
  }
}

module attributes {stable_mosaic.version = 11 : i64} {
  func.func @_dgn_gru_kernel(%arg0: i32, %arg1: memref<16x32xf32, #tpu.memory_space<vmem>>, %arg2: memref<16x32xf32, #tpu.memory_space<vmem>>, %arg3: memref<16x32xf32, #tpu.memory_space<vmem>>, %arg4: memref<32x10xf32, #tpu.memory_space<vmem>>, %arg5: memref<10x320xf32, #tpu.memory_space<vmem>>, %arg6: memref<32x320xf32, #tpu.memory_space<vmem>>, %arg7: memref<320x32xf32, #tpu.memory_space<vmem>>, %arg8: memref<32x32xf32, #tpu.memory_space<vmem>>, %arg9: memref<32x32xf32, #tpu.memory_space<vmem>>, %arg10: memref<32x32xf32, #tpu.memory_space<vmem>>, %arg11: memref<32x32xf32, #tpu.memory_space<vmem>>, %arg12: memref<32x32xf32, #tpu.memory_space<vmem>>, %arg13: memref<32x32xf32, #tpu.memory_space<vmem>>, %arg14: memref<1x32xf32, #tpu.memory_space<vmem>>, %arg15: memref<1x32xf32, #tpu.memory_space<vmem>>, %arg16: memref<1x32xf32, #tpu.memory_space<vmem>>, %arg17: memref<1x32xf32, #tpu.memory_space<vmem>>, %arg18: memref<1x32xf32, #tpu.memory_space<vmem>>, %arg19: memref<1x32xf32, #tpu.memory_space<vmem>>, %arg20: memref<16x32xf32, #tpu.memory_space<vmem>>, %arg21: memref<16x32xf32, #tpu.memory_space<vmem>>) attributes {dimension_semantics = [#tpu.dimension_semantics<arbitrary>], iteration_bounds = array<i64: 1>, scalar_prefetch = 0 : i64, scratch_operands = 0 : i64, tpu.core_type = #tpu.core_type<tc>, window_params = [{pipeline_mode = #tpu.pipeline_mode<synchronous>, transform_indices = @transform_0, window_bounds = array<i64: 16, 32>}, {pipeline_mode = #tpu.pipeline_mode<synchronous>, transform_indices = @transform_1, window_bounds = array<i64: 16, 32>}, {pipeline_mode = #tpu.pipeline_mode<synchronous>, transform_indices = @transform_2, window_bounds = array<i64: 16, 32>}, {pipeline_mode = #tpu.pipeline_mode<synchronous>, transform_indices = @transform_3, window_bounds = array<i64: 32, 10>}, {pipeline_mode = #tpu.pipeline_mode<synchronous>, transform_indices = @transform_4, window_bounds = array<i64: 10, 320>}, {pipeline_mode = #tpu.pipeline_mode<synchronous>, transform_indices = @transform_5, window_bounds = array<i64: 32, 320>}, {pipeline_mode = #tpu.pipeline_mode<synchronous>, transform_indices = @transform_6, window_bounds = array<i64: 320, 32>}, {pipeline_mode = #tpu.pipeline_mode<synchronous>, transform_indices = @transform_7, window_bounds = array<i64: 32, 32>}, {pipeline_mode = #tpu.pipeline_mode<synchronous>, transform_indices = @transform_8, window_bounds = array<i64: 32, 32>}, {pipeline_mode = #tpu.pipeline_mode<synchronous>, transform_indices = @transform_9, window_bounds = array<i64: 32, 32>}, {pipeline_mode = #tpu.pipeline_mode<synchronous>, transform_indices = @transform_10, window_bounds = array<i64: 32, 32>}, {pipeline_mode = #tpu.pipeline_mode<synchronous>, transform_indices = @transform_11, window_bounds = array<i64: 32, 32>}, {pipeline_mode = #tpu.pipeline_mode<synchronous>, transform_indices = @transform_12, window_bounds = array<i64: 32, 32>}, {pipeline_mode = #tpu.pipeline_mode<synchronous>, transform_indices = @transform_13, window_bounds = array<i64: 1, 32>}, {pipeline_mode = #tpu.pipeline_mode<synchronous>, transform_indices = @transform_14, window_bounds = array<i64: 1, 32>}, {pipeline_mode = #tpu.pipeline_mode<synchronous>, transform_indices = @transform_15, window_bounds = array<i64: 1, 32>}, {pipeline_mode = #tpu.pipeline_mode<synchronous>, transform_indices = @transform_16, window_bounds = array<i64: 1, 32>}, {pipeline_mode = #tpu.pipeline_mode<synchronous>, transform_indices = @transform_17, window_bounds = array<i64: 1, 32>}, {pipeline_mode = #tpu.pipeline_mode<synchronous>, transform_indices = @transform_18, window_bounds = array<i64: 1, 32>}, {pipeline_mode = #tpu.pipeline_mode<synchronous>, transform_indices = @transform_19, window_bounds = array<i64: 16, 32>}, {pipeline_mode = #tpu.pipeline_mode<synchronous>, transform_indices = @transform_20, window_bounds = array<i64: 16, 32>}]} {
    %c0 = arith.constant 0 : index
    %c0_0 = arith.constant 0 : index
    %0 = vector.load %arg1[%c0, %c0_0] : memref<16x32xf32, #tpu.memory_space<vmem>>, vector<16x32xf32>
    %c0_1 = arith.constant 0 : index
    %c0_2 = arith.constant 0 : index
    %1 = vector.load %arg4[%c0_1, %c0_2] : memref<32x10xf32, #tpu.memory_space<vmem>>, vector<32x10xf32>
    %cst = arith.constant dense<0.000000e+00> : vector<16x10xf32>
    %2 = tpu.matmul %0, %1, %cst {dimension_numbers = #tpu.dot_dimension_numbers<[1], [0], [0], [1], [0, 0, 1, 1], [], []>} : vector<16x32xf32>, vector<32x10xf32>, vector<16x10xf32> -> vector<16x10xf32>
    %cst_3 = arith.constant dense<0xFF800000> : vector<16xf32>
    %3 = vector.multi_reduction <maximumf>, %2, %cst_3 [1] : vector<16x10xf32> to vector<16xf32>
    %4 = vector.shape_cast %3 : vector<16xf32> to vector<16x1xf32>
    %5 = vector.broadcast %4 : vector<16x1xf32> to vector<16x10xf32>
    %6 = arith.subf %2, %5 : vector<16x10xf32>
    %7 = math.exp %6 : vector<16x10xf32>
    %cst_4 = arith.constant dense<0.000000e+00> : vector<16xf32>
    %8 = vector.multi_reduction <add>, %7, %cst_4 [1] : vector<16x10xf32> to vector<16xf32>
    %9 = vector.shape_cast %8 : vector<16xf32> to vector<16x1xf32>
    %10 = vector.broadcast %9 : vector<16x1xf32> to vector<16x10xf32>
    %11 = arith.divf %7, %10 : vector<16x10xf32>
    %c0_5 = arith.constant 0 : index
    %c0_6 = arith.constant 0 : index
    %12 = vector.load %arg5[%c0_5, %c0_6] : memref<10x320xf32, #tpu.memory_space<vmem>>, vector<10x320xf32>
    %cst_7 = arith.constant dense<0.000000e+00> : vector<16x320xf32>
    %13 = tpu.matmul %11, %12, %cst_7 {dimension_numbers = #tpu.dot_dimension_numbers<[1], [0], [0], [1], [0, 0, 1, 1], [], []>} : vector<16x10xf32>, vector<10x320xf32>, vector<16x320xf32> -> vector<16x320xf32>
    %c0_8 = arith.constant 0 : index
    %c0_9 = arith.constant 0 : index
    %14 = vector.load %arg6[%c0_8, %c0_9] : memref<32x320xf32, #tpu.memory_space<vmem>>, vector<32x320xf32>
    %cst_10 = arith.constant dense<0.000000e+00> : vector<16x320xf32>
    %15 = tpu.matmul %0, %14, %cst_10 {dimension_numbers = #tpu.dot_dimension_numbers<[1], [0], [0], [1], [0, 0, 1, 1], [], []>} : vector<16x32xf32>, vector<32x320xf32>, vector<16x320xf32> -> vector<16x320xf32>
    %16 = arith.mulf %13, %15 : vector<16x320xf32>
    %cst_11 = arith.constant dense<0.000000e+00> : vector<320xf32>
    %17 = vector.multi_reduction <add>, %16, %cst_11 [0] : vector<16x320xf32> to vector<320xf32>
    %18 = vector.shape_cast %17 : vector<320xf32> to vector<1x320xf32>
    %cst_12 = arith.constant 6.250000e-02 : f32
    %19 = vector.broadcast %cst_12 : f32 to vector<1x320xf32>
    %20 = arith.mulf %18, %19 : vector<1x320xf32>
    %21 = vector.broadcast %20 : vector<1x320xf32> to vector<16x320xf32>
    %22 = arith.subf %16, %21 : vector<16x320xf32>
    %23 = arith.mulf %22, %22 : vector<16x320xf32>
    %cst_13 = arith.constant dense<0.000000e+00> : vector<320xf32>
    %24 = vector.multi_reduction <add>, %23, %cst_13 [0] : vector<16x320xf32> to vector<320xf32>
    %25 = vector.shape_cast %24 : vector<320xf32> to vector<1x320xf32>
    %cst_14 = arith.constant 6.250000e-02 : f32
    %26 = vector.broadcast %cst_14 : f32 to vector<1x320xf32>
    %27 = arith.mulf %25, %26 : vector<1x320xf32>
    %cst_15 = arith.constant 9.99999974E-6 : f32
    %28 = vector.broadcast %cst_15 : f32 to vector<1x320xf32>
    %29 = arith.addf %27, %28 : vector<1x320xf32>
    %30 = math.rsqrt %29 : vector<1x320xf32>
    %31 = vector.broadcast %30 : vector<1x320xf32> to vector<16x320xf32>
    %32 = arith.mulf %22, %31 : vector<16x320xf32>
    %c0_16 = arith.constant 0 : index
    %c0_17 = arith.constant 0 : index
    %33 = vector.load %arg7[%c0_16, %c0_17] : memref<320x32xf32, #tpu.memory_space<vmem>>, vector<320x32xf32>
    %cst_18 = arith.constant dense<0.000000e+00> : vector<16x32xf32>
    %34 = tpu.matmul %32, %33, %cst_18 {dimension_numbers = #tpu.dot_dimension_numbers<[1], [0], [0], [1], [0, 0, 1, 1], [], []>} : vector<16x320xf32>, vector<320x32xf32>, vector<16x32xf32> -> vector<16x32xf32>
    %cst_19 = arith.constant 0.00999999977 : f32
    %35 = vector.broadcast %cst_19 : f32 to vector<16x32xf32>
    %36 = arith.mulf %35, %34 : vector<16x32xf32>
    %37 = arith.addf %0, %36 : vector<16x32xf32>
    %cst_20 = arith.constant 0.000000e+00 : f32
    %38 = vector.broadcast %cst_20 : f32 to vector<16x32xf32>
    %39 = arith.maximumf %37, %38 : vector<16x32xf32>
    %c0_21 = arith.constant 0 : index
    %c0_22 = arith.constant 0 : index
    %40 = vector.load %arg2[%c0_21, %c0_22] : memref<16x32xf32, #tpu.memory_space<vmem>>, vector<16x32xf32>
    %c0_23 = arith.constant 0 : index
    %c0_24 = arith.constant 0 : index
    %41 = vector.load %arg8[%c0_23, %c0_24] : memref<32x32xf32, #tpu.memory_space<vmem>>, vector<32x32xf32>
    %cst_25 = arith.constant dense<0.000000e+00> : vector<16x32xf32>
    %42 = tpu.matmul %39, %41, %cst_25 {dimension_numbers = #tpu.dot_dimension_numbers<[1], [0], [0], [1], [0, 0, 1, 1], [], []>} : vector<16x32xf32>, vector<32x32xf32>, vector<16x32xf32> -> vector<16x32xf32>
    %c0_26 = arith.constant 0 : index
    %c0_27 = arith.constant 0 : index
    %43 = vector.load %arg14[%c0_26, %c0_27] : memref<1x32xf32, #tpu.memory_space<vmem>>, vector<1x32xf32>
    %44 = vector.broadcast %43 : vector<1x32xf32> to vector<16x32xf32>
    %45 = arith.addf %42, %44 : vector<16x32xf32>
    %c0_28 = arith.constant 0 : index
    %c0_29 = arith.constant 0 : index
    %46 = vector.load %arg9[%c0_28, %c0_29] : memref<32x32xf32, #tpu.memory_space<vmem>>, vector<32x32xf32>
    %cst_30 = arith.constant dense<0.000000e+00> : vector<16x32xf32>
    %47 = tpu.matmul %39, %46, %cst_30 {dimension_numbers = #tpu.dot_dimension_numbers<[1], [0], [0], [1], [0, 0, 1, 1], [], []>} : vector<16x32xf32>, vector<32x32xf32>, vector<16x32xf32> -> vector<16x32xf32>
    %c0_31 = arith.constant 0 : index
    %c0_32 = arith.constant 0 : index
    %48 = vector.load %arg15[%c0_31, %c0_32] : memref<1x32xf32, #tpu.memory_space<vmem>>, vector<1x32xf32>
    %49 = vector.broadcast %48 : vector<1x32xf32> to vector<16x32xf32>
    %50 = arith.addf %47, %49 : vector<16x32xf32>
    %c0_33 = arith.constant 0 : index
    %c0_34 = arith.constant 0 : index
    %51 = vector.load %arg10[%c0_33, %c0_34] : memref<32x32xf32, #tpu.memory_space<vmem>>, vector<32x32xf32>
    %cst_35 = arith.constant dense<0.000000e+00> : vector<16x32xf32>
    %52 = tpu.matmul %39, %51, %cst_35 {dimension_numbers = #tpu.dot_dimension_numbers<[1], [0], [0], [1], [0, 0, 1, 1], [], []>} : vector<16x32xf32>, vector<32x32xf32>, vector<16x32xf32> -> vector<16x32xf32>
    %c0_36 = arith.constant 0 : index
    %c0_37 = arith.constant 0 : index
    %53 = vector.load %arg16[%c0_36, %c0_37] : memref<1x32xf32, #tpu.memory_space<vmem>>, vector<1x32xf32>
    %54 = vector.broadcast %53 : vector<1x32xf32> to vector<16x32xf32>
    %55 = arith.addf %52, %54 : vector<16x32xf32>
    %c0_38 = arith.constant 0 : index
    %c0_39 = arith.constant 0 : index
    %56 = vector.load %arg11[%c0_38, %c0_39] : memref<32x32xf32, #tpu.memory_space<vmem>>, vector<32x32xf32>
    %cst_40 = arith.constant dense<0.000000e+00> : vector<16x32xf32>
    %57 = tpu.matmul %40, %56, %cst_40 {dimension_numbers = #tpu.dot_dimension_numbers<[1], [0], [0], [1], [0, 0, 1, 1], [], []>} : vector<16x32xf32>, vector<32x32xf32>, vector<16x32xf32> -> vector<16x32xf32>
    %c0_41 = arith.constant 0 : index
    %c0_42 = arith.constant 0 : index
    %58 = vector.load %arg17[%c0_41, %c0_42] : memref<1x32xf32, #tpu.memory_space<vmem>>, vector<1x32xf32>
    %59 = vector.broadcast %58 : vector<1x32xf32> to vector<16x32xf32>
    %60 = arith.addf %57, %59 : vector<16x32xf32>
    %c0_43 = arith.constant 0 : index
    %c0_44 = arith.constant 0 : index
    %61 = vector.load %arg12[%c0_43, %c0_44] : memref<32x32xf32, #tpu.memory_space<vmem>>, vector<32x32xf32>
    %cst_45 = arith.constant dense<0.000000e+00> : vector<16x32xf32>
    %62 = tpu.matmul %40, %61, %cst_45 {dimension_numbers = #tpu.dot_dimension_numbers<[1], [0], [0], [1], [0, 0, 1, 1], [], []>} : vector<16x32xf32>, vector<32x32xf32>, vector<16x32xf32> -> vector<16x32xf32>
    %c0_46 = arith.constant 0 : index
    %c0_47 = arith.constant 0 : index
    %63 = vector.load %arg18[%c0_46, %c0_47] : memref<1x32xf32, #tpu.memory_space<vmem>>, vector<1x32xf32>
    %64 = vector.broadcast %63 : vector<1x32xf32> to vector<16x32xf32>
    %65 = arith.addf %62, %64 : vector<16x32xf32>
    %c0_48 = arith.constant 0 : index
    %c0_49 = arith.constant 0 : index
    %66 = vector.load %arg13[%c0_48, %c0_49] : memref<32x32xf32, #tpu.memory_space<vmem>>, vector<32x32xf32>
    %cst_50 = arith.constant dense<0.000000e+00> : vector<16x32xf32>
    %67 = tpu.matmul %40, %66, %cst_50 {dimension_numbers = #tpu.dot_dimension_numbers<[1], [0], [0], [1], [0, 0, 1, 1], [], []>} : vector<16x32xf32>, vector<32x32xf32>, vector<16x32xf32> -> vector<16x32xf32>
    %c0_51 = arith.constant 0 : index
    %c0_52 = arith.constant 0 : index
    %68 = vector.load %arg19[%c0_51, %c0_52] : memref<1x32xf32, #tpu.memory_space<vmem>>, vector<1x32xf32>
    %69 = vector.broadcast %68 : vector<1x32xf32> to vector<16x32xf32>
    %70 = arith.addf %67, %69 : vector<16x32xf32>
    %71 = arith.addf %45, %60 : vector<16x32xf32>
    %72 = arith.negf %71 : vector<16x32xf32>
    %73 = math.exp %72 : vector<16x32xf32>
    %cst_53 = arith.constant 1.000000e+00 : f32
    %74 = vector.broadcast %cst_53 : f32 to vector<16x32xf32>
    %75 = arith.addf %74, %73 : vector<16x32xf32>
    %76 = arith.divf %74, %75 : vector<16x32xf32>
    %77 = arith.addf %50, %65 : vector<16x32xf32>
    %78 = arith.negf %77 : vector<16x32xf32>
    %79 = math.exp %78 : vector<16x32xf32>
    %cst_54 = arith.constant 1.000000e+00 : f32
    %80 = vector.broadcast %cst_54 : f32 to vector<16x32xf32>
    %81 = arith.addf %80, %79 : vector<16x32xf32>
    %82 = arith.divf %80, %81 : vector<16x32xf32>
    %83 = arith.mulf %76, %70 : vector<16x32xf32>
    %84 = arith.addf %55, %83 : vector<16x32xf32>
    %85 = math.tanh %84 : vector<16x32xf32>
    %cst_55 = arith.constant 1.000000e+00 : f32
    %86 = vector.broadcast %cst_55 : f32 to vector<16x32xf32>
    %87 = arith.subf %86, %82 : vector<16x32xf32>
    %88 = arith.mulf %87, %85 : vector<16x32xf32>
    %89 = arith.mulf %82, %40 : vector<16x32xf32>
    %90 = arith.addf %88, %89 : vector<16x32xf32>
    %c0_56 = arith.constant 0 : index
    %c0_57 = arith.constant 0 : index
    %91 = vector.load %arg21[%c0_56, %c0_57] : memref<16x32xf32, #tpu.memory_space<vmem>>, vector<16x32xf32>
    tpu.vector_store %arg21[%c0_56, %c0_57], %90 {strides = array<i32>} : memref<16x32xf32, #tpu.memory_space<vmem>>, vector<16x32xf32>,
    %c0_58 = arith.constant 0 : index
    %c0_59 = arith.constant 0 : index
    %92 = vector.load %arg3[%c0_58, %c0_59] : memref<16x32xf32, #tpu.memory_space<vmem>>, vector<16x32xf32>
    %93 = arith.addf %90, %92 : vector<16x32xf32>
    %c0_60 = arith.constant 0 : index
    %c0_61 = arith.constant 0 : index
    %94 = vector.load %arg20[%c0_60, %c0_61] : memref<16x32xf32, #tpu.memory_space<vmem>>, vector<16x32xf32>
    tpu.vector_store %arg20[%c0_60, %c0_61], %93 {strides = array<i32>} : memref<16x32xf32, #tpu.memory_space<vmem>>, vector<16x32xf32>,
    return
  }
  func.func @transform_0(%arg0: i32) -> (i32, i32) {
    %c0_i32 = arith.constant 0 : i32
    %c0_i32_0 = arith.constant 0 : i32
    %c0_i32_1 = arith.constant 0 : i32
    return %c0_i32, %c0_i32_0 : i32, i32
  }
  func.func @transform_1(%arg0: i32) -> (i32, i32) {
    %c0_i32 = arith.constant 0 : i32
    %c0_i32_0 = arith.constant 0 : i32
    %c0_i32_1 = arith.constant 0 : i32
    return %c0_i32, %c0_i32_0 : i32, i32
  }
  func.func @transform_2(%arg0: i32) -> (i32, i32) {
    %c0_i32 = arith.constant 0 : i32
    %c0_i32_0 = arith.constant 0 : i32
    %c0_i32_1 = arith.constant 0 : i32
    return %c0_i32, %c0_i32_0 : i32, i32
  }
  func.func @transform_3(%arg0: i32) -> (i32, i32) {
    %c0_i32 = arith.constant 0 : i32
    %c0_i32_0 = arith.constant 0 : i32
    %c0_i32_1 = arith.constant 0 : i32
    return %c0_i32, %c0_i32_0 : i32, i32
  }
  func.func @transform_4(%arg0: i32) -> (i32, i32) {
    %c0_i32 = arith.constant 0 : i32
    %c0_i32_0 = arith.constant 0 : i32
    %c0_i32_1 = arith.constant 0 : i32
    return %c0_i32, %c0_i32_0 : i32, i32
  }
  func.func @transform_5(%arg0: i32) -> (i32, i32) {
    %c0_i32 = arith.constant 0 : i32
    %c0_i32_0 = arith.constant 0 : i32
    %c0_i32_1 = arith.constant 0 : i32
    return %c0_i32, %c0_i32_0 : i32, i32
  }
  func.func @transform_6(%arg0: i32) -> (i32, i32) {
    %c0_i32 = arith.constant 0 : i32
    %c0_i32_0 = arith.constant 0 : i32
    %c0_i32_1 = arith.constant 0 : i32
    return %c0_i32, %c0_i32_0 : i32, i32
  }
  func.func @transform_7(%arg0: i32) -> (i32, i32) {
    %c0_i32 = arith.constant 0 : i32
    %c0_i32_0 = arith.constant 0 : i32
    %c0_i32_1 = arith.constant 0 : i32
    return %c0_i32, %c0_i32_0 : i32, i32
  }
  func.func @transform_8(%arg0: i32) -> (i32, i32) {
    %c0_i32 = arith.constant 0 : i32
    %c0_i32_0 = arith.constant 0 : i32
    %c0_i32_1 = arith.constant 0 : i32
    return %c0_i32, %c0_i32_0 : i32, i32
  }
  func.func @transform_9(%arg0: i32) -> (i32, i32) {
    %c0_i32 = arith.constant 0 : i32
    %c0_i32_0 = arith.constant 0 : i32
    %c0_i32_1 = arith.constant 0 : i32
    return %c0_i32, %c0_i32_0 : i32, i32
  }
  func.func @transform_10(%arg0: i32) -> (i32, i32) {
    %c0_i32 = arith.constant 0 : i32
    %c0_i32_0 = arith.constant 0 : i32
    %c0_i32_1 = arith.constant 0 : i32
    return %c0_i32, %c0_i32_0 : i32, i32
  }
  func.func @transform_11(%arg0: i32) -> (i32, i32) {
    %c0_i32 = arith.constant 0 : i32
    %c0_i32_0 = arith.constant 0 : i32
    %c0_i32_1 = arith.constant 0 : i32
    return %c0_i32, %c0_i32_0 : i32, i32
  }
  func.func @transform_12(%arg0: i32) -> (i32, i32) {
    %c0_i32 = arith.constant 0 : i32
    %c0_i32_0 = arith.constant 0 : i32
    %c0_i32_1 = arith.constant 0 : i32
    return %c0_i32, %c0_i32_0 : i32, i32
  }
  func.func @transform_13(%arg0: i32) -> (i32, i32) {
    %c0_i32 = arith.constant 0 : i32
    %c0_i32_0 = arith.constant 0 : i32
    %c0_i32_1 = arith.constant 0 : i32
    return %c0_i32, %c0_i32_0 : i32, i32
  }
  func.func @transform_14(%arg0: i32) -> (i32, i32) {
    %c0_i32 = arith.constant 0 : i32
    %c0_i32_0 = arith.constant 0 : i32
    %c0_i32_1 = arith.constant 0 : i32
    return %c0_i32, %c0_i32_0 : i32, i32
  }
  func.func @transform_15(%arg0: i32) -> (i32, i32) {
    %c0_i32 = arith.constant 0 : i32
    %c0_i32_0 = arith.constant 0 : i32
    %c0_i32_1 = arith.constant 0 : i32
    return %c0_i32, %c0_i32_0 : i32, i32
  }
  func.func @transform_16(%arg0: i32) -> (i32, i32) {
    %c0_i32 = arith.constant 0 : i32
    %c0_i32_0 = arith.constant 0 : i32
    %c0_i32_1 = arith.constant 0 : i32
    return %c0_i32, %c0_i32_0 : i32, i32
  }
  func.func @transform_17(%arg0: i32) -> (i32, i32) {
    %c0_i32 = arith.constant 0 : i32
    %c0_i32_0 = arith.constant 0 : i32
    %c0_i32_1 = arith.constant 0 : i32
    return %c0_i32, %c0_i32_0 : i32, i32
  }
  func.func @transform_18(%arg0: i32) -> (i32, i32) {
    %c0_i32 = arith.constant 0 : i32
    %c0_i32_0 = arith.constant 0 : i32
    %c0_i32_1 = arith.constant 0 : i32
    return %c0_i32, %c0_i32_0 : i32, i32
  }
  func.func @transform_19(%arg0: i32) -> (i32, i32) {
    %c0_i32 = arith.constant 0 : i32
    %c0_i32_0 = arith.constant 0 : i32
    %c0_i32_1 = arith.constant 0 : i32
    return %c0_i32, %c0_i32_0 : i32, i32
  }
  func.func @transform_20(%arg0: i32) -> (i32, i32) {
    %c0_i32 = arith.constant 0 : i32
    %c0_i32_0 = arith.constant 0 : i32
    %c0_i32_1 = arith.constant 0 : i32
    return %c0_i32, %c0_i32_0 : i32, i32
  }
}

module attributes {stable_mosaic.version = 11 : i64} {
  func.func @_dgn_gru_kernel(%arg0: i32, %arg1: memref<16x32xf32, #tpu.memory_space<vmem>>, %arg2: memref<16x32xf32, #tpu.memory_space<vmem>>, %arg3: memref<16x32xf32, #tpu.memory_space<vmem>>, %arg4: memref<32x10xf32, #tpu.memory_space<vmem>>, %arg5: memref<10x320xf32, #tpu.memory_space<vmem>>, %arg6: memref<32x320xf32, #tpu.memory_space<vmem>>, %arg7: memref<320x32xf32, #tpu.memory_space<vmem>>, %arg8: memref<32x32xf32, #tpu.memory_space<vmem>>, %arg9: memref<32x32xf32, #tpu.memory_space<vmem>>, %arg10: memref<32x32xf32, #tpu.memory_space<vmem>>, %arg11: memref<32x32xf32, #tpu.memory_space<vmem>>, %arg12: memref<32x32xf32, #tpu.memory_space<vmem>>, %arg13: memref<32x32xf32, #tpu.memory_space<vmem>>, %arg14: memref<1x32xf32, #tpu.memory_space<vmem>>, %arg15: memref<1x32xf32, #tpu.memory_space<vmem>>, %arg16: memref<1x32xf32, #tpu.memory_space<vmem>>, %arg17: memref<1x32xf32, #tpu.memory_space<vmem>>, %arg18: memref<1x32xf32, #tpu.memory_space<vmem>>, %arg19: memref<1x32xf32, #tpu.memory_space<vmem>>, %arg20: memref<16x32xf32, #tpu.memory_space<vmem>>, %arg21: memref<16x32xf32, #tpu.memory_space<vmem>>) attributes {dimension_semantics = [#tpu.dimension_semantics<arbitrary>], iteration_bounds = array<i64: 1>, scalar_prefetch = 0 : i64, scratch_operands = 0 : i64, tpu.core_type = #tpu.core_type<tc>, window_params = [{pipeline_mode = #tpu.pipeline_mode<synchronous>, transform_indices = @transform_0, window_bounds = array<i64: 16, 32>}, {pipeline_mode = #tpu.pipeline_mode<synchronous>, transform_indices = @transform_1, window_bounds = array<i64: 16, 32>}, {pipeline_mode = #tpu.pipeline_mode<synchronous>, transform_indices = @transform_2, window_bounds = array<i64: 16, 32>}, {pipeline_mode = #tpu.pipeline_mode<synchronous>, transform_indices = @transform_3, window_bounds = array<i64: 32, 10>}, {pipeline_mode = #tpu.pipeline_mode<synchronous>, transform_indices = @transform_4, window_bounds = array<i64: 10, 320>}, {pipeline_mode = #tpu.pipeline_mode<synchronous>, transform_indices = @transform_5, window_bounds = array<i64: 32, 320>}, {pipeline_mode = #tpu.pipeline_mode<synchronous>, transform_indices = @transform_6, window_bounds = array<i64: 320, 32>}, {pipeline_mode = #tpu.pipeline_mode<synchronous>, transform_indices = @transform_7, window_bounds = array<i64: 32, 32>}, {pipeline_mode = #tpu.pipeline_mode<synchronous>, transform_indices = @transform_8, window_bounds = array<i64: 32, 32>}, {pipeline_mode = #tpu.pipeline_mode<synchronous>, transform_indices = @transform_9, window_bounds = array<i64: 32, 32>}, {pipeline_mode = #tpu.pipeline_mode<synchronous>, transform_indices = @transform_10, window_bounds = array<i64: 32, 32>}, {pipeline_mode = #tpu.pipeline_mode<synchronous>, transform_indices = @transform_11, window_bounds = array<i64: 32, 32>}, {pipeline_mode = #tpu.pipeline_mode<synchronous>, transform_indices = @transform_12, window_bounds = array<i64: 32, 32>}, {pipeline_mode = #tpu.pipeline_mode<synchronous>, transform_indices = @transform_13, window_bounds = array<i64: 1, 32>}, {pipeline_mode = #tpu.pipeline_mode<synchronous>, transform_indices = @transform_14, window_bounds = array<i64: 1, 32>}, {pipeline_mode = #tpu.pipeline_mode<synchronous>, transform_indices = @transform_15, window_bounds = array<i64: 1, 32>}, {pipeline_mode = #tpu.pipeline_mode<synchronous>, transform_indices = @transform_16, window_bounds = array<i64: 1, 32>}, {pipeline_mode = #tpu.pipeline_mode<synchronous>, transform_indices = @transform_17, window_bounds = array<i64: 1, 32>}, {pipeline_mode = #tpu.pipeline_mode<synchronous>, transform_indices = @transform_18, window_bounds = array<i64: 1, 32>}, {pipeline_mode = #tpu.pipeline_mode<synchronous>, transform_indices = @transform_19, window_bounds = array<i64: 16, 32>}, {pipeline_mode = #tpu.pipeline_mode<synchronous>, transform_indices = @transform_20, window_bounds = array<i64: 16, 32>}]} {
    %c0 = arith.constant 0 : index
    %c0_0 = arith.constant 0 : index
    %0 = vector.load %arg1[%c0, %c0_0] : memref<16x32xf32, #tpu.memory_space<vmem>>, vector<16x32xf32>
    %c0_1 = arith.constant 0 : index
    %c0_2 = arith.constant 0 : index
    %1 = vector.load %arg4[%c0_1, %c0_2] : memref<32x10xf32, #tpu.memory_space<vmem>>, vector<32x10xf32>
    %cst = arith.constant dense<0.000000e+00> : vector<16x10xf32>
    %2 = tpu.matmul %0, %1, %cst {dimension_numbers = #tpu.dot_dimension_numbers<[1], [0], [0], [1], [0, 0, 1, 1], [], []>} : vector<16x32xf32>, vector<32x10xf32>, vector<16x10xf32> -> vector<16x10xf32>
    %cst_3 = arith.constant dense<0xFF800000> : vector<16xf32>
    %3 = vector.multi_reduction <maximumf>, %2, %cst_3 [1] : vector<16x10xf32> to vector<16xf32>
    %4 = vector.shape_cast %3 : vector<16xf32> to vector<16x1xf32>
    %5 = vector.broadcast %4 : vector<16x1xf32> to vector<16x10xf32>
    %6 = arith.subf %2, %5 : vector<16x10xf32>
    %7 = math.exp %6 : vector<16x10xf32>
    %cst_4 = arith.constant dense<0.000000e+00> : vector<16xf32>
    %8 = vector.multi_reduction <add>, %7, %cst_4 [1] : vector<16x10xf32> to vector<16xf32>
    %9 = vector.shape_cast %8 : vector<16xf32> to vector<16x1xf32>
    %10 = vector.broadcast %9 : vector<16x1xf32> to vector<16x10xf32>
    %11 = arith.divf %7, %10 : vector<16x10xf32>
    %c0_5 = arith.constant 0 : index
    %c0_6 = arith.constant 0 : index
    %12 = vector.load %arg5[%c0_5, %c0_6] : memref<10x320xf32, #tpu.memory_space<vmem>>, vector<10x320xf32>
    %cst_7 = arith.constant dense<0.000000e+00> : vector<16x320xf32>
    %13 = tpu.matmul %11, %12, %cst_7 {dimension_numbers = #tpu.dot_dimension_numbers<[1], [0], [0], [1], [0, 0, 1, 1], [], []>} : vector<16x10xf32>, vector<10x320xf32>, vector<16x320xf32> -> vector<16x320xf32>
    %c0_8 = arith.constant 0 : index
    %c0_9 = arith.constant 0 : index
    %14 = vector.load %arg6[%c0_8, %c0_9] : memref<32x320xf32, #tpu.memory_space<vmem>>, vector<32x320xf32>
    %cst_10 = arith.constant dense<0.000000e+00> : vector<16x320xf32>
    %15 = tpu.matmul %0, %14, %cst_10 {dimension_numbers = #tpu.dot_dimension_numbers<[1], [0], [0], [1], [0, 0, 1, 1], [], []>} : vector<16x32xf32>, vector<32x320xf32>, vector<16x320xf32> -> vector<16x320xf32>
    %16 = arith.mulf %13, %15 : vector<16x320xf32>
    %cst_11 = arith.constant dense<0.000000e+00> : vector<320xf32>
    %17 = vector.multi_reduction <add>, %16, %cst_11 [0] : vector<16x320xf32> to vector<320xf32>
    %18 = vector.shape_cast %17 : vector<320xf32> to vector<1x320xf32>
    %cst_12 = arith.constant 6.250000e-02 : f32
    %19 = vector.broadcast %cst_12 : f32 to vector<1x320xf32>
    %20 = arith.mulf %18, %19 : vector<1x320xf32>
    %21 = vector.broadcast %20 : vector<1x320xf32> to vector<16x320xf32>
    %22 = arith.subf %16, %21 : vector<16x320xf32>
    %23 = arith.mulf %22, %22 : vector<16x320xf32>
    %cst_13 = arith.constant dense<0.000000e+00> : vector<320xf32>
    %24 = vector.multi_reduction <add>, %23, %cst_13 [0] : vector<16x320xf32> to vector<320xf32>
    %25 = vector.shape_cast %24 : vector<320xf32> to vector<1x320xf32>
    %cst_14 = arith.constant 6.250000e-02 : f32
    %26 = vector.broadcast %cst_14 : f32 to vector<1x320xf32>
    %27 = arith.mulf %25, %26 : vector<1x320xf32>
    %cst_15 = arith.constant 9.99999974E-6 : f32
    %28 = vector.broadcast %cst_15 : f32 to vector<1x320xf32>
    %29 = arith.addf %27, %28 : vector<1x320xf32>
    %30 = math.rsqrt %29 : vector<1x320xf32>
    %31 = vector.broadcast %30 : vector<1x320xf32> to vector<16x320xf32>
    %32 = arith.mulf %22, %31 : vector<16x320xf32>
    %c0_16 = arith.constant 0 : index
    %c0_17 = arith.constant 0 : index
    %33 = vector.load %arg7[%c0_16, %c0_17] : memref<320x32xf32, #tpu.memory_space<vmem>>, vector<320x32xf32>
    %cst_18 = arith.constant dense<0.000000e+00> : vector<16x32xf32>
    %34 = tpu.matmul %32, %33, %cst_18 {dimension_numbers = #tpu.dot_dimension_numbers<[1], [0], [0], [1], [0, 0, 1, 1], [], []>} : vector<16x320xf32>, vector<320x32xf32>, vector<16x32xf32> -> vector<16x32xf32>
    %cst_19 = arith.constant 0.00999999977 : f32
    %35 = vector.broadcast %cst_19 : f32 to vector<16x32xf32>
    %36 = arith.mulf %35, %34 : vector<16x32xf32>
    %37 = arith.addf %0, %36 : vector<16x32xf32>
    %cst_20 = arith.constant 0.000000e+00 : f32
    %38 = vector.broadcast %cst_20 : f32 to vector<16x32xf32>
    %39 = arith.maximumf %37, %38 : vector<16x32xf32>
    %c0_21 = arith.constant 0 : index
    %c0_22 = arith.constant 0 : index
    %40 = vector.load %arg2[%c0_21, %c0_22] : memref<16x32xf32, #tpu.memory_space<vmem>>, vector<16x32xf32>
    %c0_23 = arith.constant 0 : index
    %c0_24 = arith.constant 0 : index
    %41 = vector.load %arg8[%c0_23, %c0_24] : memref<32x32xf32, #tpu.memory_space<vmem>>, vector<32x32xf32>
    %cst_25 = arith.constant dense<0.000000e+00> : vector<16x32xf32>
    %42 = tpu.matmul %39, %41, %cst_25 {dimension_numbers = #tpu.dot_dimension_numbers<[1], [0], [0], [1], [0, 0, 1, 1], [], []>} : vector<16x32xf32>, vector<32x32xf32>, vector<16x32xf32> -> vector<16x32xf32>
    %c0_26 = arith.constant 0 : index
    %c0_27 = arith.constant 0 : index
    %43 = vector.load %arg14[%c0_26, %c0_27] : memref<1x32xf32, #tpu.memory_space<vmem>>, vector<1x32xf32>
    %44 = vector.broadcast %43 : vector<1x32xf32> to vector<16x32xf32>
    %45 = arith.addf %42, %44 : vector<16x32xf32>
    %c0_28 = arith.constant 0 : index
    %c0_29 = arith.constant 0 : index
    %46 = vector.load %arg9[%c0_28, %c0_29] : memref<32x32xf32, #tpu.memory_space<vmem>>, vector<32x32xf32>
    %cst_30 = arith.constant dense<0.000000e+00> : vector<16x32xf32>
    %47 = tpu.matmul %39, %46, %cst_30 {dimension_numbers = #tpu.dot_dimension_numbers<[1], [0], [0], [1], [0, 0, 1, 1], [], []>} : vector<16x32xf32>, vector<32x32xf32>, vector<16x32xf32> -> vector<16x32xf32>
    %c0_31 = arith.constant 0 : index
    %c0_32 = arith.constant 0 : index
    %48 = vector.load %arg15[%c0_31, %c0_32] : memref<1x32xf32, #tpu.memory_space<vmem>>, vector<1x32xf32>
    %49 = vector.broadcast %48 : vector<1x32xf32> to vector<16x32xf32>
    %50 = arith.addf %47, %49 : vector<16x32xf32>
    %c0_33 = arith.constant 0 : index
    %c0_34 = arith.constant 0 : index
    %51 = vector.load %arg10[%c0_33, %c0_34] : memref<32x32xf32, #tpu.memory_space<vmem>>, vector<32x32xf32>
    %cst_35 = arith.constant dense<0.000000e+00> : vector<16x32xf32>
    %52 = tpu.matmul %39, %51, %cst_35 {dimension_numbers = #tpu.dot_dimension_numbers<[1], [0], [0], [1], [0, 0, 1, 1], [], []>} : vector<16x32xf32>, vector<32x32xf32>, vector<16x32xf32> -> vector<16x32xf32>
    %c0_36 = arith.constant 0 : index
    %c0_37 = arith.constant 0 : index
    %53 = vector.load %arg16[%c0_36, %c0_37] : memref<1x32xf32, #tpu.memory_space<vmem>>, vector<1x32xf32>
    %54 = vector.broadcast %53 : vector<1x32xf32> to vector<16x32xf32>
    %55 = arith.addf %52, %54 : vector<16x32xf32>
    %c0_38 = arith.constant 0 : index
    %c0_39 = arith.constant 0 : index
    %56 = vector.load %arg11[%c0_38, %c0_39] : memref<32x32xf32, #tpu.memory_space<vmem>>, vector<32x32xf32>
    %cst_40 = arith.constant dense<0.000000e+00> : vector<16x32xf32>
    %57 = tpu.matmul %40, %56, %cst_40 {dimension_numbers = #tpu.dot_dimension_numbers<[1], [0], [0], [1], [0, 0, 1, 1], [], []>} : vector<16x32xf32>, vector<32x32xf32>, vector<16x32xf32> -> vector<16x32xf32>
    %c0_41 = arith.constant 0 : index
    %c0_42 = arith.constant 0 : index
    %58 = vector.load %arg17[%c0_41, %c0_42] : memref<1x32xf32, #tpu.memory_space<vmem>>, vector<1x32xf32>
    %59 = vector.broadcast %58 : vector<1x32xf32> to vector<16x32xf32>
    %60 = arith.addf %57, %59 : vector<16x32xf32>
    %c0_43 = arith.constant 0 : index
    %c0_44 = arith.constant 0 : index
    %61 = vector.load %arg12[%c0_43, %c0_44] : memref<32x32xf32, #tpu.memory_space<vmem>>, vector<32x32xf32>
    %cst_45 = arith.constant dense<0.000000e+00> : vector<16x32xf32>
    %62 = tpu.matmul %40, %61, %cst_45 {dimension_numbers = #tpu.dot_dimension_numbers<[1], [0], [0], [1], [0, 0, 1, 1], [], []>} : vector<16x32xf32>, vector<32x32xf32>, vector<16x32xf32> -> vector<16x32xf32>
    %c0_46 = arith.constant 0 : index
    %c0_47 = arith.constant 0 : index
    %63 = vector.load %arg18[%c0_46, %c0_47] : memref<1x32xf32, #tpu.memory_space<vmem>>, vector<1x32xf32>
    %64 = vector.broadcast %63 : vector<1x32xf32> to vector<16x32xf32>
    %65 = arith.addf %62, %64 : vector<16x32xf32>
    %c0_48 = arith.constant 0 : index
    %c0_49 = arith.constant 0 : index
    %66 = vector.load %arg13[%c0_48, %c0_49] : memref<32x32xf32, #tpu.memory_space<vmem>>, vector<32x32xf32>
    %cst_50 = arith.constant dense<0.000000e+00> : vector<16x32xf32>
    %67 = tpu.matmul %40, %66, %cst_50 {dimension_numbers = #tpu.dot_dimension_numbers<[1], [0], [0], [1], [0, 0, 1, 1], [], []>} : vector<16x32xf32>, vector<32x32xf32>, vector<16x32xf32> -> vector<16x32xf32>
    %c0_51 = arith.constant 0 : index
    %c0_52 = arith.constant 0 : index
    %68 = vector.load %arg19[%c0_51, %c0_52] : memref<1x32xf32, #tpu.memory_space<vmem>>, vector<1x32xf32>
    %69 = vector.broadcast %68 : vector<1x32xf32> to vector<16x32xf32>
    %70 = arith.addf %67, %69 : vector<16x32xf32>
    %71 = arith.addf %45, %60 : vector<16x32xf32>
    %72 = arith.negf %71 : vector<16x32xf32>
    %73 = math.exp %72 : vector<16x32xf32>
    %cst_53 = arith.constant 1.000000e+00 : f32
    %74 = vector.broadcast %cst_53 : f32 to vector<16x32xf32>
    %75 = arith.addf %74, %73 : vector<16x32xf32>
    %76 = arith.divf %74, %75 : vector<16x32xf32>
    %77 = arith.addf %50, %65 : vector<16x32xf32>
    %78 = arith.negf %77 : vector<16x32xf32>
    %79 = math.exp %78 : vector<16x32xf32>
    %cst_54 = arith.constant 1.000000e+00 : f32
    %80 = vector.broadcast %cst_54 : f32 to vector<16x32xf32>
    %81 = arith.addf %80, %79 : vector<16x32xf32>
    %82 = arith.divf %80, %81 : vector<16x32xf32>
    %83 = arith.mulf %76, %70 : vector<16x32xf32>
    %84 = arith.addf %55, %83 : vector<16x32xf32>
    %85 = math.tanh %84 : vector<16x32xf32>
    %cst_55 = arith.constant 1.000000e+00 : f32
    %86 = vector.broadcast %cst_55 : f32 to vector<16x32xf32>
    %87 = arith.subf %86, %82 : vector<16x32xf32>
    %88 = arith.mulf %87, %85 : vector<16x32xf32>
    %89 = arith.mulf %82, %40 : vector<16x32xf32>
    %90 = arith.addf %88, %89 : vector<16x32xf32>
    %c0_56 = arith.constant 0 : index
    %c0_57 = arith.constant 0 : index
    %91 = vector.load %arg21[%c0_56, %c0_57] : memref<16x32xf32, #tpu.memory_space<vmem>>, vector<16x32xf32>
    tpu.vector_store %arg21[%c0_56, %c0_57], %90 {strides = array<i32>} : memref<16x32xf32, #tpu.memory_space<vmem>>, vector<16x32xf32>,
    %c0_58 = arith.constant 0 : index
    %c0_59 = arith.constant 0 : index
    %92 = vector.load %arg3[%c0_58, %c0_59] : memref<16x32xf32, #tpu.memory_space<vmem>>, vector<16x32xf32>
    %93 = arith.addf %90, %92 : vector<16x32xf32>
    %c0_60 = arith.constant 0 : index
    %c0_61 = arith.constant 0 : index
    %94 = vector.load %arg20[%c0_60, %c0_61] : memref<16x32xf32, #tpu.memory_space<vmem>>, vector<16x32xf32>
    tpu.vector_store %arg20[%c0_60, %c0_61], %93 {strides = array<i32>} : memref<16x32xf32, #tpu.memory_space<vmem>>, vector<16x32xf32>,
    return
  }
  func.func @transform_0(%arg0: i32) -> (i32, i32) {
    %c0_i32 = arith.constant 0 : i32
    %c0_i32_0 = arith.constant 0 : i32
    %c0_i32_1 = arith.constant 0 : i32
    return %c0_i32, %c0_i32_0 : i32, i32
  }
  func.func @transform_1(%arg0: i32) -> (i32, i32) {
    %c0_i32 = arith.constant 0 : i32
    %c0_i32_0 = arith.constant 0 : i32
    %c0_i32_1 = arith.constant 0 : i32
    return %c0_i32, %c0_i32_0 : i32, i32
  }
  func.func @transform_2(%arg0: i32) -> (i32, i32) {
    %c0_i32 = arith.constant 0 : i32
    %c0_i32_0 = arith.constant 0 : i32
    %c0_i32_1 = arith.constant 0 : i32
    return %c0_i32, %c0_i32_0 : i32, i32
  }
  func.func @transform_3(%arg0: i32) -> (i32, i32) {
    %c0_i32 = arith.constant 0 : i32
    %c0_i32_0 = arith.constant 0 : i32
    %c0_i32_1 = arith.constant 0 : i32
    return %c0_i32, %c0_i32_0 : i32, i32
  }
  func.func @transform_4(%arg0: i32) -> (i32, i32) {
    %c0_i32 = arith.constant 0 : i32
    %c0_i32_0 = arith.constant 0 : i32
    %c0_i32_1 = arith.constant 0 : i32
    return %c0_i32, %c0_i32_0 : i32, i32
  }
  func.func @transform_5(%arg0: i32) -> (i32, i32) {
    %c0_i32 = arith.constant 0 : i32
    %c0_i32_0 = arith.constant 0 : i32
    %c0_i32_1 = arith.constant 0 : i32
    return %c0_i32, %c0_i32_0 : i32, i32
  }
  func.func @transform_6(%arg0: i32) -> (i32, i32) {
    %c0_i32 = arith.constant 0 : i32
    %c0_i32_0 = arith.constant 0 : i32
    %c0_i32_1 = arith.constant 0 : i32
    return %c0_i32, %c0_i32_0 : i32, i32
  }
  func.func @transform_7(%arg0: i32) -> (i32, i32) {
    %c0_i32 = arith.constant 0 : i32
    %c0_i32_0 = arith.constant 0 : i32
    %c0_i32_1 = arith.constant 0 : i32
    return %c0_i32, %c0_i32_0 : i32, i32
  }
  func.func @transform_8(%arg0: i32) -> (i32, i32) {
    %c0_i32 = arith.constant 0 : i32
    %c0_i32_0 = arith.constant 0 : i32
    %c0_i32_1 = arith.constant 0 : i32
    return %c0_i32, %c0_i32_0 : i32, i32
  }
  func.func @transform_9(%arg0: i32) -> (i32, i32) {
    %c0_i32 = arith.constant 0 : i32
    %c0_i32_0 = arith.constant 0 : i32
    %c0_i32_1 = arith.constant 0 : i32
    return %c0_i32, %c0_i32_0 : i32, i32
  }
  func.func @transform_10(%arg0: i32) -> (i32, i32) {
    %c0_i32 = arith.constant 0 : i32
    %c0_i32_0 = arith.constant 0 : i32
    %c0_i32_1 = arith.constant 0 : i32
    return %c0_i32, %c0_i32_0 : i32, i32
  }
  func.func @transform_11(%arg0: i32) -> (i32, i32) {
    %c0_i32 = arith.constant 0 : i32
    %c0_i32_0 = arith.constant 0 : i32
    %c0_i32_1 = arith.constant 0 : i32
    return %c0_i32, %c0_i32_0 : i32, i32
  }
  func.func @transform_12(%arg0: i32) -> (i32, i32) {
    %c0_i32 = arith.constant 0 : i32
    %c0_i32_0 = arith.constant 0 : i32
    %c0_i32_1 = arith.constant 0 : i32
    return %c0_i32, %c0_i32_0 : i32, i32
  }
  func.func @transform_13(%arg0: i32) -> (i32, i32) {
    %c0_i32 = arith.constant 0 : i32
    %c0_i32_0 = arith.constant 0 : i32
    %c0_i32_1 = arith.constant 0 : i32
    return %c0_i32, %c0_i32_0 : i32, i32
  }
  func.func @transform_14(%arg0: i32) -> (i32, i32) {
    %c0_i32 = arith.constant 0 : i32
    %c0_i32_0 = arith.constant 0 : i32
    %c0_i32_1 = arith.constant 0 : i32
    return %c0_i32, %c0_i32_0 : i32, i32
  }
  func.func @transform_15(%arg0: i32) -> (i32, i32) {
    %c0_i32 = arith.constant 0 : i32
    %c0_i32_0 = arith.constant 0 : i32
    %c0_i32_1 = arith.constant 0 : i32
    return %c0_i32, %c0_i32_0 : i32, i32
  }
  func.func @transform_16(%arg0: i32) -> (i32, i32) {
    %c0_i32 = arith.constant 0 : i32
    %c0_i32_0 = arith.constant 0 : i32
    %c0_i32_1 = arith.constant 0 : i32
    return %c0_i32, %c0_i32_0 : i32, i32
  }
  func.func @transform_17(%arg0: i32) -> (i32, i32) {
    %c0_i32 = arith.constant 0 : i32
    %c0_i32_0 = arith.constant 0 : i32
    %c0_i32_1 = arith.constant 0 : i32
    return %c0_i32, %c0_i32_0 : i32, i32
  }
  func.func @transform_18(%arg0: i32) -> (i32, i32) {
    %c0_i32 = arith.constant 0 : i32
    %c0_i32_0 = arith.constant 0 : i32
    %c0_i32_1 = arith.constant 0 : i32
    return %c0_i32, %c0_i32_0 : i32, i32
  }
  func.func @transform_19(%arg0: i32) -> (i32, i32) {
    %c0_i32 = arith.constant 0 : i32
    %c0_i32_0 = arith.constant 0 : i32
    %c0_i32_1 = arith.constant 0 : i32
    return %c0_i32, %c0_i32_0 : i32, i32
  }
  func.func @transform_20(%arg0: i32) -> (i32, i32) {
    %c0_i32 = arith.constant 0 : i32
    %c0_i32_0 = arith.constant 0 : i32
    %c0_i32_1 = arith.constant 0 : i32
    return %c0_i32, %c0_i32_0 : i32, i32
  }
}

module attributes {stable_mosaic.version = 11 : i64} {
  func.func @_pool_post_kernel(%arg0: i32, %arg1: memref<1x16xi32, #tpu.memory_space<vmem>>, %arg2: memref<1x16xf32, #tpu.memory_space<vmem>>, %arg3: memref<16x32xf32, #tpu.memory_space<vmem>>, %arg4: memref<32x32xf32, #tpu.memory_space<vmem>>, %arg5: memref<1x32xf32, #tpu.memory_space<vmem>>, %arg6: memref<32x1xf32, #tpu.memory_space<vmem>>, %arg7: memref<1x1xf32, #tpu.memory_space<vmem>>, %arg8: memref<2x1xf32, #tpu.memory_space<vmem>>) attributes {dimension_semantics = [#tpu.dimension_semantics<arbitrary>], iteration_bounds = array<i64: 1>, scalar_prefetch = 0 : i64, scratch_operands = 0 : i64, tpu.core_type = #tpu.core_type<tc>, window_params = [{pipeline_mode = #tpu.pipeline_mode<synchronous>, transform_indices = @transform_0, window_bounds = array<i64: 1, 16>}, {pipeline_mode = #tpu.pipeline_mode<synchronous>, transform_indices = @transform_1, window_bounds = array<i64: 1, 16>}, {pipeline_mode = #tpu.pipeline_mode<synchronous>, transform_indices = @transform_2, window_bounds = array<i64: 16, 32>}, {pipeline_mode = #tpu.pipeline_mode<synchronous>, transform_indices = @transform_3, window_bounds = array<i64: 32, 32>}, {pipeline_mode = #tpu.pipeline_mode<synchronous>, transform_indices = @transform_4, window_bounds = array<i64: 1, 32>}, {pipeline_mode = #tpu.pipeline_mode<synchronous>, transform_indices = @transform_5, window_bounds = array<i64: 32, 1>}, {pipeline_mode = #tpu.pipeline_mode<synchronous>, transform_indices = @transform_6, window_bounds = array<i64: 1, 1>}, {pipeline_mode = #tpu.pipeline_mode<synchronous>, transform_indices = @transform_7, window_bounds = array<i64: 2, 1>}]} {
    %0 = tpu.iota {dimensions = array<i32: 0>} : vector<2x16xi32>
    %c0 = arith.constant 0 : index
    %c0_0 = arith.constant 0 : index
    %1 = vector.load %arg1[%c0, %c0_0] : memref<1x16xi32, #tpu.memory_space<vmem>>, vector<1x16xi32>
    %2 = vector.broadcast %1 : vector<1x16xi32> to vector<2x16xi32>
    %3 = arith.cmpi eq, %0, %2 : vector<2x16xi32>
    %c0_1 = arith.constant 0 : index
    %c0_2 = arith.constant 0 : index
    %4 = vector.load %arg2[%c0_1, %c0_2] : memref<1x16xf32, #tpu.memory_space<vmem>>, vector<1x16xf32>
    %cst = arith.constant 0.000000e+00 : f32
    %5 = vector.shape_cast %4 : vector<1x16xf32> to vector<1x16xf32>
    %6 = vector.broadcast %5 : vector<1x16xf32> to vector<2x16xf32>
    %7 = vector.broadcast %cst : f32 to vector<2x16xf32>
    %8 = arith.select %3, %6, %7 : vector<2x16xi1>, vector<2x16xf32>
    %c0_3 = arith.constant 0 : index
    %c0_4 = arith.constant 0 : index
    %9 = vector.load %arg3[%c0_3, %c0_4] : memref<16x32xf32, #tpu.memory_space<vmem>>, vector<16x32xf32>
    %cst_5 = arith.constant dense<0.000000e+00> : vector<2x32xf32>
    %10 = tpu.matmul %8, %9, %cst_5 {dimension_numbers = #tpu.dot_dimension_numbers<[1], [0], [0], [1], [0, 0, 1, 1], [], []>} : vector<2x16xf32>, vector<16x32xf32>, vector<2x32xf32> -> vector<2x32xf32>
    %c0_6 = arith.constant 0 : index
    %c0_7 = arith.constant 0 : index
    %11 = vector.load %arg4[%c0_6, %c0_7] : memref<32x32xf32, #tpu.memory_space<vmem>>, vector<32x32xf32>
    %cst_8 = arith.constant dense<0.000000e+00> : vector<2x32xf32>
    %12 = tpu.matmul %10, %11, %cst_8 {dimension_numbers = #tpu.dot_dimension_numbers<[1], [0], [0], [1], [0, 0, 1, 1], [], []>} : vector<2x32xf32>, vector<32x32xf32>, vector<2x32xf32> -> vector<2x32xf32>
    %c0_9 = arith.constant 0 : index
    %c0_10 = arith.constant 0 : index
    %13 = vector.load %arg5[%c0_9, %c0_10] : memref<1x32xf32, #tpu.memory_space<vmem>>, vector<1x32xf32>
    %14 = vector.broadcast %13 : vector<1x32xf32> to vector<2x32xf32>
    %15 = arith.addf %12, %14 : vector<2x32xf32>
    %cst_11 = arith.constant 0.000000e+00 : f32
    %16 = vector.broadcast %cst_11 : f32 to vector<2x32xf32>
    %17 = arith.maximumf %15, %16 : vector<2x32xf32>
    %c0_12 = arith.constant 0 : index
    %c0_13 = arith.constant 0 : index
    %18 = vector.load %arg6[%c0_12, %c0_13] : memref<32x1xf32, #tpu.memory_space<vmem>>, vector<32x1xf32>
    %cst_14 = arith.constant dense<0.000000e+00> : vector<2x1xf32>
    %19 = tpu.matmul %17, %18, %cst_14 {dimension_numbers = #tpu.dot_dimension_numbers<[1], [0], [0], [1], [0, 0, 1, 1], [], []>} : vector<2x32xf32>, vector<32x1xf32>, vector<2x1xf32> -> vector<2x1xf32>
    %c0_15 = arith.constant 0 : index
    %c0_16 = arith.constant 0 : index
    %20 = vector.load %arg7[%c0_15, %c0_16] : memref<1x1xf32, #tpu.memory_space<vmem>>, vector<1x1xf32>
    %21 = vector.broadcast %20 : vector<1x1xf32> to vector<2x1xf32>
    %22 = arith.addf %19, %21 : vector<2x1xf32>
    %c0_17 = arith.constant 0 : index
    %c0_18 = arith.constant 0 : index
    %23 = vector.load %arg8[%c0_17, %c0_18] : memref<2x1xf32, #tpu.memory_space<vmem>>, vector<2x1xf32>
    tpu.vector_store %arg8[%c0_17, %c0_18], %22 {strides = array<i32>} : memref<2x1xf32, #tpu.memory_space<vmem>>, vector<2x1xf32>,
    return
  }
  func.func @transform_0(%arg0: i32) -> (i32, i32) {
    %c0_i32 = arith.constant 0 : i32
    %c0_i32_0 = arith.constant 0 : i32
    %c0_i32_1 = arith.constant 0 : i32
    return %c0_i32, %c0_i32_0 : i32, i32
  }
  func.func @transform_1(%arg0: i32) -> (i32, i32) {
    %c0_i32 = arith.constant 0 : i32
    %c0_i32_0 = arith.constant 0 : i32
    %c0_i32_1 = arith.constant 0 : i32
    return %c0_i32, %c0_i32_0 : i32, i32
  }
  func.func @transform_2(%arg0: i32) -> (i32, i32) {
    %c0_i32 = arith.constant 0 : i32
    %c0_i32_0 = arith.constant 0 : i32
    %c0_i32_1 = arith.constant 0 : i32
    return %c0_i32, %c0_i32_0 : i32, i32
  }
  func.func @transform_3(%arg0: i32) -> (i32, i32) {
    %c0_i32 = arith.constant 0 : i32
    %c0_i32_0 = arith.constant 0 : i32
    %c0_i32_1 = arith.constant 0 : i32
    return %c0_i32, %c0_i32_0 : i32, i32
  }
  func.func @transform_4(%arg0: i32) -> (i32, i32) {
    %c0_i32 = arith.constant 0 : i32
    %c0_i32_0 = arith.constant 0 : i32
    %c0_i32_1 = arith.constant 0 : i32
    return %c0_i32, %c0_i32_0 : i32, i32
  }
  func.func @transform_5(%arg0: i32) -> (i32, i32) {
    %c0_i32 = arith.constant 0 : i32
    %c0_i32_0 = arith.constant 0 : i32
    %c0_i32_1 = arith.constant 0 : i32
    return %c0_i32, %c0_i32_0 : i32, i32
  }
  func.func @transform_6(%arg0: i32) -> (i32, i32) {
    %c0_i32 = arith.constant 0 : i32
    %c0_i32_0 = arith.constant 0 : i32
    %c0_i32_1 = arith.constant 0 : i32
    return %c0_i32, %c0_i32_0 : i32, i32
  }
  func.func @transform_7(%arg0: i32) -> (i32, i32) {
    %c0_i32 = arith.constant 0 : i32
    %c0_i32_0 = arith.constant 0 : i32
    %c0_i32_1 = arith.constant 0 : i32
    return %c0_i32, %c0_i32_0 : i32, i32
  }
}

</mosaic_0001>

<bundles_post_ra>
// kernel: tile.54
= control target key start
LH: loop header
LB: loop body
LE: loop exit
PB: predicated region body
PF: predicated region fallthrough
CT: control target
= control target key end

     0   :  { %vm166_vm0 = vcmask 1043458   ;;  %s206_s6 = smov 3  ;;  %vm171_vm1 = vcmask 1045508   ;;  %vm176_vm2 = vcmask 1047558   ;;  %s209_s9 = smov 12  ;;  %vm3_vm3 = vcmask 261120   ;;  %s1800_s0 = inlined_call_operand.vmem [shape: f32[32,10,32], index: 0, kind: input, shape index: {}]   ;;  %s1801_s1 = inlined_call_operand.vmem [shape: f32[32,320], index: 1, kind: output, shape index: {}]  }
   0x1   :  { %v872_v0 = vld [vmem:[%s1800_s0 + $0x7] ss:$16 sm:%s206_s6]   ;;  %s214_s10 = smov 48  ;;  %s219_s15 = smov 192  ;;  %vm180_vm4 = vcmask 1048320   ;;  %vm363_vm5 = vcmask 785920  }
   0x2   :  { %v873_v1 = vld [vmem:[%s1800_s0 + $0x7] ss:$16 sm:%s209_s9]   ;;  %s161_s16 = smov 3  ;;  %s164_s21 = smov 12  ;;  %vm546_vm6 = vcmask 523520  }
   0x3   :  { %v874_v2 = vld [vmem:[%s1800_s0 + $0x7] ss:$16 sm:%s214_s10]   ;;  %v212_v3 = vsel %vm166_vm0, %v873_v1, %v872_v0  ;;  %v863_v5 = vld [vmem:[%s1800_s0 + $0x3] ss:$16 sm:%s161_s16]   ;;  %s169_s22 = smov 48  ;;  %s174_s27 = smov 192 }
   0x4   :  { %v875_v4 = vld [vmem:[%s1800_s0 + $0x7] ss:$16 sm:%s219_s15]   ;;  %v217_v6 = vsel %vm171_vm1, %v874_v2, %v212_v3  ;;  %v864_v7 = vld [vmem:[%s1800_s0 + $0x3] ss:$16 sm:%s164_s21]   ;;  %s229_s28 = smov 3  ;;  %s232_s4 = smov 12 }
   0x5   :  { %v865_v8 = vld [vmem:[%s1800_s0 + $0x3] ss:$16 sm:%s169_s22]   ;;  %v222_v9 = vsel %vm176_vm2, %v875_v4, %v217_v6  ;;  %v167_v10 = vsel %vm166_vm0, %v864_v7, %v863_v5  ;;  %s237_s5 = smov 48  ;;  %s1003_s6 = smov 96  }
   0x6   :  { %v866_v11 = vld [vmem:[%s1800_s0 + $0x3] ss:$16 sm:%s174_s27]   ;;  %223 = vrot.lane.b32.xlu1 %v222_v9, %s1003_s6  ;;  %v172_v13 = vsel %vm171_vm1, %v865_v8, %v167_v10  ;;  %s242_s9 = smov 192  ;;  %s183_s10 = smov 3 }
   0x7   :  { %v877_v12 = vld [vmem:[%s1800_s0 + $0x183] ss:$16 sm:%s229_s28]   ;;  %v177_v15 = vsel %vm176_vm2, %v866_v11, %v172_v13  ;;  %s186_s15 = smov 12  ;;  %s191_s16 = smov 48  ;;  %v867_v20 = vld [vmem:[%s1800_s0 + $0x87] ss:$16 sm:%s183_s10]  }
   0x8   :  { %v878_v14 = vld [vmem:[%s1800_s0 + $0x183] ss:$16 sm:%s232_s4]   ;;  %178 = vrot.lane.b32.xlu0 %v177_v15, %s1003_s6  ;;  %s196_s19 = smov 192  ;;  %s275_s20 = smov 3 }
   0x9   :  { %v235_v16 = vsel %vm166_vm0, %v878_v14, %v877_v12  ;;  %v879_v17 = vld [vmem:[%s1800_s0 + $0x183] ss:$16 sm:%s237_s5]   ;;  %v868_v22 = vld [vmem:[%s1800_s0 + $0x87] ss:$16 sm:%s186_s15]   ;;  %s278_s25 = smov 12  ;;  %s283_s26 = smov 48 }
   0xa   :  { %v880_v18 = vld [vmem:[%s1800_s0 + $0x183] ss:$16 sm:%s242_s9]   ;;  %v240_v19 = vsel %vm171_vm1, %v879_v17, %v235_v16  ;;  %v869_v23 = vld [vmem:[%s1800_s0 + $0x87] ss:$16 sm:%s191_s16]   ;;  %v189_v24 = vsel %vm166_vm0, %v868_v22, %v867_v20  ;;  %s288_s29 = smov 192  ;;  %s252_s30 = smov 3 }
   0xb   :  { %v245_v21 = vsel %vm176_vm2, %v880_v18, %v240_v19  ;;  %v870_v25 = vld [vmem:[%s1800_s0 + $0x87] ss:$16 sm:%s196_s19]   ;;  %v194_v26 = vsel %vm171_vm1, %v869_v23, %v189_v24  ;;  %s255_s7 = smov 12  ;;  %s260_s8 = smov 48  ;;  %v882_v34 = vld [vmem:[%s1800_s0 + $0x103] ss:$16 sm:%s252_s30]  }
   0xc   :  { %246 = vrot.lane.b32.xlu1 %v245_v21, %s1003_s6  ;;  %v887_v27 = vld [vmem:[%s1800_s0 + $0x187] ss:$16 sm:%s275_s20]   ;;  %v199_v29 = vsel %vm176_vm2, %v870_v25, %v194_v26  ;;  %s265_s13 = smov 192  ;;  %s321_s16 = smov 3 }
   0xd   :  { %v888_v28 = vld [vmem:[%s1800_s0 + $0x187] ss:$16 sm:%s278_s25]   ;;  %200 = vrot.lane.b32.xlu0 %v199_v29, %s1003_s6  ;;  %s324_s17 = smov 12  ;;  %s329_s22 = smov 48 }
   0xe   :  { %v281_v30 = vsel %vm166_vm0, %v888_v28, %v887_v27  ;;  %v889_v31 = vld [vmem:[%s1800_s0 + $0x187] ss:$16 sm:%s283_s26]   ;;  %v883_v36 = vld [vmem:[%s1800_s0 + $0x103] ss:$16 sm:%s255_s7]   ;;  %s334_s23 = smov 192  ;;  %s298_s26 = smov 3 }
   0xf   :  { %v890_v32 = vld [vmem:[%s1800_s0 + $0x187] ss:$16 sm:%s288_s29]   ;;  %v286_v33 = vsel %vm171_vm1, %v889_v31, %v281_v30  ;;  %v884_v37 = vld [vmem:[%s1800_s0 + $0x103] ss:$16 sm:%s260_s8]   ;;  %v258_v38 = vsel %vm166_vm0, %v883_v36, %v882_v34  ;;  %s301_s2 = smov 12  ;;  %s306_s3 = smov 48 }
  0x10   :  { %v291_v35 = vsel %vm176_vm2, %v890_v32, %v286_v33  ;;  %v885_v39 = vld [vmem:[%s1800_s0 + $0x103] ss:$16 sm:%s265_s13]   ;;  %v263_v40 = vsel %vm171_vm1, %v884_v37, %v258_v38  ;;  %v897_v41 = vld [vmem:[%s1800_s0 + $0x107] ss:$16 sm:%s321_s16]   ;;  %s311_s9 = smov 192  ;;  %s366_s12 = smov 3 }
  0x11   :  { %292 = vrot.lane.b32.xlu1 %v291_v35, %s1003_s6  ;;  %v898_v42 = vld [vmem:[%s1800_s0 + $0x107] ss:$16 sm:%s324_s17]   ;;  %v268_v43 = vsel %vm176_vm2, %v885_v39, %v263_v40  ;;  %s369_s13 = smov 12  ;;  %s374_s18 = smov 48 }
  0x12   :  { %v327_v44 = vsel %vm166_vm0, %v898_v42, %v897_v41  ;;  %v899_v45 = vld [vmem:[%s1800_s0 + $0x107] ss:$16 sm:%s329_s22]   ;;  %269 = vrot.lane.b32.xlu0 %v268_v43, %s1003_s6  ;;  %s379_s19 = smov 192  ;;  %s344_s22 = smov 3 }
  0x13   :  { %v900_v46 = vld [vmem:[%s1800_s0 + $0x107] ss:$16 sm:%s334_s23]   ;;  %v332_v47 = vsel %vm171_vm1, %v899_v45, %v327_v44  ;;  %v892_v48 = vld [vmem:[%s1800_s0 + $0x83] ss:$16 sm:%s298_s26]   ;;  %s347_s27 = smov 12  ;;  %s352_s28 = smov 48 }
  0x14   :  { %v337_v49 = vsel %vm176_vm2, %v900_v46, %v332_v47  ;;  %v893_v50 = vld [vmem:[%s1800_s0 + $0x83] ss:$16 sm:%s301_s2]   ;;  %v906_v55 = vld [vmem:[%s1800_s0 + $0x86] ss:$16 sm:%s366_s12]   ;;  %s357_s4 = smov 192  ;;  %s412_s7 = smov 3 }
  0x15   :  { %v894_v51 = vld [vmem:[%s1800_s0 + $0x83] ss:$16 sm:%s306_s3]   ;;  %338 = vrot.lane.b32.xlu1 %v337_v49, %s1003_s6  ;;  %v304_v52 = vsel %vm166_vm0, %v893_v50, %v892_v48  ;;  %s415_s8 = smov 12  ;;  %s425_s14 = smov 192 }
  0x16   :  { %v895_v53 = vld [vmem:[%s1800_s0 + $0x83] ss:$16 sm:%s311_s9]   ;;  %v309_v54 = vsel %vm171_vm1, %v894_v51, %v304_v52  ;;  %v907_v56 = vld [vmem:[%s1800_s0 + $0x86] ss:$16 sm:%s369_s13]   ;;  %s420_s13 = smov 48  ;;  %s1004_s15 = smov 64  }
  0x17   :  { %v314_v57 = vsel %vm176_vm2, %v895_v53, %v309_v54  ;;  %v372_v58 = vsel %vm166_vm0, %v907_v56, %v906_v55  ;;  %v908_v59 = vld [vmem:[%s1800_s0 + $0x86] ss:$16 sm:%s374_s18]   ;;  %v902_v62 = vld [vmem:[%s1800_s0 + $0x2] ss:$16 sm:%s344_s22]   ;;  %s389_s18 = smov 3  ;;  %s392_s23 = smov 12 }
  0x18   :  { %v909_v60 = vld [vmem:[%s1800_s0 + $0x86] ss:$16 sm:%s379_s19]   ;;  %315 = vrot.lane.b32.xlu0 %v314_v57, %s1003_s6  ;;  %v377_v61 = vsel %vm171_vm1, %v908_v59, %v372_v58  ;;  %s397_s24 = smov 48  ;;  %s402_s29 = smov 192 }
  0x19   :  { %v382_v63 = vsel %vm176_vm2, %v909_v60, %v377_v61  ;;  %v903_v0 = vld [vmem:[%s1800_s0 + $0x2] ss:$16 sm:%s347_s27]   ;;  %v911_v12 = vld [vmem:[%s1800_s0 + $0x6] ss:$16 sm:%s389_s18]   ;;  %s458_s3 = smov 3  ;;  %s466_s9 = smov 48 }
  0x1a   :  { %v904_v1 = vld [vmem:[%s1800_s0 + $0x2] ss:$16 sm:%s352_s28]   ;;  %383 = vrot.lane.b32.xlu1 %v382_v63, %s1004_s15  ;;  %v350_v2 = vsel %vm166_vm0, %v903_v0, %v902_v62  ;;  %s471_s10 = smov 192  ;;  %s438_s19 = smov 12 }
  0x1b   :  { %v905_v3 = vld [vmem:[%s1800_s0 + $0x2] ss:$16 sm:%s357_s4]   ;;  %v355_v4 = vsel %vm171_vm1, %v904_v1, %v350_v2  ;;  %s461_s4 = smov 12  ;;  %v912_v14 = vld [vmem:[%s1800_s0 + $0x6] ss:$16 sm:%s392_s23]   ;;  %s443_s20 = smov 48 }
  0x1c   :  { %v916_v5 = vld [vmem:[%s1800_s0 + $0x182] ss:$16 sm:%s412_s7]   ;;  %v360_v7 = vsel %vm176_vm2, %v905_v3, %v355_v4  ;;  %v913_v15 = vld [vmem:[%s1800_s0 + $0x6] ss:$16 sm:%s397_s24]   ;;  %v395_v16 = vsel %vm166_vm0, %v912_v14, %v911_v12  ;;  %s448_s25 = smov 192  ;;  %s504_s28 = smov 3 }
  0x1d   :  { %v917_v6 = vld [vmem:[%s1800_s0 + $0x182] ss:$16 sm:%s415_s8]   ;;  %361 = vrot.lane.b32.xlu0 %v360_v7, %s1004_s15  ;;  %v400_v18 = vsel %vm171_vm1, %v913_v15, %v395_v16  ;;  %s512_s6 = smov 48  ;;  %s517_s5 = smov 192 }
  0x1e   :  { %v418_v8 = vsel %vm166_vm0, %v917_v6, %v916_v5  ;;  %v918_v9 = vld [vmem:[%s1800_s0 + $0x182] ss:$16 sm:%s420_s13]   ;;  %v914_v17 = vld [vmem:[%s1800_s0 + $0x6] ss:$16 sm:%s402_s29]   ;;  %s435_s13 = smov 3  ;;  %s507_s29 = smov 12 }
  0x1f   :  { %v919_v10 = vld [vmem:[%s1800_s0 + $0x182] ss:$16 sm:%s425_s14]   ;;  %v423_v11 = vsel %vm171_vm1, %v918_v9, %v418_v8  ;;  %v926_v19 = vld [vmem:[%s1800_s0 + $0x186] ss:$16 sm:%s458_s3]   ;;  %v405_v21 = vsel %vm176_vm2, %v914_v17, %v400_v18  ;;  %s484_s14 = smov 12  ;;  %s489_s16 = smov 48 }
  0x20   :  { %v428_v13 = vsel %vm176_vm2, %v919_v10, %v423_v11  ;;  %v927_v20 = vld [vmem:[%s1800_s0 + $0x186] ss:$16 sm:%s461_s4]   ;;  %v921_v26 = vld [vmem:[%s1800_s0 + $0x102] ss:$16 sm:%s435_s13]   ;;  %s494_s21 = smov 192  ;;  %s549_s24 = smov 3 }
  0x21   :  { %429 = vrot.lane.b32.xlu1 %v428_v13, %s1004_s15  ;;  %v464_v22 = vsel %vm166_vm0, %v927_v20, %v926_v19  ;;  %v928_v23 = vld [vmem:[%s1800_s0 + $0x186] ss:$16 sm:%s466_s9]   ;;  %406 = vrot.lane.b32.xlu0 %v405_v21, %s1004_s15  ;;  %s481_s9 = smov 3  ;;  %s557_s30 = smov 48 }
  0x22   :  { %v929_v24 = vld [vmem:[%s1800_s0 + $0x186] ss:$16 sm:%s471_s10]   ;;  %v469_v25 = vsel %vm171_vm1, %v928_v23, %v464_v22  ;;  %v922_v28 = vld [vmem:[%s1800_s0 + $0x102] ss:$16 sm:%s438_s19]   ;;  %s562_s2 = smov 192  ;;  %s530_s10 = smov 12 }
  0x23   :  { %v474_v27 = vsel %vm176_vm2, %v929_v24, %v469_v25  ;;  %v923_v29 = vld [vmem:[%s1800_s0 + $0x102] ss:$16 sm:%s443_s20]   ;;  %v441_v30 = vsel %vm166_vm0, %v922_v28, %v921_v26  ;;  %v936_v33 = vld [vmem:[%s1800_s0 + $0x106] ss:$16 sm:%s504_s28]   ;;  %s535_s11 = smov 48  ;;  %s540_s17 = smov 192 }
  0x24   :  { %v924_v31 = vld [vmem:[%s1800_s0 + $0x102] ss:$16 sm:%s448_s25]   ;;  %v446_v32 = vsel %vm171_vm1, %v923_v29, %v441_v30  ;;  %v937_v34 = vld [vmem:[%s1800_s0 + $0x106] ss:$16 sm:%s507_s29]   ;;  %s552_s25 = smov 12  ;;  %s595_s19 = smov 3 }
  0x25   :  { %475 = vrot.lane.b32.xlu1 %v474_v27, %s1004_s15  ;;  %v451_v35 = vsel %vm176_vm2, %v924_v31, %v446_v32  ;;  %v510_v36 = vsel %vm166_vm0, %v937_v34, %v936_v33  ;;  %v938_v37 = vld [vmem:[%s1800_s0 + $0x106] ss:$16 sm:%s512_s6]   ;;  %s527_s6 = smov 3  ;;  %s598_s20 = smov 12 }
  0x26   :  { %v939_v38 = vld [vmem:[%s1800_s0 + $0x106] ss:$16 sm:%s517_s5]   ;;  %452 = vrot.lane.b32.xlu0 %v451_v35, %s1004_s15  ;;  %v515_v39 = vsel %vm171_vm1, %v938_v37, %v510_v36  ;;  %s608_s26 = smov 192  ;;  %s1005_s27 = smov 32  }
  0x27   :  { %v931_v40 = vld [vmem:[%s1800_s0 + $0x82] ss:$16 sm:%s481_s9]   ;;  %v520_v41 = vsel %vm176_vm2, %v939_v38, %v515_v39  ;;  %v945_v47 = vld [vmem:[%s1800_s0 + $0x85] ss:$16 sm:%s549_s24]   ;;  %s575_s5 = smov 12  ;;  %s580_s7 = smov 48 }
  0x28   :  { %v932_v42 = vld [vmem:[%s1800_s0 + $0x82] ss:$16 sm:%s484_s14]   ;;  %v946_v48 = vld [vmem:[%s1800_s0 + $0x85] ss:$16 sm:%s552_s25]   ;;  %s603_s25 = smov 48  ;;  %s585_s12 = smov 192 }
  0x29   :  { %v933_v43 = vld [vmem:[%s1800_s0 + $0x82] ss:$16 sm:%s489_s16]   ;;  %521 = vrot.lane.b32.xlu1 %v520_v41, %s1004_s15  ;;  %v487_v44 = vsel %vm166_vm0, %v932_v42, %v931_v40  ;;  %v555_v50 = vsel %vm166_vm0, %v946_v48, %v945_v47  ;;  %s641_s16 = smov 3  ;;  %s654_s22 = smov 192 }
  0x2a   :  { %v934_v45 = vld [vmem:[%s1800_s0 + $0x82] ss:$16 sm:%s494_s21]   ;;  %v492_v46 = vsel %vm171_vm1, %v933_v43, %v487_v44  ;;  %v947_v51 = vld [vmem:[%s1800_s0 + $0x85] ss:$16 sm:%s557_s30]   ;;  %s572_s30 = smov 3  ;;  %s649_s21 = smov 48 }
  0x2b   :  { %v497_v49 = vsel %vm176_vm2, %v934_v45, %v492_v46  ;;  %v948_v52 = vld [vmem:[%s1800_s0 + $0x85] ss:$16 sm:%s562_s2]   ;;  %v560_v53 = vsel %vm171_vm1, %v947_v51, %v555_v50  ;;  %v941_v54 = vld [vmem:[%s1800_s0 + $0x1] ss:$16 sm:%s527_s6]   ;;  %s621_s2 = smov 12  ;;  %s626_s3 = smov 48 }
  0x2c   :  { %498 = vrot.lane.b32.xlu0 %v497_v49, %s1004_s15  ;;  %v565_v55 = vsel %vm176_vm2, %v948_v52, %v560_v53  ;;  %v942_v56 = vld [vmem:[%s1800_s0 + $0x1] ss:$16 sm:%s530_s10]   ;;  %s631_s8 = smov 192  ;;  %s695_s15 = smov 48 }
  0x2d   :  { %v943_v57 = vld [vmem:[%s1800_s0 + $0x1] ss:$16 sm:%s535_s11]   ;;  %566 = vrot.lane.b32.xlu1 %v565_v55, %s1005_s27  ;;  %v533_v58 = vsel %vm166_vm0, %v942_v56, %v941_v54  ;;  %s687_s11 = smov 3  ;;  %s700_s18 = smov 192 }
  0x2e   :  { %v944_v59 = vld [vmem:[%s1800_s0 + $0x1] ss:$16 sm:%s540_s17]   ;;  %v538_v60 = vsel %vm171_vm1, %v943_v57, %v533_v58  ;;  %v955_v61 = vld [vmem:[%s1800_s0 + $0x5] ss:$16 sm:%s595_s19]   ;;  %s644_s17 = smov 12  ;;  %s672_s28 = smov 48 }
  0x2f   :  { %v956_v62 = vld [vmem:[%s1800_s0 + $0x5] ss:$16 sm:%s598_s20]   ;;  %v543_v63 = vsel %vm176_vm2, %v944_v59, %v538_v60  ;;  %v950_v4 = vld [vmem:[%s1800_s0 + $0x109] ss:$16 sm:%s572_s30]   ;;  %s677_s4 = smov 192  ;;  %s733_s6 = smov 3 }
  0x30   :  { %v601_v0 = vsel %vm166_vm0, %v956_v62, %v955_v61  ;;  %v957_v1 = vld [vmem:[%s1800_s0 + $0x5] ss:$16 sm:%s603_s25]   ;;  %544 = vrot.lane.b32.xlu0 %v543_v63, %s1005_s27  ;;  %s618_s25 = smov 3  ;;  %v815_v33 = vld [vmem:[%s1800_s0 + $0x80] ss:$4 sm:$0x7]  }
  0x31   :  { %v958_v2 = vld [vmem:[%s1800_s0 + $0x5] ss:$16 sm:%s608_s26]   ;;  %v606_v3 = vsel %vm171_vm1, %v957_v1, %v601_v0  ;;  %v951_v6 = vld [vmem:[%s1800_s0 + $0x109] ss:$16 sm:%s575_s5]   ;;  %s667_s26 = smov 12  ;;  %s713_s29 = smov 12 }
  0x32   :  { %v611_v5 = vsel %vm176_vm2, %v958_v2, %v606_v3  ;;  %v952_v7 = vld [vmem:[%s1800_s0 + $0x109] ss:$16 sm:%s580_s7]   ;;  %v578_v8 = vsel %vm166_vm0, %v951_v6, %v950_v4  ;;  %v965_v11 = vld [vmem:[%s1800_s0 + $0x181] ss:$16 sm:%s641_s16]   ;;  %s741_s16 = smov 48  ;;  %s718_s30 = smov 48 }
  0x33   :  { %612 = vrot.lane.b32.xlu1 %v611_v5, %s1005_s27  ;;  %v953_v9 = vld [vmem:[%s1800_s0 + $0x109] ss:$16 sm:%s585_s12]   ;;  %v583_v10 = vsel %vm171_vm1, %v952_v7, %v578_v8  ;;  %s690_s12 = smov 12  ;;  %816 = vst.msk [vmem:[%s1801_s1 + $0x18] ss:$8 sm:$0x7] %vm3_vm3, %v815_v33  }
  0x34   :  { %v966_v12 = vld [vmem:[%s1800_s0 + $0x181] ss:$16 sm:%s644_s17]   ;;  %v588_v13 = vsel %vm176_vm2, %v953_v9, %v583_v10  ;;  %v960_v18 = vld [vmem:[%s1800_s0 + $0x89] ss:$16 sm:%s618_s25]   ;;  %s746_s17 = smov 192  ;;  %s779_s9 = smov 3 }
  0x35   :  { %v647_v14 = vsel %vm166_vm0, %v966_v12, %v965_v11  ;;  %v967_v15 = vld [vmem:[%s1800_s0 + $0x181] ss:$16 sm:%s649_s21]   ;;  %589 = vrot.lane.b32.xlu0 %v588_v13, %s1005_s27  ;;  %s664_s21 = smov 3  ;;  %v817_v39 = vld [vmem:[%s1800_s0 + $0x90] ss:$4 sm:$0x7]  }
  0x36   :  { %v968_v16 = vld [vmem:[%s1800_s0 + $0x181] ss:$16 sm:%s654_s22]   ;;  %v652_v17 = vsel %vm171_vm1, %v967_v15, %v647_v14  ;;  %v961_v20 = vld [vmem:[%s1800_s0 + $0x89] ss:$16 sm:%s621_s2]   ;;  %s787_s19 = smov 48  ;;  %s792_s20 = smov 192 }
  0x37   :  { %v657_v19 = vsel %vm176_vm2, %v968_v16, %v652_v17  ;;  %v962_v21 = vld [vmem:[%s1800_s0 + $0x89] ss:$16 sm:%s626_s3]   ;;  %v624_v22 = vsel %vm166_vm0, %v961_v20, %v960_v18  ;;  %v975_v25 = vld [vmem:[%s1800_s0 + $0x101] ss:$16 sm:%s687_s11]   ;;  %s756_s25 = smov 3 }
  0x38   :  { %658 = vrot.lane.b32.xlu1 %v657_v19, %s1005_s27  ;;  %v963_v23 = vld [vmem:[%s1800_s0 + $0x89] ss:$16 sm:%s631_s8]   ;;  %v629_v24 = vsel %vm171_vm1, %v962_v21, %v624_v22  ;;  %s736_s8 = smov 12  ;;  %818 = vst.msk [vmem:[%s1801_s1 + $0x19] ss:$8 sm:$0x7] %vm3_vm3, %v817_v39  }
  0x39   :  { %v976_v26 = vld [vmem:[%s1800_s0 + $0x101] ss:$16 sm:%s690_s12]   ;;  %v634_v27 = vsel %vm176_vm2, %v963_v23, %v629_v24  ;;  %v970_v32 = vld [vmem:[%s1800_s0 + $0x9] ss:$16 sm:%s664_s21]   ;;  %s710_s21 = smov 3  ;;  %s782_s12 = smov 12 }
  0x3a   :  { %v693_v28 = vsel %vm166_vm0, %v976_v26, %v975_v25  ;;  %v977_v29 = vld [vmem:[%s1800_s0 + $0x101] ss:$16 sm:%s695_s15]   ;;  %635 = vrot.lane.b32.xlu0 %v634_v27, %s1005_s27  ;;  %v819_v49 = vld [vmem:[%s1800_s0 + $0xa0] ss:$4 sm:$0x7]  }
  0x3b   :  { %v978_v30 = vld [vmem:[%s1800_s0 + $0x101] ss:$16 sm:%s700_s18]   ;;  %v698_v31 = vsel %vm171_vm1, %v977_v29, %v693_v28  ;;  %v971_v35 = vld [vmem:[%s1800_s0 + $0x9] ss:$16 sm:%s667_s26]  }
  0x3c   :  { %v703_v34 = vsel %vm176_vm2, %v978_v30, %v698_v31  ;;  %v972_v36 = vld [vmem:[%s1800_s0 + $0x9] ss:$16 sm:%s672_s28]   ;;  %v670_v37 = vsel %vm166_vm0, %v971_v35, %v970_v32  ;;  %v985_v41 = vld [vmem:[%s1800_s0 + $0x81] ss:$16 sm:%s733_s6]   ;;  %s764_s6 = smov 48 }
  0x3d   :  { %704 = vrot.lane.b32.xlu1 %v703_v34, %s1005_s27  ;;  %v973_v38 = vld [vmem:[%s1800_s0 + $0x9] ss:$16 sm:%s677_s4]   ;;  %v675_v40 = vsel %vm171_vm1, %v972_v36, %v670_v37  ;;  %820 = vst.msk [vmem:[%s1801_s1 + $0x1a] ss:$8 sm:$0x7] %vm3_vm3, %v819_v49   ;;  %s759_s4 = smov 12 }
  0x3e   :  { %v986_v42 = vld [vmem:[%s1800_s0 + $0x81] ss:$16 sm:%s736_s8]   ;;  %v680_v43 = vsel %vm176_vm2, %v973_v38, %v675_v40  ;;  %s723_s8 = smov 192  ;;  %v980_v48 = vld [vmem:[%s1800_s0 + $0x185] ss:$16 sm:%s710_s21]  }
  0x3f   :  { %v739_v44 = vsel %vm166_vm0, %v986_v42, %v985_v41  ;;  %v987_v45 = vld [vmem:[%s1800_s0 + $0x81] ss:$16 sm:%s741_s16]   ;;  %681 = vrot.lane.b32.xlu0 %v680_v43, %s1005_s27  ;;  %v821_v55 = vld [vmem:[%s1800_s0 + $0xb0] ss:$4 sm:$0x7]  }
  0x40   :  { %v988_v46 = vld [vmem:[%s1800_s0 + $0x81] ss:$16 sm:%s746_s17]   ;;  %v744_v47 = vsel %vm171_vm1, %v987_v45, %v739_v44  ;;  %v981_v51 = vld [vmem:[%s1800_s0 + $0x185] ss:$16 sm:%s713_s29]  }
  0x41   :  { %v749_v50 = vsel %vm176_vm2, %v988_v46, %v744_v47  ;;  %v982_v52 = vld [vmem:[%s1800_s0 + $0x185] ss:$16 sm:%s718_s30]   ;;  %v716_v53 = vsel %vm166_vm0, %v981_v51, %v980_v48  ;;  %v995_v57 = vld [vmem:[%s1800_s0 + $0x189] ss:$16 sm:%s779_s9]  }
  0x42   :  { %750 = vrot.lane.b32.xlu1 %v749_v50, %s1005_s27  ;;  %v983_v54 = vld [vmem:[%s1800_s0 + $0x185] ss:$16 sm:%s723_s8]   ;;  %v721_v56 = vsel %vm171_vm1, %v982_v52, %v716_v53  ;;  %822 = vst.msk [vmem:[%s1801_s1 + $0x1b] ss:$8 sm:$0x7] %vm3_vm3, %v821_v55  }
  0x43   :  { %v996_v58 = vld [vmem:[%s1800_s0 + $0x189] ss:$16 sm:%s782_s12]   ;;  %v726_v59 = vsel %vm176_vm2, %v983_v54, %v721_v56  ;;  %s769_s12 = smov 192  ;;  %v990_v0 = vld [vmem:[%s1800_s0 + $0x105] ss:$16 sm:%s756_s25]  }
  0x44   :  { %v785_v60 = vsel %vm166_vm0, %v996_v58, %v995_v57  ;;  %v997_v61 = vld [vmem:[%s1800_s0 + $0x189] ss:$16 sm:%s787_s19]   ;;  %727 = vrot.lane.b32.xlu0 %v726_v59, %s1005_s27  ;;  %v823_v1 = vld [vmem:[%s1800_s0 + $0xc0] ss:$4 sm:$0x7]  }
  0x45   :  { %v998_v62 = vld [vmem:[%s1800_s0 + $0x189] ss:$16 sm:%s792_s20]   ;;  %v790_v63 = vsel %vm171_vm1, %v997_v61, %v785_v60  ;;  %v991_v3 = vld [vmem:[%s1800_s0 + $0x105] ss:$16 sm:%s759_s4]  }
  0x46   :  { %v795_v2 = vsel %vm176_vm2, %v998_v62, %v790_v63  ;;  %v992_v4 = vld [vmem:[%s1800_s0 + $0x105] ss:$16 sm:%s764_s6]   ;;  %824 = vst.msk [vmem:[%s1801_s1 + $0x1c] ss:$8 sm:$0x7] %vm3_vm3, %v823_v1   ;;  %v762_v5 = vsel %vm166_vm0, %v991_v3, %v990_v0 }
  0x47   :  { %796 = vrot.lane.b32.xlu1 %v795_v2, %s1005_s27  ;;  %v993_v6 = vld [vmem:[%s1800_s0 + $0x105] ss:$16 sm:%s769_s12]   ;;  %v825_v7 = vld [vmem:[%s1800_s0 + $0xd0] ss:$4 sm:$0x7]   ;;  %v767_v8 = vsel %vm171_vm1, %v992_v4, %v762_v5 }
  0x48   :  { %826 = vst.msk [vmem:[%s1801_s1 + $0x1d] ss:$8 sm:$0x7] %vm3_vm3, %v825_v7   ;;  %v827_v9 = vld [vmem:[%s1800_s0 + $0xe0] ss:$4 sm:$0x7]   ;;  %v772_v11 = vsel %vm176_vm2, %v993_v6, %v767_v8 }
  0x49   :  { %v829_v10 = vld [vmem:[%s1800_s0 + $0xf0] ss:$4 sm:$0x7]   ;;  %828 = vst.msk [vmem:[%s1801_s1 + $0x1e] ss:$8 sm:$0x7] %vm3_vm3, %v827_v9   ;;  %773 = vrot.lane.b32.xlu0 %v772_v11, %s1005_s27 }
  0x4a   :  { %830 = vst.msk [vmem:[%s1801_s1 + $0x1f] ss:$8 sm:$0x7] %vm3_vm3, %v829_v10   ;;  %v2_v12 = vld [vmem:[%s1800_s0] ss:$4 sm:$0x7]  }
  0x4b   :  { %v801_v13 = vld [vmem:[%s1800_s0 + $0x10] ss:$4 sm:$0x7]   ;;  %4 = vst.msk [vmem:[%s1801_s1] ss:$8 sm:$0x7] %vm3_vm3, %v2_v12  }
  0x4c   :  { %802 = vst.msk [vmem:[%s1801_s1 + $0x1] ss:$8 sm:$0x7] %vm3_vm3, %v801_v13   ;;  %v803_v14 = vld [vmem:[%s1800_s0 + $0x20] ss:$4 sm:$0x7]  }
  0x4d   :  { %v805_v15 = vld [vmem:[%s1800_s0 + $0x30] ss:$4 sm:$0x7]   ;;  %804 = vst.msk [vmem:[%s1801_s1 + $0x2] ss:$8 sm:$0x7] %vm3_vm3, %v803_v14  }
  0x4e   :  { %806 = vst.msk [vmem:[%s1801_s1 + $0x3] ss:$8 sm:$0x7] %vm3_vm3, %v805_v15   ;;  %v807_v16 = vld [vmem:[%s1800_s0 + $0x40] ss:$4 sm:$0x7]  }
  0x4f   :  { %v809_v17 = vld [vmem:[%s1800_s0 + $0x50] ss:$4 sm:$0x7]   ;;  %808 = vst.msk [vmem:[%s1801_s1 + $0x4] ss:$8 sm:$0x7] %vm3_vm3, %v807_v16  }
  0x50   :  { %810 = vst.msk [vmem:[%s1801_s1 + $0x5] ss:$8 sm:$0x7] %vm3_vm3, %v809_v17   ;;  %v811_v18 = vld [vmem:[%s1800_s0 + $0x60] ss:$4 sm:$0x7]  }
  0x51   :  { %v813_v19 = vld [vmem:[%s1800_s0 + $0x70] ss:$4 sm:$0x7]   ;;  %812 = vst.msk [vmem:[%s1801_s1 + $0x6] ss:$8 sm:$0x7] %vm3_vm3, %v811_v18  }
  0x52   :  { %814 = vst.msk [vmem:[%s1801_s1 + $0x7] ss:$8 sm:$0x7] %vm3_vm3, %v813_v19   ;;  %v847_v20 = vld [vmem:[%s1800_s0 + $0x180] ss:$4 sm:$0x7]  }
  0x53   :  { %v849_v21 = vld [vmem:[%s1800_s0 + $0x190] ss:$4 sm:$0x7]   ;;  %848 = vst.msk [vmem:[%s1801_s1 + $0x48] ss:$8 sm:$0x7] %vm3_vm3, %v847_v20  }
  0x54   :  { %850 = vst.msk [vmem:[%s1801_s1 + $0x49] ss:$8 sm:$0x7] %vm3_vm3, %v849_v21   ;;  %v851_v22 = vld [vmem:[%s1800_s0 + $0x1a0] ss:$4 sm:$0x7]  }
  0x55   :  { %v853_v23 = vld [vmem:[%s1800_s0 + $0x1b0] ss:$4 sm:$0x7]   ;;  %852 = vst.msk [vmem:[%s1801_s1 + $0x4a] ss:$8 sm:$0x7] %vm3_vm3, %v851_v22  }
  0x56   :  { %854 = vst.msk [vmem:[%s1801_s1 + $0x4b] ss:$8 sm:$0x7] %vm3_vm3, %v853_v23   ;;  %v855_v24 = vld [vmem:[%s1800_s0 + $0x1c0] ss:$4 sm:$0x7]  }
  0x57   :  { %v857_v25 = vld [vmem:[%s1800_s0 + $0x1d0] ss:$4 sm:$0x7]   ;;  %856 = vst.msk [vmem:[%s1801_s1 + $0x4c] ss:$8 sm:$0x7] %vm3_vm3, %v855_v24  }
  0x58   :  { %858 = vst.msk [vmem:[%s1801_s1 + $0x4d] ss:$8 sm:$0x7] %vm3_vm3, %v857_v25   ;;  %v859_v26 = vld [vmem:[%s1800_s0 + $0x1e0] ss:$4 sm:$0x7]  }
  0x59   :  { %v861_v27 = vld [vmem:[%s1800_s0 + $0x1f0] ss:$4 sm:$0x7]   ;;  %860 = vst.msk [vmem:[%s1801_s1 + $0x4e] ss:$8 sm:$0x7] %vm3_vm3, %v859_v26  }
  0x5a   :  { %862 = vst.msk [vmem:[%s1801_s1 + $0x4f] ss:$8 sm:$0x7] %vm3_vm3, %v861_v27   ;;  %v831_v28 = vld [vmem:[%s1800_s0 + $0x100] ss:$4 sm:$0x7]  }
  0x5b   :  { %v833_v29 = vld [vmem:[%s1800_s0 + $0x110] ss:$4 sm:$0x7]   ;;  %832 = vst.msk [vmem:[%s1801_s1 + $0x30] ss:$8 sm:$0x7] %vm3_vm3, %v831_v28  }
  0x5c   :  { %834 = vst.msk [vmem:[%s1801_s1 + $0x31] ss:$8 sm:$0x7] %vm3_vm3, %v833_v29   ;;  %v835_v30 = vld [vmem:[%s1800_s0 + $0x120] ss:$4 sm:$0x7]  }
  0x5d   :  { %v837_v31 = vld [vmem:[%s1800_s0 + $0x130] ss:$4 sm:$0x7]   ;;  %836 = vst.msk [vmem:[%s1801_s1 + $0x32] ss:$8 sm:$0x7] %vm3_vm3, %v835_v30  }
  0x5e   :  { %838 = vst.msk [vmem:[%s1801_s1 + $0x33] ss:$8 sm:$0x7] %vm3_vm3, %v837_v31   ;;  %v839_v32 = vld [vmem:[%s1800_s0 + $0x140] ss:$4 sm:$0x7]  }
  0x5f   :  { %v841_v33 = vld [vmem:[%s1800_s0 + $0x150] ss:$4 sm:$0x7]   ;;  %840 = vst.msk [vmem:[%s1801_s1 + $0x34] ss:$8 sm:$0x7] %vm3_vm3, %v839_v32  }
  0x60   :  { %842 = vst.msk [vmem:[%s1801_s1 + $0x35] ss:$8 sm:$0x7] %vm3_vm3, %v841_v33   ;;  %v843_v34 = vld [vmem:[%s1800_s0 + $0x160] ss:$4 sm:$0x7]  }
  0x61   :  { %v845_v35 = vld [vmem:[%s1800_s0 + $0x170] ss:$4 sm:$0x7]   ;;  %844 = vst.msk [vmem:[%s1801_s1 + $0x36] ss:$8 sm:$0x7] %vm3_vm3, %v843_v34  }
  0x62   :  { %846 = vst.msk [vmem:[%s1801_s1 + $0x37] ss:$8 sm:$0x7] %vm3_vm3, %v845_v35  }
  0x78   :  { %v224_v36 = vpop.permute.xlu1 %223  }
  0x79   :  { %876 = vst.msk [vmem:[%s1801_s1 + $0x8] sm:$0xff] %vm180_vm4, %v224_v36  }
  0x7a   :  { %v179_v37 = vpop.permute.xlu0 %178  }
  0x7b   :  { %181 = vst.msk [vmem:[%s1801_s1] sm:$0xff] %vm180_vm4, %v179_v37  }
  0x7e   :  { %v247_v38 = vpop.permute.xlu1 %246  }
  0x7f   :  { %881 = vst.msk [vmem:[%s1801_s1 + $0x48] sm:$0xff] %vm180_vm4, %v247_v38   ;;  %v201_v39 = vpop.permute.xlu0 %200  }
  0x80   :  { %871 = vst.msk [vmem:[%s1801_s1 + $0x20] sm:$0xff] %vm180_vm4, %v201_v39  }
  0x83   :  { %v293_v40 = vpop.permute.xlu1 %292  }
  0x84   :  { %891 = vst.msk [vmem:[%s1801_s1 + $0x50] sm:$0xff] %vm180_vm4, %v293_v40   ;;  %v270_v41 = vpop.permute.xlu0 %269  }
  0x85   :  { %886 = vst.msk [vmem:[%s1801_s1 + $0x30] sm:$0xff] %vm180_vm4, %v270_v41  }
  0x87   :  { %v339_v42 = vpop.permute.xlu1 %338  }
  0x88   :  { %901 = vst.msk [vmem:[%s1801_s1 + $0x38] sm:$0xff] %vm180_vm4, %v339_v42  }
  0x8a   :  { %v316_v43 = vpop.permute.xlu0 %315  }
  0x8b   :  { %896 = vst.msk [vmem:[%s1801_s1 + $0x18] sm:$0xff] %vm180_vm4, %v316_v43  }
  0x8c   :  { %v384_v44 = vpop.permute.xlu1 %383  }
  0x8d   :  { %910 = vst.msk [vmem:[%s1801_s1 + $0x20] sm:$0xff] %vm363_vm5, %v384_v44  }
  0x8f   :  { %v362_v45 = vpop.permute.xlu0 %361  }
  0x90   :  { %364 = vst.msk [vmem:[%s1801_s1] sm:$0xff] %vm363_vm5, %v362_v45  }
  0x93   :  { %v430_v46 = vpop.permute.xlu1 %429   ;;  %v407_v47 = vpop.permute.xlu0 %406  }
  0x94   :  { %920 = vst.msk [vmem:[%s1801_s1 + $0x48] sm:$0xff] %vm363_vm5, %v430_v46   ;;  %915 = vst.msk [vmem:[%s1801_s1 + $0x8] sm:$0xff] %vm363_vm5, %v407_v47  }
  0x97   :  { %v476_v48 = vpop.permute.xlu1 %475  }
  0x98   :  { %930 = vst.msk [vmem:[%s1801_s1 + $0x50] sm:$0xff] %vm363_vm5, %v476_v48   ;;  %v453_v49 = vpop.permute.xlu0 %452  }
  0x99   :  { %925 = vst.msk [vmem:[%s1801_s1 + $0x30] sm:$0xff] %vm363_vm5, %v453_v49  }
  0x9b   :  { %v522_v50 = vpop.permute.xlu1 %521  }
  0x9c   :  { %940 = vst.msk [vmem:[%s1801_s1 + $0x38] sm:$0xff] %vm363_vm5, %v522_v50  }
  0x9e   :  { %v499_v51 = vpop.permute.xlu0 %498  }
  0x9f   :  { %935 = vst.msk [vmem:[%s1801_s1 + $0x18] sm:$0xff] %vm363_vm5, %v499_v51   ;;  %v567_v52 = vpop.permute.xlu1 %566  }
  0xa0   :  { %949 = vst.msk [vmem:[%s1801_s1 + $0x20] sm:$0xff] %vm546_vm6, %v567_v52  }
  0xa2   :  { %v545_v53 = vpop.permute.xlu0 %544  }
  0xa3   :  { %547 = vst.msk [vmem:[%s1801_s1] sm:$0xff] %vm546_vm6, %v545_v53  }
  0xa5   :  { %v613_v54 = vpop.permute.xlu1 %612  }
  0xa6   :  { %959 = vst.msk [vmem:[%s1801_s1 + $0x8] sm:$0xff] %vm546_vm6, %v613_v54  }
  0xa7   :  { %v590_v55 = vpop.permute.xlu0 %589  }
  0xa8   :  { %954 = vst.msk [vmem:[%s1801_s1 + $0x40] sm:$0xff] %vm546_vm6, %v590_v55  }
  0xaa   :  { %v659_v56 = vpop.permute.xlu1 %658  }
  0xab   :  { %969 = vst.msk [vmem:[%s1801_s1 + $0x48] sm:$0xff] %vm546_vm6, %v659_v56  }
  0xac   :  { %v636_v57 = vpop.permute.xlu0 %635  }
  0xad   :  { %964 = vst.msk [vmem:[%s1801_s1 + $0x28] sm:$0xff] %vm546_vm6, %v636_v57  }
  0xaf   :  { %v705_v58 = vpop.permute.xlu1 %704  }
  0xb0   :  { %979 = vst.msk [vmem:[%s1801_s1 + $0x30] sm:$0xff] %vm546_vm6, %v705_v58  }
  0xb1   :  { %v682_v59 = vpop.permute.xlu0 %681  }
  0xb2   :  { %974 = vst.msk [vmem:[%s1801_s1 + $0x10] sm:$0xff] %vm546_vm6, %v682_v59  }
  0xb4   :  { %v751_v60 = vpop.permute.xlu1 %750  }
  0xb5   :  { %989 = vst.msk [vmem:[%s1801_s1 + $0x18] sm:$0xff] %vm546_vm6, %v751_v60  }
  0xb6   :  { %v728_v61 = vpop.permute.xlu0 %727  }
  0xb7   :  { %984 = vst.msk [vmem:[%s1801_s1 + $0x50] sm:$0xff] %vm546_vm6, %v728_v61  }
  0xb9   :  { %v797_v62 = vpop.permute.xlu1 %796  }
  0xba   :  { %999 = vst.msk [vmem:[%s1801_s1 + $0x58] sm:$0xff] %vm546_vm6, %v797_v62  }
  0xbb   :  { %v774_v63 = vpop.permute.xlu0 %773  }
  0xbc   :  { %994 = vst.msk [vmem:[%s1801_s1 + $0x38] sm:$0xff] %vm546_vm6, %v774_v63  }

// kernel: mpnn_bayes_forward.8
= control target key start
LH: loop header
LB: loop body
LE: loop exit
PB: predicated region body
PF: predicated region fallthrough
CT: control target
= control target key end

     0   :  { %vm25_vm0 = vcmask 130048   ;;  %vm109_vm1 = vcmask 261120   ;;  %s175_s1 = inlined_call_operand.vmem [shape: f32[16,32], index: 1, kind: input, shape index: {}]   ;;  %s176_s0 = inlined_call_operand.vmem [shape: f32[16,16], index: 0, kind: input, shape index: {}]   ;;  %s177_s2 = inlined_call_operand.vmem [shape: f32[1,32], index: 2, kind: input, shape index: {}]   ;;  %s178_s3 = inlined_call_operand.vmem [shape: f32[16,32], index: 3, kind: output, shape index: {}]  }
   0x1   :  { %v16_v0 = vld [vmem:[%s175_s1] sm:$0xff]  ;;  %v17_v1 = vld [vmem:[%s175_s1 + $0x8] sm:$0xff] }
   0x2   :  { %v14_v2 = vld [vmem:[%s176_s0] sm:$0xff]  ;;  %v130_v3 = vpack.c.bf16 %v17_v1, %v16_v0  ;;  %v15_v4 = vld [vmem:[%s176_s0 + $0x8] sm:$0xff] }
   0x3   :  { %127 = vmatprep.mubr.msk.f32.mxu0 %vm25_vm0, %v14_v2  ;;  %v116_v5 = vld [vmem:[%s177_s2] ss:$0 sm:$0xff] }
   0x4   :  { %131 = vmatprep.subr.bf16.mxu0 %v130_v3 }
   0x5   :  { %133 = vmatpush3.bf16.msra.mxu0 %v130_v3 }
   0x8   :  { %128 = vmatmul.mubr.msk.f32.vlgmr.msra.gmra.mrb[0].mxu0 %vm25_vm0, %v15_v4 }
  0xdb   :  { %v129_v6 = vpop.f32.mrb[0].mxu0 }
  0xdc   :  { %v104_v7 = vadd.f32 %v129_v6, %v116_v5  ;;  %v98_v8 = vpop.f32.mrb[1].mxu0 }
  0xdd   :  { %v99_v9 = vadd.f32 %v116_v5, %v98_v8 }
  0xde   :  { %v108_v10 = vmax.f32 %v104_v7, 0.0 }
  0xdf   :  { %v107_v11 = vmax.f32 %v99_v9, 0.0 }
  0xe0   :  { %111 = vst.msk [vmem:[%s178_s3 + $0x8] sm:$0xff] %vm109_vm1, %v108_v10 }
  0xe1   :  { %110 = vst.msk [vmem:[%s178_s3] sm:$0xff] %vm109_vm1, %v107_v11 }

// kernel: mpnn_bayes_forward.10
= control target key start
LH: loop header
LB: loop body
LE: loop exit
PB: predicated region body
PF: predicated region fallthrough
CT: control target
= control target key end

     0   :  { %vm70_vm0 = vcmask 261120   ;;  %vm152_vm1 = vcmask 80896   ;;  %vm187_vm2 = vcmask 1041408   ;;  %vm1817_vm3 = vmmov 1   ;;  %s2302_s3 = inlined_call_operand.vmem [shape: f32[32,10], index: 3, kind: input, shape index: {}]   ;;  %s2303_s0 = inlined_call_operand.vmem [shape: f32[16,32], index: 0, kind: input, shape index: {}]   ;;  %s2304_s4 = inlined_call_operand.vmem [shape: f32[10,320], index: 4, kind: input, shape index: {}]   ;;  %s2305_s5 = inlined_call_operand.vmem [shape: f32[32,320], index: 5, kind: input, shape index: {}]   ;;  %s2306_s6 = inlined_call_operand.vmem [shape: f32[320,32], index: 6, kind: input, shape index: {}]   ;;  %s2307_s7 = inlined_call_operand.vmem [shape: f32[32,32], index: 7, kind: input, shape index: {}]   ;;  %s2308_s9 = inlined_call_operand.vmem [shape: f32[32,32], index: 9, kind: input, shape index: {}]   ;;  %s2309_s8 = inlined_call_operand.vmem [shape: f32[32,32], index: 8, kind: input, shape index: {}]   ;;  %s2310_s12 = inlined_call_operand.vmem [shape: f32[32,32], index: 12, kind: input, shape index: {}]   ;;  %s2311_s10 = inlined_call_operand.vmem [shape: f32[32,32], index: 10, kind: input, shape index: {}]   ;;  %s2312_s1 = inlined_call_operand.vmem [shape: f32[16,32], index: 1, kind: input, shape index: {}, may-alias: {1,2}]   ;;  %s2313_s11 = inlined_call_operand.vmem [shape: f32[32,32], index: 11, kind: input, shape index: {}]   ;;  %s2314_s13 = inlined_call_operand.vmem [shape: f32[1,32], index: 13, kind: input, shape index: {}]   ;;  %s2315_s16 = inlined_call_operand.vmem [shape: f32[1,32], index: 16, kind: input, shape index: {}]   ;;  %s2316_s14 = inlined_call_operand.vmem [shape: f32[1,32], index: 14, kind: input, shape index: {}]   ;;  %s2317_s17 = inlined_call_operand.vmem [shape: f32[1,32], index: 17, kind: input, shape index: {}]   ;;  %s2318_s18 = inlined_call_operand.vmem [shape: f32[1,32], index: 18, kind: input, shape index: {}]   ;;  %s2319_s15 = inlined_call_operand.vmem [shape: f32[1,32], index: 15, kind: input, shape index: {}]   ;;  %s2320_s2 = inlined_call_operand.vmem [shape: f32[16,32], index: 2, kind: input, shape index: {}, may-alias: {1,2}]   ;;  %s2321_s20 = inlined_call_operand.vmem [shape: f32[16,32], index: 20, kind: output, shape index: {1}]   ;;  %s2322_s19 = inlined_call_operand.vmem [shape: f32[16,32], index: 19, kind: output, shape index: {0}]  }
   0x1   :  { %2328 = sst [smem:[#allocation2_spill]] %s2302_s3  ;;  %vm1960_vm4 = vmpackc.low %vm187_vm2, %vm1817_vm3  ;;  %v1818_v25 = vmov 0.0   ;;  %vm533_vm5 = vcmask 523264  }
   0x2   :  { %2329 = sst [smem:[#allocation3_spill]] %s2303_s0  ;;  %s2333_s23 = sld [smem:[#allocation2_spill]]  ;;  %261 = vmatprep.mubr.f32.mxu1 %v1818_v25 }
   0x3   :  { %2330 = sst [smem:[#allocation4_spill]] %s2304_s4  ;;  %s2334_s29 = sld [smem:[#allocation3_spill]] }
   0x4   :  { %2331 = sst [smem:[#allocation5_spill]] %s2305_s5  ;;  %s2335_s22 = sld [smem:[#allocation4_spill]] }
   0x5   :  { %2332 = sst [smem:[#allocation6_spill]] %s2306_s6  ;;  %s2338_s21 = sld [smem:[#allocation5_spill]] }
   0x6   :  { %s2339_s28 = sld [smem:[#allocation6_spill]] }
   0x8   :  { %v66_v0 = vld [vmem:[%s2333_s23] sm:$0xff]  ;;  %v67_v1 = vld [vmem:[%s2333_s23 + $0x8] sm:$0xff]  ;;  %v68_v2 = vld [vmem:[%s2333_s23 + $0x10] sm:$0xff] }
   0x9   :  { %v1637_v3 = vpack.c.bf16 %v67_v1, %v66_v0  ;;  %v69_v4 = vld [vmem:[%s2333_s23 + $0x18] sm:$0xff]  ;;  %v1939_v5 = vld [vmem:[%s2334_s29] sm:$0xff]  ;;  %v1946_v7 = vld [vmem:[%s2334_s29 + $0x8] sm:$0xff] }
   0xa   :  { %v1641_v6 = vpack.c.bf16 %v69_v4, %v68_v2  ;;  %1531 = vmatprep.mubr.msk.f32.mxu0 %vm70_vm0, %v1939_v5  ;;  %v176_v22 = vld [vmem:[%s2335_s22 + $0x8] sm:$0xff]  ;;  %v179_v23 = vld [vmem:[%s2335_s22 + $0x20] sm:$0x3]  ;;  %v178_v28 = vld [vmem:[%s2335_s22 + $0x18] sm:$0x3] }
   0xb   :  { %1638 = vmatprep.subr.bf16.mxu0 %v1637_v3  ;;  %v1645_v26 = vpack.c.bf16 %v179_v23, %v176_v22  ;;  %v175_v27 = vld [vmem:[%s2335_s22] sm:$0xff]  ;;  %v177_v29 = vld [vmem:[%s2335_s22 + $0x10] sm:$0xff]  ;;  %v180_v31 = vld [vmem:[%s2335_s22 + $0x28] sm:$0x3] }
   0xc   :  { %1640 = vmatpush3.bf16.msra.mxu0 %v1637_v3  ;;  %v1648_v30 = vpack.c.bf16 %v178_v28, %v175_v27  ;;  %v350_v32 = vld [vmem:[%s2338_s21 + $0x8] sm:$0xff]  ;;  %v353_v33 = vld [vmem:[%s2338_s21 + $0x20] sm:$0xff]  ;;  %v1651_v34 = vpack.c.bf16 %v180_v31, %v177_v29  ;;  %v351_v36 = vld [vmem:[%s2338_s21 + $0x10] sm:$0xff] }
   0xd   :  { %1642 = vmatprep.subr.bf16.mxu0 %v1641_v6  ;;  %1647 = vmatprep.subr.msk.bf16.mxu1 %vm1960_vm4, %v1645_v26  ;;  %v1657_v35 = vpack.c.bf16 %v353_v33, %v350_v32  ;;  %v354_v37 = vld [vmem:[%s2338_s21 + $0x28] sm:$0xff]  ;;  %v349_v41 = vld [vmem:[%s2338_s21] sm:$0xff]  ;;  %v352_v42 = vld [vmem:[%s2338_s21 + $0x18] sm:$0xff] }
   0xe   :  { %1650 = vmatpush1.bf16.msk.msra.mxu1 %vm1960_vm4, %v1648_v30  ;;  %v1665_v38 = vpack.c.bf16 %v354_v37, %v351_v36  ;;  %v356_v43 = vld [vmem:[%s2338_s21 + $0x38] sm:$0xff]  ;;  %v359_v44 = vld [vmem:[%s2338_s21 + $0x50] sm:$0xff]  ;;  %v1659_v46 = vpack.c.bf16 %v352_v42, %v349_v41  ;;  %v358_v50 = vld [vmem:[%s2338_s21 + $0x48] sm:$0xff] }
   0xf   :  { %1658 = vmatprep.subr.bf16.mxu1 %v1657_v35  ;;  %v1661_v48 = vpack.c.bf16 %v359_v44, %v356_v43  ;;  %v355_v49 = vld [vmem:[%s2338_s21 + $0x30] sm:$0xff]  ;;  %v357_v51 = vld [vmem:[%s2338_s21 + $0x40] sm:$0xff]  ;;  %v360_v52 = vld [vmem:[%s2338_s21 + $0x58] sm:$0xff] }
  0x10   :  { %1644 = vmatpush3.bf16.msra.mxu0 %v1641_v6  ;;  %v1663_v54 = vpack.c.bf16 %v358_v50, %v355_v49  ;;  %v1669_v56 = vpack.c.bf16 %v360_v52, %v357_v51  ;;  %v612_v57 = vld [vmem:[%s2339_s28 + $0x80] sm:$0xff]  ;;  %v613_v58 = vld [vmem:[%s2339_s28 + $0x88] sm:$0xff]  ;;  %v614_v63 = vld [vmem:[%s2339_s28 + $0x90] sm:$0xff] }
  0x11   :  { %1653 = vmatprep.subr.msk.bf16.mxu0 %vm1960_vm4, %v1651_v34  ;;  %v1673_v59 = vpack.c.bf16 %v613_v58, %v612_v57  ;;  %v596_v60 = vld [vmem:[%s2339_s28] sm:$0xff]  ;;  %v597_v61 = vld [vmem:[%s2339_s28 + $0x8] sm:$0xff]  ;;  %v615_v0 = vld [vmem:[%s2339_s28 + $0x98] sm:$0xff] }
  0x12   :  { %v1675_v62 = vpack.c.bf16 %v597_v61, %v596_v60  ;;  %v1677_v1 = vpack.c.bf16 %v615_v0, %v614_v63  ;;  %v598_v2 = vld [vmem:[%s2339_s28 + $0x10] sm:$0xff]  ;;  %v599_v3 = vld [vmem:[%s2339_s28 + $0x18] sm:$0xff]  ;;  %v616_v6 = vld [vmem:[%s2339_s28 + $0xa0] sm:$0xff] }
  0x13   :  { %1532 = vmatmul.mubr.msk.f32.vlgmr.msra.gmra.mrb[0].mxu0 %vm70_vm0, %v1946_v7  ;;  %v1679_v4 = vpack.c.bf16 %v599_v3, %v598_v2  ;;  %v604_v22 = vld [vmem:[%s2339_s28 + $0x40] sm:$0xff]  ;;  %v605_v23 = vld [vmem:[%s2339_s28 + $0x48] sm:$0xff]  ;;  %v622_v28 = vld [vmem:[%s2339_s28 + $0xd0] sm:$0xff] }
  0x14   :  { %1656 = vmatpush3.bf16.msk.msra.mxu0 %vm1960_vm4, %v1651_v34  ;;  %v628_v24 = vld [vmem:[%s2339_s28 + $0x100] sm:$0xff]  ;;  %v629_v26 = vld [vmem:[%s2339_s28 + $0x108] sm:$0xff]  ;;  %v623_v29 = vld [vmem:[%s2339_s28 + $0xd8] sm:$0xff] }
  0x15   :  { %1666 = vmatprep.subr.bf16.mxu0 %v1665_v38  ;;  %v1705_v27 = vpack.c.bf16 %v629_v26, %v628_v24  ;;  %v1693_v30 = vpack.c.bf16 %v623_v29, %v622_v28  ;;  %v606_v31 = vld [vmem:[%s2339_s28 + $0x50] sm:$0xff]  ;;  %v607_v32 = vld [vmem:[%s2339_s28 + $0x58] sm:$0xff]  ;;  %v624_v37 = vld [vmem:[%s2339_s28 + $0xe0] sm:$0xff] }
  0x16   :  { %v630_v33 = vld [vmem:[%s2339_s28 + $0x110] sm:$0xff]  ;;  %v1695_v34 = vpack.c.bf16 %v607_v32, %v606_v31  ;;  %v631_v35 = vld [vmem:[%s2339_s28 + $0x118] sm:$0xff]  ;;  %v609_v41 = vld [vmem:[%s2339_s28 + $0x68] sm:$0xff] }
  0x17   :  { %v1709_v36 = vpack.c.bf16 %v631_v35, %v630_v33  ;;  %v632_v42 = vld [vmem:[%s2339_s28 + $0x120] sm:$0xff]  ;;  %v633_v44 = vld [vmem:[%s2339_s28 + $0x128] sm:$0xff]  ;;  %v610_v49 = vld [vmem:[%s2339_s28 + $0x70] sm:$0xff] }
  0x18   :  { %v611_v50 = vld [vmem:[%s2339_s28 + $0x78] sm:$0xff]  ;;  %v634_v51 = vld [vmem:[%s2339_s28 + $0x130] sm:$0xff] }
  0x19   :  { %v1703_v52 = vpack.c.bf16 %v611_v50, %v610_v49 }
  0xe6   :  { %v1533_v8 = vpop.f32.mrb[0].mxu0 }
  0xe7   :  { %v143_v9 = vpop.f32.mrb[1].mxu0  ;;  %v156_v11 = vsel %vm152_vm1, %v1533_v8, -inf }
  0xe8   :  { %v153_v10 = vsel %vm152_vm1, %v143_v9, -inf }
  0xe9   :  { %154 = vmax.xlane.f32.xlu0 %v153_v10  ;;  %v600_v10 = vld [vmem:[%s2339_s28 + $0x20] sm:$0xff] }
  0xed   :  { %157 = vmax.xlane.f32.xlu0 %v156_v11  ;;  %v601_v11 = vld [vmem:[%s2339_s28 + $0x28] sm:$0xff] }
 0x176   :  { %v155_v12 = vpop.xlane.xlu0 %154 }
 0x177   :  { %v159_v13 = vsub.f32 %v143_v9, %v155_v12  ;;  %v1683_v12 = vpack.c.bf16 %v601_v11, %v600_v10 }
 0x179   :  { %v161_v14 = vmul.f32 1.442695, %v159_v13  ;;  %v618_v13 = vld [vmem:[%s2339_s28 + $0xb0] sm:$0xff] }
 0x17a   :  { %v158_v15 = vpop.xlane.xlu0 %157 }
 0x17b   :  { %1783 = vpow2.f32 %v161_v14  ;;  %v160_v16 = vsub.f32 %v1533_v8, %v158_v15  ;;  %v617_v8 = vld [vmem:[%s2339_s28 + $0xa8] sm:$0xff]  ;;  %v619_v14 = vld [vmem:[%s2339_s28 + $0xb8] sm:$0xff] }
 0x17c   :  { %v1681_v9 = vpack.c.bf16 %v617_v8, %v616_v6  ;;  %v1685_v15 = vpack.c.bf16 %v619_v14, %v618_v13 }
 0x17d   :  { %v163_v17 = vmul.f32 1.442695, %v160_v16  ;;  %v602_v16 = vld [vmem:[%s2339_s28 + $0x30] sm:$0xff] }
 0x17f   :  { %1785 = vpow2.f32 %v163_v17  ;;  %v603_v17 = vld [vmem:[%s2339_s28 + $0x38] sm:$0xff] }
 0x185   :  { %v1784_v18 = vpop.eup %1783 }
 0x186   :  { %v165_v19 = vsel %vm152_vm1, %v1784_v18, 0.0 }
 0x187   :  { %166 = vadd.xlane.f32.xlu1 %v165_v19  ;;  %v620_v19 = vld [vmem:[%s2339_s28 + $0xc0] sm:$0xff] }
 0x189   :  { %v1786_v20 = vpop.eup %1785 }
 0x18a   :  { %v168_v21 = vsel %vm152_vm1, %v1786_v20, 0.0 }
 0x18b   :  { %169 = vadd.xlane.f32.xlu1 %v168_v21 }
 0x214   :  { %v167_v39 = vpop.xlane.xlu1 %166 }
 0x215   :  { %1787 = vrcp.f32 %v167_v39 }
 0x218   :  { %v170_v40 = vpop.xlane.xlu1 %169 }
 0x219   :  { %1789 = vrcp.f32 %v170_v40  ;;  %v608_v40 = vld [vmem:[%s2339_s28 + $0x60] sm:$0xff] }
 0x21a   :  { %v1699_v43 = vpack.c.bf16 %v609_v41, %v608_v40 }
 0x21f   :  { %v1788_v45 = vpop.eup %1787 }
 0x220   :  { %v172_v47 = vmul.f32 %v1788_v45, %v1784_v18  ;;  %v1687_v18 = vpack.c.bf16 %v603_v17, %v602_v16  ;;  %v1713_v45 = vpack.c.bf16 %v633_v44, %v632_v42 }
 0x222   :  { %1390 = vmatmul.mubr.msk.f32.vlgmr.msra.gmra.mrb[0].mxu1 %vm152_vm1, %v172_v47  ;;  %1538 = vmatprep.mubr.msk.f32.mxu0 %vm152_vm1, %v172_v47  ;;  %v627_v47 = vld [vmem:[%s2339_s28 + $0xf8] sm:$0xff] }
 0x223   :  { %v1790_v53 = vpop.eup %1789  ;;  %1660 = vmatpush1.bf16.msra.mxu1 %v1659_v46  ;;  %267 = vmatprep.mubr.f32.mxu1 %v1818_v25  ;;  %v626_v46 = vld [vmem:[%s2339_s28 + $0xf0] sm:$0xff] }
 0x224   :  { %1662 = vmatprep.subr.bf16.mxu1 %v1661_v48  ;;  %v174_v55 = vmul.f32 %v1790_v53, %v1786_v20  ;;  %v621_v20 = vld [vmem:[%s2339_s28 + $0xc8] sm:$0xff]  ;;  %v1701_v48 = vpack.c.bf16 %v627_v47, %v626_v46  ;;  %v635_v53 = vld [vmem:[%s2339_s28 + $0x138] sm:$0xff] }
 0x225   :  { %v1689_v21 = vpack.c.bf16 %v621_v20, %v620_v19 }
 0x226   :  { %1391 = vmatmul.mubr.msk.f32.gmra.mrb[2].mxu1 %vm152_vm1, %v174_v55  ;;  %1539 = vmatmul.mubr.msk.f32.vlgmr.msra.gmra.mrb[2].mxu0 %vm152_vm1, %v174_v55 }
 0x227   :  { %1664 = vmatpush1.bf16.msra.mxu1 %v1663_v54  ;;  %1668 = vmatpush3.bf16.msra.mxu0 %v1665_v38  ;;  %v625_v38 = vld [vmem:[%s2339_s28 + $0xe8] sm:$0xff]  ;;  %v1717_v54 = vpack.c.bf16 %v635_v53, %v634_v51 }
 0x228   :  { %425 = vmatprep.mubr.f32.mxu1 %v1818_v25  ;;  %1670 = vmatprep.subr.bf16.mxu0 %v1669_v56  ;;  %v1697_v39 = vpack.c.bf16 %v625_v38, %v624_v37 }
 0x229   :  { %1549 = vmatprep.mubr.msk.f32.mxu0 %vm70_vm0, %v1939_v5  ;;  %1674 = vmatprep.subr.bf16.mxu1 %v1673_v59 }
 0x22a   :  { %1395 = vmatmul.mubr.msk.f32.vlgmr.msra.gmra.mrb[4].mxu1 %vm70_vm0, %v1939_v5 }
 0x22b   :  { %1672 = vmatpush3.bf16.msra.mxu0 %v1669_v56  ;;  %431 = vmatprep.mubr.f32.mxu1 %v1818_v25  ;;  %v1691_v25 = vpack.c.bf16 %v605_v23, %v604_v22 }
 0x22c   :  { %1676 = vmatpush3.bf16.msra.mxu1 %v1675_v62  ;;  %1706 = vmatprep.subr.bf16.mxu0 %v1705_v27 }
 0x22d   :  { %1678 = vmatprep.subr.bf16.mxu1 %v1677_v1 }
 0x22e   :  { %1550 = vmatmul.mubr.msk.f32.vlgmr.msra.gmra.mrb[4].mxu0 %vm70_vm0, %v1946_v7  ;;  %1396 = vmatmul.mubr.msk.f32.gmra.mrb[6].mxu1 %vm70_vm0, %v1946_v7 }
 0x22f   :  { %1708 = vmatpush3.bf16.msra.mxu0 %v1705_v27 }
 0x230   :  { %1680 = vmatpush3.bf16.msra.mxu1 %v1679_v4  ;;  %1710 = vmatprep.subr.bf16.mxu0 %v1709_v36 }
 0x231   :  { %1682 = vmatprep.subr.bf16.mxu1 %v1681_v9 }
 0x233   :  { %1712 = vmatpush3.bf16.msra.mxu0 %v1709_v36 }
 0x234   :  { %1684 = vmatpush3.bf16.msra.mxu1 %v1683_v12  ;;  %1714 = vmatprep.subr.bf16.mxu0 %v1713_v45 }
 0x235   :  { %1686 = vmatprep.subr.bf16.mxu1 %v1685_v15 }
 0x237   :  { %1716 = vmatpush3.bf16.msra.mxu0 %v1713_v45 }
 0x238   :  { %1688 = vmatpush3.bf16.msra.mxu1 %v1687_v18  ;;  %1718 = vmatprep.subr.bf16.mxu0 %v1717_v54 }
 0x239   :  { %1690 = vmatprep.subr.bf16.mxu1 %v1689_v21 }
 0x23b   :  { %1720 = vmatpush3.bf16.msra.mxu0 %v1717_v54 }
 0x23c   :  { %1692 = vmatpush3.bf16.msra.mxu1 %v1691_v25 }
 0x23d   :  { %1694 = vmatprep.subr.bf16.mxu1 %v1693_v30 }
 0x240   :  { %1696 = vmatpush3.bf16.msra.mxu1 %v1695_v34 }
 0x241   :  { %1698 = vmatprep.subr.bf16.mxu1 %v1697_v39 }
 0x244   :  { %1700 = vmatpush3.bf16.msra.mxu1 %v1699_v43 }
 0x245   :  { %1702 = vmatprep.subr.bf16.mxu1 %v1701_v48 }
 0x248   :  { %1704 = vmatpush3.bf16.msra.mxu1 %v1703_v52 }
 0x2f5   :  { %v263_v55 = vpop.f32.mrb[0].mxu1 }
 0x2f6   :  { %v265_v56 = vpop.f32.mrb[1].mxu1 }
 0x2f9   :  { %v269_v57 = vpop.f32.mrb[2].mxu1  ;;  %v1540_v58 = vpop.f32.mrb[2].mxu0 }
 0x2fa   :  { %v271_v59 = vpop.f32.mrb[3].mxu1  ;;  %v340_v60 = vpop.f32.mrb[3].mxu0 }
 0x2fd   :  { %v427_v61 = vpop.f32.mrb[4].mxu1 }
 0x2fe   :  { %v513_v62 = vmul.f32 %v427_v61, %v263_v55  ;;  %v429_v63 = vpop.f32.mrb[5].mxu1 }
 0x2ff   :  { %v514_v0 = vmul.f32 %v429_v63, %v265_v56 }
 0x301   :  { %v1551_v1 = vpop.f32.mrb[4].mxu0  ;;  %v433_v2 = vpop.f32.mrb[6].mxu1 }
 0x302   :  { %v518_v3 = vmul.f32 %v1551_v1, %v1540_v58  ;;  %v516_v4 = vmul.f32 %v433_v2, %v269_v57  ;;  %v504_v6 = vpop.f32.mrb[5].mxu0  ;;  %v435_v8 = vpop.f32.mrb[7].mxu1 }
 0x303   :  { %v515_v9 = vmul.f32 %v504_v6, %v340_v60  ;;  %v517_v10 = vmul.f32 %v435_v8, %v271_v59 }
 0x304   :  { %v535_v11 = vsel %vm533_vm5, %v518_v3, 0.0  ;;  %v519_v12 = vadd.f32 %v516_v4, %v513_v62 }
 0x305   :  { %v534_v13 = vsel %vm533_vm5, %v515_v9, 0.0  ;;  %v526_v14 = vadd.f32 %v517_v10, %v514_v0 }
 0x306   :  { %v520_v15 = vrot.slane %v519_v12, 4  ;;  %v536_v16 = vadd.f32 %v535_v11, %v534_v13 }
 0x307   :  { %v527_v17 = vrot.slane %v526_v14, 4 }
 0x308   :  { %v521_v18 = vadd.f32 %v520_v15, %v519_v12  ;;  %v537_v19 = vrot.slane %v536_v16, 4 }
 0x309   :  { %v528_v20 = vadd.f32 %v527_v17, %v526_v14 }
 0x30a   :  { %v522_v21 = vrot.slane %v521_v18, 2  ;;  %v538_v22 = vadd.f32 %v537_v19, %v536_v16 }
 0x30b   :  { %v529_v23 = vrot.slane %v528_v20, 2 }
 0x30c   :  { %v523_v24 = vadd.f32 %v522_v21, %v521_v18  ;;  %v539_v25 = vrot.slane %v538_v22, 2 }
 0x30d   :  { %v530_v26 = vadd.f32 %v529_v23, %v528_v20 }
 0x30e   :  { %v524_v27 = vrot.slane %v523_v24, 1  ;;  %v540_v28 = vadd.f32 %v539_v25, %v538_v22  ;;  %v800_v25 = vld [vmem:[%s2307_s7] sm:$0xff] }
 0x30f   :  { %v531_v29 = vrot.slane %v530_v26, 1 }
 0x310   :  { %v525_v30 = vadd.f32 %v524_v27, %v523_v24  ;;  %v541_v31 = vrot.slane %v540_v28, 1 }
 0x311   :  { %v532_v32 = vadd.f32 %v531_v29, %v530_v26  ;;  %v801_v26 = vld [vmem:[%s2307_s7 + $0x8] sm:$0xff] }
 0x312   :  { %v543_v33 = vmul.f32 0.0625, %v525_v30  ;;  %v542_v34 = vadd.f32 %v541_v31, %v540_v28  ;;  %v1721_v27 = vpack.c.bf16 %v801_v26, %v800_v25  ;;  %v978_v28 = vld [vmem:[%s2308_s9] sm:$0xff]  ;;  %v979_v29 = vld [vmem:[%s2308_s9 + $0x8] sm:$0xff]  ;;  %v802_v31 = vld [vmem:[%s2307_s7 + $0x10] sm:$0xff] }
 0x313   :  { %v544_v35 = vmul.f32 0.0625, %v532_v32  ;;  %v1737_v30 = vpack.c.bf16 %v979_v29, %v978_v28  ;;  %v803_v32 = vld [vmem:[%s2307_s7 + $0x18] sm:$0xff]  ;;  %v1404_v29 = vld [vmem:[%s2316_s14] ss:$0 sm:$0xff] }
 0x314   :  { %v546_v36 = vsub.f32 %v513_v62, %v543_v33  ;;  %v549_v37 = vsub.f32 %v516_v4, %v543_v33  ;;  %v545_v38 = vmul.f32 0.0625, %v542_v34  ;;  %1722 = vmatprep.subr.bf16.mxu0 %v1721_v27  ;;  %v1725_v33 = vpack.c.bf16 %v803_v32, %v802_v31  ;;  %v980_v34 = vld [vmem:[%s2308_s9 + $0x10] sm:$0xff]  ;;  %v1413_v31 = vld [vmem:[%s2317_s17] ss:$0 sm:$0xff] }
 0x315   :  { %v550_v39 = vsub.f32 %v517_v10, %v544_v35  ;;  %v547_v40 = vsub.f32 %v514_v0, %v544_v35  ;;  %1738 = vmatprep.subr.bf16.mxu1 %v1737_v30  ;;  %v981_v35 = vld [vmem:[%s2308_s9 + $0x18] sm:$0xff] }
 0x316   :  { %v552_v41 = vmul.f32 %v546_v36, %v546_v36  ;;  %v555_v42 = vmul.f32 %v549_v37, %v549_v37  ;;  %v548_v43 = vsub.f32 %v515_v9, %v545_v38  ;;  %v551_v44 = vsub.f32 %v518_v3, %v545_v38  ;;  %v893_v38 = vld [vmem:[%s2309_s8 + $0x8] sm:$0xff] }
 0x317   :  { %v556_v45 = vmul.f32 %v550_v39, %v550_v39  ;;  %v553_v46 = vmul.f32 %v547_v40, %v547_v40 }
 0x318   :  { %v558_v47 = vadd.f32 %v555_v42, %v552_v41  ;;  %v554_v48 = vmul.f32 %v548_v43, %v548_v43  ;;  %v557_v49 = vmul.f32 %v551_v44, %v551_v44  ;;  %v1243_v41 = vld [vmem:[%s2310_s12 + $0x8] sm:$0xff] }
 0x319   :  { %v565_v50 = vadd.f32 %v556_v45, %v553_v46 }
 0x31a   :  { %v559_v51 = vrot.slane %v558_v47, 4  ;;  %v572_v52 = vsel %vm533_vm5, %v554_v48, 0.0  ;;  %v573_v53 = vsel %vm533_vm5, %v557_v49, 0.0 }
 0x31b   :  { %v574_v54 = vadd.f32 %v573_v53, %v572_v52  ;;  %v566_v55 = vrot.slane %v565_v50, 4 }
 0x31c   :  { %v560_v56 = vadd.f32 %v559_v51, %v558_v47 }
 0x31d   :  { %v575_v57 = vrot.slane %v574_v54, 4  ;;  %v567_v58 = vadd.f32 %v566_v55, %v565_v50 }
 0x31e   :  { %v561_v59 = vrot.slane %v560_v56, 2 }
 0x31f   :  { %v576_v60 = vadd.f32 %v575_v57, %v574_v54  ;;  %v568_v61 = vrot.slane %v567_v58, 2  ;;  %v894_v57 = vld [vmem:[%s2309_s8 + $0x10] sm:$0xff] }
 0x320   :  { %v562_v62 = vadd.f32 %v561_v59, %v560_v56 }
 0x321   :  { %v577_v63 = vrot.slane %v576_v60, 2  ;;  %v569_v0 = vadd.f32 %v568_v61, %v567_v58  ;;  %v895_v58 = vld [vmem:[%s2309_s8 + $0x18] sm:$0xff] }
 0x322   :  { %v563_v1 = vrot.slane %v562_v62, 1 }
 0x323   :  { %v578_v2 = vadd.f32 %v577_v63, %v576_v60  ;;  %v570_v3 = vrot.slane %v569_v0, 1  ;;  %v1245_v60 = vld [vmem:[%s2310_s12 + $0x18] sm:$0xff]  ;;  %v1064_v63 = vld [vmem:[%s2311_s10] sm:$0xff] }
 0x324   :  { %v564_v4 = vadd.f32 %v563_v1, %v562_v62  ;;  %v1733_v62 = vpack.c.bf16 %v895_v58, %v894_v57 }
 0x325   :  { %v579_v6 = vrot.slane %v578_v2, 1  ;;  %v571_v8 = vadd.f32 %v570_v3, %v569_v0  ;;  %v1066_v3 = vld [vmem:[%s2311_s10 + $0x10] sm:$0xff] }
 0x326   :  { %v581_v9 = vmul.f32 0.0625, %v564_v4  ;;  %v1067_v4 = vld [vmem:[%s2311_s10 + $0x18] sm:$0xff] }
 0x327   :  { %v580_v10 = vadd.f32 %v579_v6, %v578_v2  ;;  %v582_v11 = vmul.f32 0.0625, %v571_v8  ;;  %v2222_v2 = vld [vmem:[%s2312_s1] sm:$0xff]  ;;  %v1749_v6 = vpack.c.bf16 %v1067_v4, %v1066_v3  ;;  %v1373_v3 = vld [vmem:[%s2320_s2 + $0x8] sm:$0xff] }
 0x328   :  { %v584_v12 = vadd.f32 1e-05, %v581_v9  ;;  %v1156_v8 = vld [vmem:[%s2313_s11] sm:$0xff]  ;;  %v1157_v9 = vld [vmem:[%s2313_s11 + $0x8] sm:$0xff] }
 0x329   :  { %v583_v13 = vmul.f32 0.0625, %v580_v10  ;;  %v585_v14 = vadd.f32 1e-05, %v582_v11  ;;  %v2242_v10 = vld [vmem:[%s2312_s1 + $0x8] sm:$0xff]  ;;  %v1753_v11 = vpack.c.bf16 %v1157_v9, %v1156_v8  ;;  %v1372_v8 = vld [vmem:[%s2320_s2] sm:$0xff] }
 0x32a   :  { %1791 = vrsqrt.f32 %v584_v12  ;;  %v1158_v12 = vld [vmem:[%s2313_s11 + $0x10] sm:$0xff] }
 0x32b   :  { %v586_v15 = vadd.f32 1e-05, %v583_v13  ;;  %1793 = vrsqrt.f32 %v585_v14  ;;  %v1159_v13 = vld [vmem:[%s2313_s11 + $0x18] sm:$0xff] }
 0x32c   :  { %v1757_v14 = vpack.c.bf16 %v1159_v13, %v1158_v12 }
 0x32d   :  { %1795 = vrsqrt.f32 %v586_v15 }
 0x334   :  { %v1792_v16 = vpop.eup %1791 }
 0x335   :  { %v1794_v17 = vpop.eup %1793  ;;  %v590_v18 = vmul.f32 %v1792_v16, %v546_v36  ;;  %v593_v19 = vmul.f32 %v1792_v16, %v549_v37  ;;  %v1741_v36 = vpack.c.bf16 %v981_v35, %v980_v34  ;;  %v892_v37 = vld [vmem:[%s2309_s8] sm:$0xff] }
 0x336   :  { %v591_v20 = vmul.f32 %v1794_v17, %v547_v40  ;;  %v594_v21 = vmul.f32 %v1794_v17, %v550_v39  ;;  %v1729_v39 = vpack.c.bf16 %v893_v38, %v892_v37  ;;  %v1242_v40 = vld [vmem:[%s2310_s12] sm:$0xff] }
 0x337   :  { %v1796_v22 = vpop.eup %1795  ;;  %v1761_v42 = vpack.c.bf16 %v1243_v41, %v1242_v40 }
 0x338   :  { %v592_v23 = vmul.f32 %v1796_v22, %v548_v43  ;;  %v595_v24 = vmul.f32 %v1796_v22, %v551_v44  ;;  %706 = vmatprep.mubr.f32.mxu1 %v591_v20 }
 0x339   :  { %707 = vmatmul.mubr.f32.vlgmr.msra.gmra.mrb[8].mxu1 %v590_v18 }
 0x33a   :  { %1568 = vmatprep.mubr.msk.f32.mxu0 %vm533_vm5, %v592_v23  ;;  %711 = vmatprep.mubr.f32.mxu1 %v594_v21  ;;  %v1410_v21 = vld [vmem:[%s2315_s16] ss:$0 sm:$0xff] }
 0x33b   :  { %1569 = vmatmul.mubr.msk.f32.vlgmr.msra.gmra.mrb[6].mxu0 %vm533_vm5, %v595_v24  ;;  %1740 = vmatpush3.bf16.msra.mxu1 %v1737_v30 }
 0x33c   :  { %1724 = vmatpush3.bf16.msra.mxu0 %v1721_v27  ;;  %1742 = vmatprep.subr.bf16.mxu1 %v1741_v36 }
 0x33d   :  { %712 = vmatmul.mubr.f32.gmra.mrb[10].mxu1 %v593_v19  ;;  %1726 = vmatprep.subr.bf16.mxu0 %v1725_v33  ;;  %v1401_v19 = vld [vmem:[%s2314_s13] ss:$0 sm:$0xff] }
 0x33f   :  { %1744 = vmatpush3.bf16.msra.mxu1 %v1741_v36 }
 0x340   :  { %1728 = vmatpush3.bf16.msra.mxu0 %v1725_v33  ;;  %1762 = vmatprep.subr.bf16.mxu1 %v1761_v42 }
 0x341   :  { %1730 = vmatprep.subr.bf16.mxu0 %v1729_v39 }
 0x40c   :  { %v1471_v43 = vpop.f32.mrb[8].mxu1 }
 0x40d   :  { %v1472_v44 = vpop.f32.mrb[9].mxu1 }
 0x40e   :  { %v1473_v45 = vadd.f32 %v1472_v44, %v1471_v43  ;;  %v1570_v46 = vpop.f32.mrb[6].mxu0  ;;  %v1416_v43 = vld [vmem:[%s2318_s18] ss:$0 sm:$0xff] }
 0x40f   :  { %v783_v47 = vpop.f32.mrb[7].mxu0 }
 0x410   :  { %v784_v48 = vadd.f32 %v1473_v45, %v783_v47  ;;  %v1474_v49 = vpop.f32.mrb[10].mxu1 }
 0x411   :  { %v1475_v50 = vpop.f32.mrb[11].mxu1 }
 0x412   :  { %v792_v51 = vmul.f32 0.01, %v784_v48  ;;  %v1476_v52 = vadd.f32 %v1475_v50, %v1474_v49  ;;  %v1407_v48 = vld [vmem:[%s2319_s15] ss:$0 sm:$0xff] }
 0x414   :  { %v794_v53 = vadd.f32 %v792_v51, %v1939_v5  ;;  %v789_v54 = vadd.f32 %v1570_v46, %v1476_v52  ;;  %v1244_v5 = vld [vmem:[%s2310_s12 + $0x10] sm:$0xff] }
 0x415   :  { %v1765_v0 = vpack.c.bf16 %v1245_v60, %v1244_v5 }
 0x416   :  { %v796_v55 = vmax.f32 %v794_v53, 0.0  ;;  %v793_v56 = vmul.f32 0.01, %v789_v54 }
 0x418   :  { %v795_v59 = vadd.f32 %v793_v56, %v1946_v7  ;;  %1579 = vmatprep.mubr.msk.f32.mxu0 %vm70_vm0, %v796_v55  ;;  %1601 = vmatprep.mubr.msk.f32.mxu1 %vm70_vm0, %v796_v55  ;;  %v1065_v7 = vld [vmem:[%s2311_s10 + $0x8] sm:$0xff] }
 0x419   :  { %v1745_v1 = vpack.c.bf16 %v1065_v7, %v1064_v63 }
 0x41a   :  { %v797_v61 = vmax.f32 %v795_v59, 0.0 }
 0x41c   :  { %1580 = vmatmul.mubr.msk.f32.vlgmr.msra.gmra.mrb[8].mxu0 %vm70_vm0, %v797_v61  ;;  %1602 = vmatmul.mubr.msk.f32.vlgmr.msra.gmra.mrb[12].mxu1 %vm70_vm0, %v797_v61 }
 0x41d   :  { %1732 = vmatpush3.bf16.msra.mxu0 %v1729_v39  ;;  %1590 = vmatprep.mubr.msk.f32.mxu0 %vm70_vm0, %v796_v55 }
 0x41e   :  { %1734 = vmatprep.subr.bf16.mxu0 %v1733_v62  ;;  %1764 = vmatpush3.bf16.msra.mxu1 %v1761_v42 }
 0x41f   :  { %1766 = vmatprep.subr.bf16.mxu1 %v1765_v0  ;;  %1634 = vmatprep.mubr.msk.f32.mxu1 %vm70_vm0, %v2222_v2 }
 0x421   :  { %1736 = vmatpush3.bf16.msra.mxu0 %v1733_v62 }
 0x422   :  { %1746 = vmatprep.subr.bf16.mxu0 %v1745_v1  ;;  %1768 = vmatpush3.bf16.msra.mxu1 %v1765_v0 }
 0x424   :  { %1591 = vmatmul.mubr.msk.f32.vlgmr.msra.gmra.mrb[10].mxu0 %vm70_vm0, %v797_v61 }
 0x425   :  { %1748 = vmatpush3.bf16.msra.mxu0 %v1745_v1  ;;  %1612 = vmatprep.mubr.msk.f32.mxu0 %vm70_vm0, %v2222_v2 }
 0x426   :  { %1750 = vmatprep.subr.bf16.mxu0 %v1749_v6  ;;  %1635 = vmatmul.mubr.msk.f32.vlgmr.msra.gmra.mrb[14].mxu1 %vm70_vm0, %v2242_v10 }
 0x429   :  { %1752 = vmatpush3.bf16.msra.mxu0 %v1749_v6 }
 0x42a   :  { %1754 = vmatprep.subr.bf16.mxu0 %v1753_v11 }
 0x42c   :  { %1613 = vmatmul.mubr.msk.f32.vlgmr.msra.gmra.mrb[8].mxu0 %vm70_vm0, %v2242_v10 }
 0x42d   :  { %1756 = vmatpush3.bf16.msra.mxu0 %v1753_v11  ;;  %1623 = vmatprep.mubr.msk.f32.mxu0 %vm70_vm0, %v2222_v2 }
 0x42e   :  { %1758 = vmatprep.subr.bf16.mxu0 %v1757_v14 }
 0x431   :  { %1760 = vmatpush3.bf16.msra.mxu0 %v1757_v14 }
 0x434   :  { %1624 = vmatmul.mubr.msk.f32.vlgmr.msra.gmra.mrb[10].mxu0 %vm70_vm0, %v2242_v10 }
 0x4ef   :  { %v1603_v15 = vpop.f32.mrb[12].mxu1 }
 0x4f0   :  { %v1055_v16 = vpop.f32.mrb[13].mxu1  ;;  %v1061_v53 = vadd.f32 %v1603_v15, %v1407_v48 }
 0x4f1   :  { %v1056_v55 = vadd.f32 %v1407_v48, %v1055_v16 }
 0x4f9   :  { %v1636_v17 = vpop.f32.mrb[14].mxu1 }
 0x4fa   :  { %v1319_v18 = vpop.f32.mrb[15].mxu1  ;;  %v1325_v47 = vadd.f32 %v1636_v17, %v1416_v43 }
 0x4fb   :  { %v1320_v50 = vadd.f32 %v1416_v43, %v1319_v18 }
 0x4ff   :  { %v1614_v20 = vpop.f32.mrb[8].mxu0 }
 0x500   :  { %v1769_v22 = vadd.f32 %v1614_v20, %v1401_v19  ;;  %v1147_v23 = vpop.f32.mrb[9].mxu0 }
 0x501   :  { %v1771_v24 = vadd.f32 %v1401_v19, %v1147_v23 }
 0x502   :  { %v1770_v25 = vadd.f32 %v1769_v22, %v1410_v21 }
 0x503   :  { %v1772_v26 = vadd.f32 %v1771_v24, %v1410_v21 }
 0x504   :  { %v1420_v27 = vmul.f32 -1.442695, %v1770_v25 }
 0x505   :  { %v1419_v28 = vmul.f32 -1.442695, %v1772_v26 }
 0x506   :  { %1797 = vpow2.f32 %v1420_v27 }
 0x507   :  { %1799 = vpow2.f32 %v1419_v28  ;;  %v1625_v30 = vpop.f32.mrb[10].mxu0 }
 0x508   :  { %v1773_v32 = vadd.f32 %v1625_v30, %v1404_v29  ;;  %v1233_v33 = vpop.f32.mrb[11].mxu0 }
 0x509   :  { %v1775_v34 = vadd.f32 %v1404_v29, %v1233_v33 }
 0x50a   :  { %v1774_v35 = vadd.f32 %v1773_v32, %v1413_v31 }
 0x50b   :  { %v1776_v36 = vadd.f32 %v1775_v34, %v1413_v31 }
 0x50c   :  { %v1422_v37 = vmul.f32 -1.442695, %v1774_v35 }
 0x50d   :  { %v1421_v38 = vmul.f32 -1.442695, %v1776_v36 }
 0x50e   :  { %1801 = vpow2.f32 %v1422_v37 }
 0x50f   :  { %1803 = vpow2.f32 %v1421_v38 }
 0x510   :  { %v1798_v39 = vpop.eup %1797 }
 0x511   :  { %v1800_v40 = vpop.eup %1799  ;;  %v1337_v41 = vadd.f32 1.0, %v1798_v39 }
 0x512   :  { %v1336_v42 = vadd.f32 1.0, %v1800_v40 }
 0x513   :  { %1805 = vrcp.f32 %v1337_v41 }
 0x514   :  { %1807 = vrcp.f32 %v1336_v42 }
 0x518   :  { %v1802_v44 = vpop.eup %1801 }
 0x519   :  { %v1804_v45 = vpop.eup %1803  ;;  %v1351_v46 = vadd.f32 1.0, %v1802_v44 }
 0x51a   :  { %v1350_v49 = vadd.f32 1.0, %v1804_v45 }
 0x51b   :  { %1809 = vrcp.f32 %v1351_v46 }
 0x51c   :  { %1811 = vrcp.f32 %v1350_v49 }
 0x51d   :  { %v1806_v51 = vpop.eup %1805 }
 0x51e   :  { %v1808_v52 = vpop.eup %1807  ;;  %v1357_v54 = vmul.f32 %v1806_v51, %v1325_v47 }
 0x51f   :  { %v1356_v56 = vmul.f32 %v1808_v52, %v1320_v50 }
 0x520   :  { %v1359_v57 = vadd.f32 %v1357_v54, %v1061_v53 }
 0x521   :  { %v1358_v58 = vadd.f32 %v1356_v56, %v1056_v55 }
 0x522   :  { %1813 = vtanh.f32 %v1359_v57 }
 0x523   :  { %1815 = vtanh.f32 %v1358_v58 }
 0x525   :  { %v1810_v59 = vpop.eup %1809 }
 0x526   :  { %v1812_v5 = vpop.eup %1811  ;;  %v1363_v60 = vsub.f32 1.0, %v1810_v59  ;;  %v1367_v7 = vmul.f32 %v1810_v59, %v2242_v10 }
 0x527   :  { %v1362_v62 = vsub.f32 1.0, %v1812_v5  ;;  %v1366_v1 = vmul.f32 %v1812_v5, %v2222_v2 }
 0x52c   :  { %v1814_v61 = vpop.eup %1813 }
 0x52d   :  { %v1816_v63 = vpop.eup %1815  ;;  %v1365_v0 = vmul.f32 %v1814_v61, %v1363_v60 }
 0x52e   :  { %v1364_v4 = vmul.f32 %v1816_v63, %v1362_v62 }
 0x52f   :  { %v1369_v6 = vadd.f32 %v1367_v7, %v1365_v0 }
 0x530   :  { %v1368_v9 = vadd.f32 %v1366_v1, %v1364_v4 }
 0x531   :  { %1371 = vst.msk [vmem:[%s2321_s20 + $0x8] sm:$0xff] %vm70_vm0, %v1369_v6  ;;  %v1375_v10 = vadd.f32 %v1373_v3, %v1369_v6 }
 0x532   :  { %1370 = vst.msk [vmem:[%s2321_s20] sm:$0xff] %vm70_vm0, %v1368_v9  ;;  %v1374_v2 = vadd.f32 %v1372_v8, %v1368_v9 }
 0x533   :  { %1377 = vst.msk [vmem:[%s2322_s19 + $0x8] sm:$0xff] %vm70_vm0, %v1375_v10 }
 0x534   :  { %1376 = vst.msk [vmem:[%s2322_s19] sm:$0xff] %vm70_vm0, %v1374_v2 }

// kernel: mpnn_bayes_forward.14
= control target key start
LH: loop header
LB: loop body
LE: loop exit
PB: predicated region body
PF: predicated region fallthrough
CT: control target
= control target key end

     0   :  { %s2339_s0 = inlined_call_operand.vmem [shape: f32[16,32], index: 0, kind: input, shape index: {}]   ;;  %s2340_s1 = inlined_call_operand.vmem [shape: f32[16,32], index: 1, kind: input, shape index: {}]   ;;  %s2341_s2 = inlined_call_operand.vmem [shape: f32[16,32], index: 2, kind: input, shape index: {}]   ;;  %s2342_s3 = inlined_call_operand.vmem [shape: f32[32,10], index: 3, kind: input, shape index: {}]   ;;  %s2343_s4 = inlined_call_operand.vmem [shape: f32[10,320], index: 4, kind: input, shape index: {}]   ;;  %s2344_s5 = inlined_call_operand.vmem [shape: f32[32,320], index: 5, kind: input, shape index: {}]   ;;  %s2345_s6 = inlined_call_operand.vmem [shape: f32[320,32], index: 6, kind: input, shape index: {}]   ;;  %s2346_s7 = inlined_call_operand.vmem [shape: f32[32,32], index: 7, kind: input, shape index: {}]   ;;  %s2347_s8 = inlined_call_operand.vmem [shape: f32[32,32], index: 8, kind: input, shape index: {}]   ;;  %s2348_s9 = inlined_call_operand.vmem [shape: f32[32,32], index: 9, kind: input, shape index: {}]   ;;  %s2349_s10 = inlined_call_operand.vmem [shape: f32[32,32], index: 10, kind: input, shape index: {}]   ;;  %s2350_s11 = inlined_call_operand.vmem [shape: f32[32,32], index: 11, kind: input, shape index: {}]   ;;  %s2351_s12 = inlined_call_operand.vmem [shape: f32[32,32], index: 12, kind: input, shape index: {}]   ;;  %s2352_s13 = inlined_call_operand.vmem [shape: f32[1,32], index: 13, kind: input, shape index: {}]   ;;  %s2353_s14 = inlined_call_operand.vmem [shape: f32[1,32], index: 14, kind: input, shape index: {}]   ;;  %s2354_s15 = inlined_call_operand.vmem [shape: f32[1,32], index: 15, kind: input, shape index: {}]   ;;  %s2355_s16 = inlined_call_operand.vmem [shape: f32[1,32], index: 16, kind: input, shape index: {}]   ;;  %s2356_s17 = inlined_call_operand.vmem [shape: f32[1,32], index: 17, kind: input, shape index: {}]   ;;  %s2357_s18 = inlined_call_operand.vmem [shape: f32[1,32], index: 18, kind: input, shape index: {}]   ;;  %s2358_s19 = inlined_call_operand.vmem [shape: f32[16,32], index: 19, kind: output, shape index: {0}]   ;;  %s2359_s20 = inlined_call_operand.hbm [shape: f32[16,32], index: 20, kind: output, shape index: {1}]  }
   0x1   :  { %2365 = sst [smem:[#allocation5_spill]] %s2339_s0 }
   0x2   :  { %2366 = sst [smem:[#allocation6_spill]] %s2340_s1 }
   0x3   :  { %2367 = sst [smem:[#allocation7_spill]] %s2341_s2 }
   0x4   :  { %2368 = sst [smem:[#allocation8_spill]] %s2342_s3 }
   0x5   :  { %2369 = sst [smem:[#allocation9_spill]] %s2343_s4 }
   0x6   :  { %s2370_s23 = sld [smem:[#allocation8_spill]]  ;;  %vm71_vm0 = vcmask 261120   ;;  %s2371_s29 = sld [smem:[#allocation5_spill]] }
   0xc   :  { %v67_v0 = vld [vmem:[%s2370_s23] sm:$0xff]  ;;  %v68_v1 = vld [vmem:[%s2370_s23 + $0x8] sm:$0xff]  ;;  %v69_v2 = vld [vmem:[%s2370_s23 + $0x10] sm:$0xff] }
   0xd   :  { %v1650_v3 = vpack.c.bf16 %v68_v1, %v67_v0  ;;  %v70_v4 = vld [vmem:[%s2370_s23 + $0x18] sm:$0xff]  ;;  %v1982_v5 = vld [vmem:[%s2371_s29] sm:$0xff] }
   0xe   :  { %v1654_v6 = vpack.c.bf16 %v70_v4, %v69_v2  ;;  %1544 = vmatprep.mubr.msk.f32.mxu0 %vm71_vm0, %v1982_v5 }
   0xf   :  { %26 = vsyncpa [#allocation3], 0  ;;  %1651 = vmatprep.subr.bf16.mxu0 %v1650_v3  ;;  %v1989_v7 = vld [vmem:[%s2371_s29 + $0x8] sm:$0xff]  ;;  %vm153_vm1 = vcmask 80896   ;;  %s2372_s22 = sld [smem:[#allocation9_spill]]  ;;  %vm188_vm2 = vcmask 1041408  }
  0x10   :  { %1653 = vmatpush3.bf16.msra.mxu0 %v1650_v3  ;;  %vm1857_vm3 = vmmov 1   ;;  %v1858_v29 = vmov 0.0   ;;  %v351_v31 = vld [vmem:[%s2344_s5 + $0x8] sm:$0xff]  ;;  %v354_v32 = vld [vmem:[%s2344_s5 + $0x20] sm:$0xff]  ;;  %v352_v35 = vld [vmem:[%s2344_s5 + $0x10] sm:$0xff]  ;;  %vm534_vm5 = vcmask 523264  }
  0x11   :  { %1655 = vmatprep.subr.bf16.mxu0 %v1654_v6  ;;  %vm1659_vm4 = vmpackc.low %vm188_vm2, %vm1857_vm3  ;;  %262 = vmatprep.mubr.f32.mxu1 %v1858_v29  ;;  %v1670_v34 = vpack.c.bf16 %v354_v32, %v351_v31  ;;  %v355_v36 = vld [vmem:[%s2344_s5 + $0x28] sm:$0xff]  ;;  %v350_v40 = vld [vmem:[%s2344_s5] sm:$0xff] }
  0x12   :  { %v1678_v37 = vpack.c.bf16 %v355_v36, %v352_v35  ;;  %v353_v41 = vld [vmem:[%s2344_s5 + $0x18] sm:$0xff]  ;;  %v360_v43 = vld [vmem:[%s2344_s5 + $0x50] sm:$0xff]  ;;  %v359_v49 = vld [vmem:[%s2344_s5 + $0x48] sm:$0xff] }
  0x13   :  { %v357_v42 = vld [vmem:[%s2344_s5 + $0x38] sm:$0xff]  ;;  %v1672_v45 = vpack.c.bf16 %v353_v41, %v350_v40  ;;  %v356_v48 = vld [vmem:[%s2344_s5 + $0x30] sm:$0xff]  ;;  %v358_v50 = vld [vmem:[%s2344_s5 + $0x40] sm:$0xff] }
  0x14   :  { %1657 = vmatpush3.bf16.msra.mxu0 %v1654_v6  ;;  %v1674_v47 = vpack.c.bf16 %v360_v43, %v357_v42  ;;  %v361_v51 = vld [vmem:[%s2344_s5 + $0x58] sm:$0xff]  ;;  %v1676_v53 = vpack.c.bf16 %v359_v49, %v356_v48  ;;  %v613_v56 = vld [vmem:[%s2345_s6 + $0x80] sm:$0xff]  ;;  %v614_v57 = vld [vmem:[%s2345_s6 + $0x88] sm:$0xff] }
  0x15   :  { %v177_v22 = vld [vmem:[%s2372_s22 + $0x8] sm:$0xff]  ;;  %v180_v23 = vld [vmem:[%s2372_s22 + $0x20] sm:$0x3]  ;;  %v179_v26 = vld [vmem:[%s2372_s22 + $0x18] sm:$0x3]  ;;  %v1682_v55 = vpack.c.bf16 %v361_v51, %v358_v50  ;;  %v1686_v58 = vpack.c.bf16 %v614_v57, %v613_v56 }
  0x16   :  { %v176_v24 = vld [vmem:[%s2372_s22] sm:$0xff]  ;;  %v1658_v25 = vpack.c.bf16 %v180_v23, %v177_v22  ;;  %v178_v27 = vld [vmem:[%s2372_s22 + $0x10] sm:$0xff]  ;;  %v181_v30 = vld [vmem:[%s2372_s22 + $0x28] sm:$0x3] }
  0x17   :  { %1545 = vmatmul.mubr.msk.f32.vlgmr.msra.gmra.mrb[0].mxu0 %vm71_vm0, %v1989_v7  ;;  %v1661_v28 = vpack.c.bf16 %v179_v26, %v176_v24  ;;  %v1664_v33 = vpack.c.bf16 %v181_v30, %v178_v27  ;;  %v597_v59 = vld [vmem:[%s2345_s6] sm:$0xff]  ;;  %v598_v60 = vld [vmem:[%s2345_s6 + $0x8] sm:$0xff]  ;;  %v615_v62 = vld [vmem:[%s2345_s6 + $0x90] sm:$0xff] }
  0x18   :  { %1660 = vmatprep.subr.msk.bf16.mxu1 %vm1659_vm4, %v1658_v25  ;;  %v1688_v61 = vpack.c.bf16 %v598_v60, %v597_v59  ;;  %v616_v63 = vld [vmem:[%s2345_s6 + $0x98] sm:$0xff]  ;;  %v599_v1 = vld [vmem:[%s2345_s6 + $0x10] sm:$0xff]  ;;  %v617_v4 = vld [vmem:[%s2345_s6 + $0xa0] sm:$0xff] }
  0x19   :  { %1663 = vmatpush1.bf16.msk.msra.mxu1 %vm1659_vm4, %v1661_v28  ;;  %1666 = vmatprep.subr.msk.bf16.mxu0 %vm1659_vm4, %v1664_v33  ;;  %v1690_v0 = vpack.c.bf16 %v616_v63, %v615_v62  ;;  %v600_v2 = vld [vmem:[%s2345_s6 + $0x18] sm:$0xff]  ;;  %v618_v6 = vld [vmem:[%s2345_s6 + $0xa8] sm:$0xff]  ;;  %v629_v23 = vld [vmem:[%s2345_s6 + $0x100] sm:$0xff] }
  0x1a   :  { %1671 = vmatprep.subr.bf16.mxu1 %v1670_v34  ;;  %1669 = vmatpush3.bf16.msk.msra.mxu0 %vm1659_vm4, %v1664_v33  ;;  %v1692_v3 = vpack.c.bf16 %v600_v2, %v599_v1  ;;  %v606_v22 = vld [vmem:[%s2345_s6 + $0x48] sm:$0xff]  ;;  %v623_v27 = vld [vmem:[%s2345_s6 + $0xd0] sm:$0xff]  ;;  %v624_v28 = vld [vmem:[%s2345_s6 + $0xd8] sm:$0xff] }
  0x1b   :  { %1679 = vmatprep.subr.bf16.mxu0 %v1678_v37  ;;  %v630_v25 = vld [vmem:[%s2345_s6 + $0x108] sm:$0xff]  ;;  %v607_v30 = vld [vmem:[%s2345_s6 + $0x50] sm:$0xff]  ;;  %v608_v31 = vld [vmem:[%s2345_s6 + $0x58] sm:$0xff] }
  0x1c   :  { %v1718_v26 = vpack.c.bf16 %v630_v25, %v629_v23  ;;  %v631_v32 = vld [vmem:[%s2345_s6 + $0x110] sm:$0xff]  ;;  %v1708_v33 = vpack.c.bf16 %v608_v31, %v607_v30  ;;  %v632_v34 = vld [vmem:[%s2345_s6 + $0x118] sm:$0xff]  ;;  %v625_v36 = vld [vmem:[%s2345_s6 + $0xe0] sm:$0xff] }
  0x1d   :  { %v1722_v35 = vpack.c.bf16 %v632_v34, %v631_v32  ;;  %v610_v40 = vld [vmem:[%s2345_s6 + $0x68] sm:$0xff]  ;;  %v633_v41 = vld [vmem:[%s2345_s6 + $0x120] sm:$0xff]  ;;  %v611_v48 = vld [vmem:[%s2345_s6 + $0x70] sm:$0xff] }
  0x1e   :  { %v634_v43 = vld [vmem:[%s2345_s6 + $0x128] sm:$0xff]  ;;  %v612_v49 = vld [vmem:[%s2345_s6 + $0x78] sm:$0xff]  ;;  %v635_v50 = vld [vmem:[%s2345_s6 + $0x130] sm:$0xff] }
  0x1f   :  { %v1716_v51 = vpack.c.bf16 %v612_v49, %v611_v48 }
  0xea   :  { %v1546_v8 = vpop.f32.mrb[0].mxu0 }
  0xeb   :  { %v144_v9 = vpop.f32.mrb[1].mxu0  ;;  %v157_v11 = vsel %vm153_vm1, %v1546_v8, -inf }
  0xec   :  { %v154_v10 = vsel %vm153_vm1, %v144_v9, -inf }
  0xed   :  { %155 = vmax.xlane.f32.xlu0 %v154_v10  ;;  %v602_v10 = vld [vmem:[%s2345_s6 + $0x28] sm:$0xff] }
  0xf1   :  { %158 = vmax.xlane.f32.xlu0 %v157_v11 }
 0x17a   :  { %v156_v12 = vpop.xlane.xlu0 %155 }
 0x17b   :  { %v160_v13 = vsub.f32 %v144_v9, %v156_v12  ;;  %v601_v9 = vld [vmem:[%s2345_s6 + $0x20] sm:$0xff]  ;;  %v619_v12 = vld [vmem:[%s2345_s6 + $0xb0] sm:$0xff] }
 0x17c   :  { %v1696_v11 = vpack.c.bf16 %v602_v10, %v601_v9 }
 0x17d   :  { %v162_v14 = vmul.f32 1.442695, %v160_v13  ;;  %v620_v13 = vld [vmem:[%s2345_s6 + $0xb8] sm:$0xff] }
 0x17e   :  { %v159_v15 = vpop.xlane.xlu0 %158 }
 0x17f   :  { %1799 = vpow2.f32 %v162_v14  ;;  %v161_v16 = vsub.f32 %v1546_v8, %v159_v15  ;;  %v1694_v8 = vpack.c.bf16 %v618_v6, %v617_v4  ;;  %v1698_v14 = vpack.c.bf16 %v620_v13, %v619_v12  ;;  %v603_v15 = vld [vmem:[%s2345_s6 + $0x30] sm:$0xff] }
 0x181   :  { %v164_v17 = vmul.f32 1.442695, %v161_v16  ;;  %v604_v16 = vld [vmem:[%s2345_s6 + $0x38] sm:$0xff] }
 0x183   :  { %1801 = vpow2.f32 %v164_v17  ;;  %v1700_v17 = vpack.c.bf16 %v604_v16, %v603_v15 }
 0x189   :  { %v1800_v18 = vpop.eup %1799 }
 0x18a   :  { %v166_v19 = vsel %vm153_vm1, %v1800_v18, 0.0 }
 0x18b   :  { %167 = vadd.xlane.f32.xlu1 %v166_v19  ;;  %v622_v19 = vld [vmem:[%s2345_s6 + $0xc8] sm:$0xff] }
 0x18d   :  { %v1802_v20 = vpop.eup %1801 }
 0x18e   :  { %v169_v21 = vsel %vm153_vm1, %v1802_v20, 0.0 }
 0x18f   :  { %170 = vadd.xlane.f32.xlu1 %v169_v21  ;;  %v605_v21 = vld [vmem:[%s2345_s6 + $0x40] sm:$0xff] }
 0x190   :  { %v1704_v24 = vpack.c.bf16 %v606_v22, %v605_v21 }
 0x218   :  { %v168_v38 = vpop.xlane.xlu1 %167 }
 0x219   :  { %1803 = vrcp.f32 %v168_v38 }
 0x21c   :  { %v171_v39 = vpop.xlane.xlu1 %170 }
 0x21d   :  { %1805 = vrcp.f32 %v171_v39  ;;  %v609_v39 = vld [vmem:[%s2345_s6 + $0x60] sm:$0xff] }
 0x21e   :  { %v1712_v42 = vpack.c.bf16 %v610_v40, %v609_v39 }
 0x223   :  { %v1804_v44 = vpop.eup %1803 }
 0x224   :  { %v173_v46 = vmul.f32 %v1804_v44, %v1800_v18  ;;  %v621_v18 = vld [vmem:[%s2345_s6 + $0xc0] sm:$0xff]  ;;  %v1726_v44 = vpack.c.bf16 %v634_v43, %v633_v41 }
 0x226   :  { %1403 = vmatmul.mubr.msk.f32.vlgmr.msra.gmra.mrb[0].mxu1 %vm153_vm1, %v173_v46  ;;  %1551 = vmatprep.mubr.msk.f32.mxu0 %vm153_vm1, %v173_v46  ;;  %v628_v46 = vld [vmem:[%s2345_s6 + $0xf8] sm:$0xff] }
 0x227   :  { %v1806_v52 = vpop.eup %1805  ;;  %1673 = vmatpush1.bf16.msra.mxu1 %v1672_v45  ;;  %268 = vmatprep.mubr.f32.mxu1 %v1858_v29  ;;  %v627_v45 = vld [vmem:[%s2345_s6 + $0xf0] sm:$0xff] }
 0x228   :  { %1675 = vmatprep.subr.bf16.mxu1 %v1674_v47  ;;  %v175_v54 = vmul.f32 %v1806_v52, %v1802_v20  ;;  %v1702_v20 = vpack.c.bf16 %v622_v19, %v621_v18  ;;  %v1714_v47 = vpack.c.bf16 %v628_v46, %v627_v45  ;;  %v636_v52 = vld [vmem:[%s2345_s6 + $0x138] sm:$0xff] }
 0x22a   :  { %1404 = vmatmul.mubr.msk.f32.gmra.mrb[2].mxu1 %vm153_vm1, %v175_v54  ;;  %1552 = vmatmul.mubr.msk.f32.vlgmr.msra.gmra.mrb[2].mxu0 %vm153_vm1, %v175_v54 }
 0x22b   :  { %1677 = vmatpush1.bf16.msra.mxu1 %v1676_v53  ;;  %1681 = vmatpush3.bf16.msra.mxu0 %v1678_v37  ;;  %v626_v37 = vld [vmem:[%s2345_s6 + $0xe8] sm:$0xff]  ;;  %v1730_v53 = vpack.c.bf16 %v636_v52, %v635_v50  ;;  %s2373_s6 = sld [smem:[#allocation6_spill]] }
 0x22c   :  { %426 = vmatprep.mubr.f32.mxu1 %v1858_v29  ;;  %1683 = vmatprep.subr.bf16.mxu0 %v1682_v55  ;;  %v1710_v38 = vpack.c.bf16 %v626_v37, %v625_v36 }
 0x22d   :  { %1562 = vmatprep.mubr.msk.f32.mxu0 %vm71_vm0, %v1982_v5  ;;  %1687 = vmatprep.subr.bf16.mxu1 %v1686_v58 }
 0x22e   :  { %1408 = vmatmul.mubr.msk.f32.vlgmr.msra.gmra.mrb[4].mxu1 %vm71_vm0, %v1982_v5 }
 0x22f   :  { %1685 = vmatpush3.bf16.msra.mxu0 %v1682_v55  ;;  %432 = vmatprep.mubr.f32.mxu1 %v1858_v29  ;;  %v1706_v29 = vpack.c.bf16 %v624_v28, %v623_v27 }
 0x230   :  { %1689 = vmatpush3.bf16.msra.mxu1 %v1688_v61  ;;  %1719 = vmatprep.subr.bf16.mxu0 %v1718_v26 }
 0x231   :  { %1691 = vmatprep.subr.bf16.mxu1 %v1690_v0 }
 0x232   :  { %1563 = vmatmul.mubr.msk.f32.vlgmr.msra.gmra.mrb[4].mxu0 %vm71_vm0, %v1989_v7  ;;  %1409 = vmatmul.mubr.msk.f32.gmra.mrb[6].mxu1 %vm71_vm0, %v1989_v7 }
 0x233   :  { %1721 = vmatpush3.bf16.msra.mxu0 %v1718_v26 }
 0x234   :  { %1693 = vmatpush3.bf16.msra.mxu1 %v1692_v3  ;;  %1723 = vmatprep.subr.bf16.mxu0 %v1722_v35 }
 0x235   :  { %1695 = vmatprep.subr.bf16.mxu1 %v1694_v8 }
 0x237   :  { %1725 = vmatpush3.bf16.msra.mxu0 %v1722_v35 }
 0x238   :  { %1697 = vmatpush3.bf16.msra.mxu1 %v1696_v11  ;;  %1727 = vmatprep.subr.bf16.mxu0 %v1726_v44 }
 0x239   :  { %1699 = vmatprep.subr.bf16.mxu1 %v1698_v14 }
 0x23b   :  { %1729 = vmatpush3.bf16.msra.mxu0 %v1726_v44 }
 0x23c   :  { %1701 = vmatpush3.bf16.msra.mxu1 %v1700_v17  ;;  %1731 = vmatprep.subr.bf16.mxu0 %v1730_v53 }
 0x23d   :  { %1703 = vmatprep.subr.bf16.mxu1 %v1702_v20 }
 0x23f   :  { %1733 = vmatpush3.bf16.msra.mxu0 %v1730_v53 }
 0x240   :  { %1705 = vmatpush3.bf16.msra.mxu1 %v1704_v24 }
 0x241   :  { %1707 = vmatprep.subr.bf16.mxu1 %v1706_v29 }
 0x244   :  { %1709 = vmatpush3.bf16.msra.mxu1 %v1708_v33 }
 0x245   :  { %1711 = vmatprep.subr.bf16.mxu1 %v1710_v38 }
 0x248   :  { %1713 = vmatpush3.bf16.msra.mxu1 %v1712_v42 }
 0x249   :  { %1715 = vmatprep.subr.bf16.mxu1 %v1714_v47 }
 0x24c   :  { %1717 = vmatpush3.bf16.msra.mxu1 %v1716_v51 }
 0x2f9   :  { %v264_v54 = vpop.f32.mrb[0].mxu1 }
 0x2fa   :  { %v266_v55 = vpop.f32.mrb[1].mxu1 }
 0x2fd   :  { %v270_v56 = vpop.f32.mrb[2].mxu1  ;;  %v1553_v57 = vpop.f32.mrb[2].mxu0 }
 0x2fe   :  { %v272_v58 = vpop.f32.mrb[3].mxu1  ;;  %v341_v59 = vpop.f32.mrb[3].mxu0 }
 0x301   :  { %v428_v60 = vpop.f32.mrb[4].mxu1 }
 0x302   :  { %v514_v61 = vmul.f32 %v428_v60, %v264_v54  ;;  %v430_v62 = vpop.f32.mrb[5].mxu1 }
 0x303   :  { %v515_v63 = vmul.f32 %v430_v62, %v266_v55 }
 0x305   :  { %v1564_v0 = vpop.f32.mrb[4].mxu0  ;;  %v434_v1 = vpop.f32.mrb[6].mxu1 }
 0x306   :  { %v519_v2 = vmul.f32 %v1564_v0, %v1553_v57  ;;  %v517_v3 = vmul.f32 %v434_v1, %v270_v56  ;;  %v505_v4 = vpop.f32.mrb[5].mxu0  ;;  %v436_v6 = vpop.f32.mrb[7].mxu1 }
 0x307   :  { %v516_v8 = vmul.f32 %v505_v4, %v341_v59  ;;  %v518_v9 = vmul.f32 %v436_v6, %v272_v58 }
 0x308   :  { %v536_v10 = vsel %vm534_vm5, %v519_v2, 0.0  ;;  %v520_v11 = vadd.f32 %v517_v3, %v514_v61 }
 0x309   :  { %v535_v12 = vsel %vm534_vm5, %v516_v8, 0.0  ;;  %v527_v13 = vadd.f32 %v518_v9, %v515_v63 }
 0x30a   :  { %v521_v14 = vrot.slane %v520_v11, 4  ;;  %v537_v15 = vadd.f32 %v536_v10, %v535_v12 }
 0x30b   :  { %v528_v16 = vrot.slane %v527_v13, 4 }
 0x30c   :  { %v522_v17 = vadd.f32 %v521_v14, %v520_v11  ;;  %v538_v18 = vrot.slane %v537_v15, 4 }
 0x30d   :  { %v529_v19 = vadd.f32 %v528_v16, %v527_v13 }
 0x30e   :  { %v523_v20 = vrot.slane %v522_v17, 2  ;;  %v539_v21 = vadd.f32 %v538_v18, %v537_v15 }
 0x30f   :  { %v530_v22 = vrot.slane %v529_v19, 2 }
 0x310   :  { %v524_v23 = vadd.f32 %v523_v20, %v522_v17  ;;  %v540_v24 = vrot.slane %v539_v21, 2 }
 0x311   :  { %v531_v25 = vadd.f32 %v530_v22, %v529_v19 }
 0x312   :  { %v525_v26 = vrot.slane %v524_v23, 1  ;;  %v541_v27 = vadd.f32 %v540_v24, %v539_v21  ;;  %v801_v24 = vld [vmem:[%s2346_s7] sm:$0xff] }
 0x313   :  { %v532_v28 = vrot.slane %v531_v25, 1 }
 0x314   :  { %v526_v29 = vadd.f32 %v525_v26, %v524_v23  ;;  %v542_v30 = vrot.slane %v541_v27, 1 }
 0x315   :  { %v533_v31 = vadd.f32 %v532_v28, %v531_v25  ;;  %v802_v25 = vld [vmem:[%s2346_s7 + $0x8] sm:$0xff] }
 0x316   :  { %v544_v32 = vmul.f32 0.0625, %v526_v29  ;;  %v543_v33 = vadd.f32 %v542_v30, %v541_v27  ;;  %v1734_v26 = vpack.c.bf16 %v802_v25, %v801_v24  ;;  %v979_v27 = vld [vmem:[%s2348_s9] sm:$0xff]  ;;  %v980_v28 = vld [vmem:[%s2348_s9 + $0x8] sm:$0xff]  ;;  %v803_v30 = vld [vmem:[%s2346_s7 + $0x10] sm:$0xff] }
 0x317   :  { %v545_v34 = vmul.f32 0.0625, %v533_v31  ;;  %v1750_v29 = vpack.c.bf16 %v980_v28, %v979_v27  ;;  %v804_v31 = vld [vmem:[%s2346_s7 + $0x18] sm:$0xff]  ;;  %v1417_v28 = vld [vmem:[%s2353_s14] ss:$0 sm:$0xff]  ;;  %s2374_s7 = sld [smem:[#allocation7_spill]] }
 0x318   :  { %v547_v35 = vsub.f32 %v514_v61, %v544_v32  ;;  %v550_v36 = vsub.f32 %v517_v3, %v544_v32  ;;  %v546_v37 = vmul.f32 0.0625, %v543_v33  ;;  %1735 = vmatprep.subr.bf16.mxu0 %v1734_v26  ;;  %v1738_v32 = vpack.c.bf16 %v804_v31, %v803_v30  ;;  %v981_v33 = vld [vmem:[%s2348_s9 + $0x10] sm:$0xff]  ;;  %v1426_v30 = vld [vmem:[%s2356_s17] ss:$0 sm:$0xff] }
 0x319   :  { %v551_v38 = vsub.f32 %v518_v9, %v545_v34  ;;  %v548_v39 = vsub.f32 %v515_v63, %v545_v34  ;;  %1751 = vmatprep.subr.bf16.mxu1 %v1750_v29  ;;  %v982_v34 = vld [vmem:[%s2348_s9 + $0x18] sm:$0xff] }
 0x31a   :  { %v553_v40 = vmul.f32 %v547_v35, %v547_v35  ;;  %v556_v41 = vmul.f32 %v550_v36, %v550_v36  ;;  %v549_v42 = vsub.f32 %v516_v8, %v546_v37  ;;  %v552_v43 = vsub.f32 %v519_v2, %v546_v37  ;;  %v894_v37 = vld [vmem:[%s2347_s8 + $0x8] sm:$0xff] }
 0x31b   :  { %v557_v44 = vmul.f32 %v551_v38, %v551_v38  ;;  %v554_v45 = vmul.f32 %v548_v39, %v548_v39 }
 0x31c   :  { %v559_v46 = vadd.f32 %v556_v41, %v553_v40  ;;  %v555_v47 = vmul.f32 %v549_v42, %v549_v42  ;;  %v558_v48 = vmul.f32 %v552_v43, %v552_v43  ;;  %v1244_v40 = vld [vmem:[%s2351_s12 + $0x8] sm:$0xff] }
 0x31d   :  { %v566_v49 = vadd.f32 %v557_v44, %v554_v45 }
 0x31e   :  { %v560_v50 = vrot.slane %v559_v46, 4  ;;  %v573_v51 = vsel %vm534_vm5, %v555_v47, 0.0  ;;  %v574_v52 = vsel %vm534_vm5, %v558_v48, 0.0 }
 0x31f   :  { %v575_v53 = vadd.f32 %v574_v52, %v573_v51  ;;  %v567_v54 = vrot.slane %v566_v49, 4 }
 0x320   :  { %v561_v55 = vadd.f32 %v560_v50, %v559_v46 }
 0x321   :  { %v576_v56 = vrot.slane %v575_v53, 4  ;;  %v568_v57 = vadd.f32 %v567_v54, %v566_v49 }
 0x322   :  { %v562_v58 = vrot.slane %v561_v55, 2 }
 0x323   :  { %v577_v59 = vadd.f32 %v576_v56, %v575_v53  ;;  %v569_v60 = vrot.slane %v568_v57, 2  ;;  %v895_v56 = vld [vmem:[%s2347_s8 + $0x10] sm:$0xff] }
 0x324   :  { %v563_v61 = vadd.f32 %v562_v58, %v561_v55 }
 0x325   :  { %v578_v62 = vrot.slane %v577_v59, 2  ;;  %v570_v63 = vadd.f32 %v569_v60, %v568_v57  ;;  %v896_v57 = vld [vmem:[%s2347_s8 + $0x18] sm:$0xff] }
 0x326   :  { %v564_v0 = vrot.slane %v563_v61, 1 }
 0x327   :  { %v579_v1 = vadd.f32 %v578_v62, %v577_v59  ;;  %v571_v2 = vrot.slane %v570_v63, 1  ;;  %v1246_v59 = vld [vmem:[%s2351_s12 + $0x18] sm:$0xff]  ;;  %v1065_v62 = vld [vmem:[%s2349_s10] sm:$0xff] }
 0x328   :  { %v565_v3 = vadd.f32 %v564_v0, %v563_v61  ;;  %v1746_v61 = vpack.c.bf16 %v896_v57, %v895_v56 }
 0x329   :  { %v580_v4 = vrot.slane %v579_v1, 1  ;;  %v572_v6 = vadd.f32 %v571_v2, %v570_v63  ;;  %v1067_v2 = vld [vmem:[%s2349_s10 + $0x10] sm:$0xff] }
 0x32a   :  { %v582_v8 = vmul.f32 0.0625, %v565_v3  ;;  %v1068_v3 = vld [vmem:[%s2349_s10 + $0x18] sm:$0xff] }
 0x32b   :  { %v581_v9 = vadd.f32 %v580_v4, %v579_v1  ;;  %v583_v10 = vmul.f32 0.0625, %v572_v6  ;;  %v2253_v1 = vld [vmem:[%s2373_s6] sm:$0xff]  ;;  %v1762_v4 = vpack.c.bf16 %v1068_v3, %v1067_v2  ;;  %v1374_v3 = vld [vmem:[%s2374_s7 + $0x8] sm:$0xff] }
 0x32c   :  { %v585_v11 = vadd.f32 1e-05, %v582_v8  ;;  %v1157_v6 = vld [vmem:[%s2350_s11] sm:$0xff]  ;;  %v1158_v8 = vld [vmem:[%s2350_s11 + $0x8] sm:$0xff] }
 0x32d   :  { %v584_v12 = vmul.f32 0.0625, %v581_v9  ;;  %v586_v13 = vadd.f32 1e-05, %v583_v10  ;;  %v2275_v9 = vld [vmem:[%s2373_s6 + $0x8] sm:$0xff]  ;;  %v1766_v10 = vpack.c.bf16 %v1158_v8, %v1157_v6  ;;  %v1373_v6 = vld [vmem:[%s2374_s7] sm:$0xff] }
 0x32e   :  { %1807 = vrsqrt.f32 %v585_v11  ;;  %v1159_v11 = vld [vmem:[%s2350_s11 + $0x10] sm:$0xff] }
 0x32f   :  { %v587_v14 = vadd.f32 1e-05, %v584_v12  ;;  %1809 = vrsqrt.f32 %v586_v13  ;;  %v1160_v12 = vld [vmem:[%s2350_s11 + $0x18] sm:$0xff] }
 0x330   :  { %v1770_v13 = vpack.c.bf16 %v1160_v12, %v1159_v11 }
 0x331   :  { %1811 = vrsqrt.f32 %v587_v14 }
 0x338   :  { %v1808_v15 = vpop.eup %1807 }
 0x339   :  { %v1810_v16 = vpop.eup %1809  ;;  %v591_v17 = vmul.f32 %v1808_v15, %v547_v35  ;;  %v594_v18 = vmul.f32 %v1808_v15, %v550_v36  ;;  %v1754_v35 = vpack.c.bf16 %v982_v34, %v981_v33  ;;  %v893_v36 = vld [vmem:[%s2347_s8] sm:$0xff] }
 0x33a   :  { %v592_v19 = vmul.f32 %v1810_v16, %v548_v39  ;;  %v595_v20 = vmul.f32 %v1810_v16, %v551_v38  ;;  %v1742_v38 = vpack.c.bf16 %v894_v37, %v893_v36  ;;  %v1243_v39 = vld [vmem:[%s2351_s12] sm:$0xff] }
 0x33b   :  { %v1812_v21 = vpop.eup %1811  ;;  %v1774_v41 = vpack.c.bf16 %v1244_v40, %v1243_v39 }
 0x33c   :  { %v593_v22 = vmul.f32 %v1812_v21, %v549_v42  ;;  %v596_v23 = vmul.f32 %v1812_v21, %v552_v43  ;;  %707 = vmatprep.mubr.f32.mxu1 %v592_v19 }
 0x33d   :  { %708 = vmatmul.mubr.f32.vlgmr.msra.gmra.mrb[8].mxu1 %v591_v17 }
 0x33e   :  { %1581 = vmatprep.mubr.msk.f32.mxu0 %vm534_vm5, %v593_v22  ;;  %712 = vmatprep.mubr.f32.mxu1 %v595_v20  ;;  %v1423_v20 = vld [vmem:[%s2355_s16] ss:$0 sm:$0xff] }
 0x33f   :  { %1582 = vmatmul.mubr.msk.f32.vlgmr.msra.gmra.mrb[6].mxu0 %vm534_vm5, %v596_v23  ;;  %1753 = vmatpush3.bf16.msra.mxu1 %v1750_v29 }
 0x340   :  { %1737 = vmatpush3.bf16.msra.mxu0 %v1734_v26  ;;  %1755 = vmatprep.subr.bf16.mxu1 %v1754_v35 }
 0x341   :  { %713 = vmatmul.mubr.f32.gmra.mrb[10].mxu1 %v594_v18  ;;  %1739 = vmatprep.subr.bf16.mxu0 %v1738_v32  ;;  %v1414_v18 = vld [vmem:[%s2352_s13] ss:$0 sm:$0xff] }
 0x343   :  { %1757 = vmatpush3.bf16.msra.mxu1 %v1754_v35 }
 0x344   :  { %1741 = vmatpush3.bf16.msra.mxu0 %v1738_v32  ;;  %1775 = vmatprep.subr.bf16.mxu1 %v1774_v41 }
 0x345   :  { %1743 = vmatprep.subr.bf16.mxu0 %v1742_v38 }
 0x410   :  { %v1484_v42 = vpop.f32.mrb[8].mxu1 }
 0x411   :  { %v1485_v43 = vpop.f32.mrb[9].mxu1 }
 0x412   :  { %v1486_v44 = vadd.f32 %v1485_v43, %v1484_v42  ;;  %v1583_v45 = vpop.f32.mrb[6].mxu0  ;;  %v1429_v42 = vld [vmem:[%s2357_s18] ss:$0 sm:$0xff] }
 0x413   :  { %v784_v46 = vpop.f32.mrb[7].mxu0 }
 0x414   :  { %v785_v47 = vadd.f32 %v1486_v44, %v784_v46  ;;  %v1487_v48 = vpop.f32.mrb[10].mxu1 }
 0x415   :  { %v1488_v49 = vpop.f32.mrb[11].mxu1 }
 0x416   :  { %v793_v50 = vmul.f32 0.01, %v785_v47  ;;  %v1489_v51 = vadd.f32 %v1488_v49, %v1487_v48  ;;  %v1420_v47 = vld [vmem:[%s2354_s15] ss:$0 sm:$0xff]  ;;  %s1859_s15 = smov [#allocation2]  }
 0x417   :  { %s1386_s18 = sshll.u32 %s1859_s15, 4  ;;  %s1387_s18 = int_to_ptr.vmem [resolvable:$true] %s1386_s18 }
 0x418   :  { %v795_v52 = vadd.f32 %v793_v50, %v1982_v5  ;;  %v790_v53 = vadd.f32 %v1583_v45, %v1489_v51  ;;  %v1245_v5 = vld [vmem:[%s2351_s12 + $0x10] sm:$0xff]  ;;  %s1833_s28 = scalar_lea.vmem %s1387_s18, 256  ;;  %p1838_p1 = scmp.lt.s32.totalorder %s1387_s18, %s1387_s18 }
 0x419   :  { %v1778_v63 = vpack.c.bf16 %v1246_v59, %v1245_v5  ;;  %p1834_p0 = scmp.ne.s32.totalorder %s1387_s18, %s1833_s28  ;;  %p1839_p2 = scmp.lt.s32.totalorder %s1833_s28, %s1833_s28 }
 0x41a   :  { %v797_v54 = vmax.f32 %v795_v52, 0.0  ;;  %v794_v55 = vmul.f32 0.01, %v790_v53 }
 0x41b   :  { %p1840_p3 = por %p1839_p2, %p1838_p1 }
 0x41c   :  { %v796_v58 = vadd.f32 %v794_v55, %v1989_v7  ;;  %1592 = vmatprep.mubr.msk.f32.mxu0 %vm71_vm0, %v797_v54  ;;  %1614 = vmatprep.mubr.msk.f32.mxu1 %vm71_vm0, %v797_v54  ;;  %v1066_v7 = vld [vmem:[%s2349_s10 + $0x8] sm:$0xff] }
 0x41d   :  { %v1758_v0 = vpack.c.bf16 %v1066_v7, %v1065_v62  ;;  %p1841_p4 = pnand %p1840_p3, %p1834_p0 }
 0x41e   :  { %v798_v60 = vmax.f32 %v796_v58, 0.0 }
 0x420   :  { %1593 = vmatmul.mubr.msk.f32.vlgmr.msra.gmra.mrb[8].mxu0 %vm71_vm0, %v798_v60  ;;  %1615 = vmatmul.mubr.msk.f32.vlgmr.msra.gmra.mrb[12].mxu1 %vm71_vm0, %v798_v60 }
 0x421   :  { %1745 = vmatpush3.bf16.msra.mxu0 %v1742_v38  ;;  %1603 = vmatprep.mubr.msk.f32.mxu0 %vm71_vm0, %v797_v54 }
 0x422   :  { %1747 = vmatprep.subr.bf16.mxu0 %v1746_v61  ;;  %1777 = vmatpush3.bf16.msra.mxu1 %v1774_v41 }
 0x423   :  { %1779 = vmatprep.subr.bf16.mxu1 %v1778_v63  ;;  %1647 = vmatprep.mubr.msk.f32.mxu1 %vm71_vm0, %v2253_v1 }
 0x425   :  { %1749 = vmatpush3.bf16.msra.mxu0 %v1746_v61 }
 0x426   :  { %1759 = vmatprep.subr.bf16.mxu0 %v1758_v0  ;;  %1781 = vmatpush3.bf16.msra.mxu1 %v1778_v63 }
 0x428   :  { %1604 = vmatmul.mubr.msk.f32.vlgmr.msra.gmra.mrb[10].mxu0 %vm71_vm0, %v798_v60 }
 0x429   :  { %1761 = vmatpush3.bf16.msra.mxu0 %v1758_v0  ;;  %1625 = vmatprep.mubr.msk.f32.mxu0 %vm71_vm0, %v2253_v1 }
 0x42a   :  { %1763 = vmatprep.subr.bf16.mxu0 %v1762_v4  ;;  %1648 = vmatmul.mubr.msk.f32.vlgmr.msra.gmra.mrb[14].mxu1 %vm71_vm0, %v2275_v9 }
 0x42d   :  { %1765 = vmatpush3.bf16.msra.mxu0 %v1762_v4 }
 0x42e   :  { %1767 = vmatprep.subr.bf16.mxu0 %v1766_v10 }
 0x430   :  { %1626 = vmatmul.mubr.msk.f32.vlgmr.msra.gmra.mrb[8].mxu0 %vm71_vm0, %v2275_v9 }
 0x431   :  { %1769 = vmatpush3.bf16.msra.mxu0 %v1766_v10  ;;  %1636 = vmatprep.mubr.msk.f32.mxu0 %vm71_vm0, %v2253_v1 }
 0x432   :  { %1771 = vmatprep.subr.bf16.mxu0 %v1770_v13 }
 0x435   :  { %1773 = vmatpush3.bf16.msra.mxu0 %v1770_v13 }
 0x438   :  { %1637 = vmatmul.mubr.msk.f32.vlgmr.msra.gmra.mrb[10].mxu0 %vm71_vm0, %v2275_v9 }
 0x4f3   :  { %v1616_v14 = vpop.f32.mrb[12].mxu1 }
 0x4f4   :  { %v1056_v15 = vpop.f32.mrb[13].mxu1  ;;  %v1062_v52 = vadd.f32 %v1616_v14, %v1420_v47 }
 0x4f5   :  { %v1057_v54 = vadd.f32 %v1420_v47, %v1056_v15 }
 0x4fd   :  { %v1649_v16 = vpop.f32.mrb[14].mxu1 }
 0x4fe   :  { %v1320_v17 = vpop.f32.mrb[15].mxu1  ;;  %v1326_v46 = vadd.f32 %v1649_v16, %v1429_v42 }
 0x4ff   :  { %v1321_v49 = vadd.f32 %v1429_v42, %v1320_v17 }
 0x503   :  { %v1627_v19 = vpop.f32.mrb[8].mxu0 }
 0x504   :  { %v1782_v21 = vadd.f32 %v1627_v19, %v1414_v18  ;;  %v1148_v22 = vpop.f32.mrb[9].mxu0 }
 0x505   :  { %v1784_v23 = vadd.f32 %v1414_v18, %v1148_v22 }
 0x506   :  { %v1783_v24 = vadd.f32 %v1782_v21, %v1423_v20 }
 0x507   :  { %v1785_v25 = vadd.f32 %v1784_v23, %v1423_v20 }
 0x508   :  { %v1433_v26 = vmul.f32 -1.442695, %v1783_v24 }
 0x509   :  { %v1432_v27 = vmul.f32 -1.442695, %v1785_v25 }
 0x50a   :  { %1813 = vpow2.f32 %v1433_v26 }
 0x50b   :  { %1815 = vpow2.f32 %v1432_v27  ;;  %v1638_v29 = vpop.f32.mrb[10].mxu0 }
 0x50c   :  { %v1786_v31 = vadd.f32 %v1638_v29, %v1417_v28  ;;  %v1234_v32 = vpop.f32.mrb[11].mxu0 }
 0x50d   :  { %v1788_v33 = vadd.f32 %v1417_v28, %v1234_v32 }
 0x50e   :  { %v1787_v34 = vadd.f32 %v1786_v31, %v1426_v30 }
 0x50f   :  { %v1789_v35 = vadd.f32 %v1788_v33, %v1426_v30 }
 0x510   :  { %v1435_v36 = vmul.f32 -1.442695, %v1787_v34 }
 0x511   :  { %v1434_v37 = vmul.f32 -1.442695, %v1789_v35 }
 0x512   :  { %1817 = vpow2.f32 %v1435_v36 }
 0x513   :  { %1819 = vpow2.f32 %v1434_v37 }
 0x514   :  { %v1814_v38 = vpop.eup %1813 }
 0x515   :  { %v1816_v39 = vpop.eup %1815  ;;  %v1338_v40 = vadd.f32 1.0, %v1814_v38 }
 0x516   :  { %v1337_v41 = vadd.f32 1.0, %v1816_v39 }
 0x517   :  { %1821 = vrcp.f32 %v1338_v40 }
 0x518   :  { %1823 = vrcp.f32 %v1337_v41 }
 0x51c   :  { %v1818_v43 = vpop.eup %1817 }
 0x51d   :  { %v1820_v44 = vpop.eup %1819  ;;  %v1352_v45 = vadd.f32 1.0, %v1818_v43 }
 0x51e   :  { %v1351_v48 = vadd.f32 1.0, %v1820_v44 }
 0x51f   :  { %1825 = vrcp.f32 %v1352_v45 }
 0x520   :  { %1827 = vrcp.f32 %v1351_v48 }
 0x521   :  { %v1822_v50 = vpop.eup %1821 }
 0x522   :  { %v1824_v51 = vpop.eup %1823  ;;  %v1358_v53 = vmul.f32 %v1822_v50, %v1326_v46 }
 0x523   :  { %v1357_v55 = vmul.f32 %v1824_v51, %v1321_v49 }
 0x524   :  { %v1360_v56 = vadd.f32 %v1358_v53, %v1062_v52 }
 0x525   :  { %v1359_v57 = vadd.f32 %v1357_v55, %v1057_v54 }
 0x526   :  { %1829 = vtanh.f32 %v1360_v56 }
 0x527   :  { %1831 = vtanh.f32 %v1359_v57 }
 0x529   :  { %v1826_v58 = vpop.eup %1825 }
 0x52a   :  { %v1828_v5 = vpop.eup %1827  ;;  %v1364_v59 = vsub.f32 1.0, %v1826_v58  ;;  %v1368_v63 = vmul.f32 %v1826_v58, %v2275_v9 }
 0x52b   :  { %v1363_v61 = vsub.f32 1.0, %v1828_v5  ;;  %v1367_v2 = vmul.f32 %v1828_v5, %v2253_v1 }
 0x530   :  { %v1830_v60 = vpop.eup %1829 }
 0x531   :  { %v1832_v62 = vpop.eup %1831  ;;  %v1366_v7 = vmul.f32 %v1830_v60, %v1364_v59 }
 0x532   :  { %v1365_v0 = vmul.f32 %v1832_v62, %v1363_v61 }
 0x533   :  { %v1370_v4 = vadd.f32 %v1368_v63, %v1366_v7 }
 0x534   :  { %v1369_v8 = vadd.f32 %v1367_v2, %v1365_v0 }
 0x535   :  { %1372 = vst.msk [vmem:[#allocation2 + $0x8] sm:$0xff] %vm71_vm0, %v1370_v4  ;;  %v1376_v10 = vadd.f32 %v1374_v3, %v1370_v4 }
 0x536   :  { %1371 = vst.msk [vmem:[#allocation2] sm:$0xff] %vm71_vm0, %v1369_v8  ;;  %v1375_v9 = vadd.f32 %v1373_v6, %v1369_v8 }
 0x537   :  { %1378 = vst.msk [vmem:[%s2358_s19 + $0x8] sm:$0xff] %vm71_vm0, %v1376_v10 }
 0x538   :  { %1844 = shalt.err (!%p1841_p4)
}
 0x539   :  { %s1845_s29 = scalar_lea.hbm %s2359_s20, 256 }
 0x53a   :  { %p1846_p5 = scmp.ne.s32.totalorder %s2359_s20, %s1845_s29  ;;  %p1849_p6 = scmp.lt.u32.totalorder %s1845_s29, %s2359_s20 }
 0x53c   :  { %p1851_p7 = pnand %p1849_p6, %p1846_p5 }
 0x53e   :  { %1854 = shalt.err (!%p1851_p7)
}
 0x53f   :  { %s1860_s11 = smov 128   ;;  %s1861_s23 = smov 8   ;;  %1377 = vst.msk [vmem:[%s2358_s19] sm:$0xff] %vm71_vm0, %v1375_v9 }
 0x540   :  { %1392 = dma.vmem_to_hbm [thread:$0]  %s1387_s18, 256, %s2359_s20, [#allocation3], %s1860_s11, %s1860_s11, %s1861_s23  }
 0x541   :  { %1855 = dma.done.wait [#allocation3], 256  }
 0x542   :  { %1856 = vsyncadd [#allocation3], 4294967040 }
 0x543   :  { %1398 = vsyncpa [#allocation3], 1 }

// kernel: mpnn_bayes_forward.9
= control target key start
LH: loop header
LB: loop body
LE: loop exit
PB: predicated region body
PF: predicated region fallthrough
CT: control target
= control target key end

     0   :  { %v2378_v0 = vmov 0   ;;  %vm62_vm0 = vcmask 261120   ;;  %vm297_vm1 = vcmask 1043456   ;;  %vm290_vm2 = vcmask 64512   ;;  %s2998_s0 = inlined_call_operand.vmem [shape: s32[32,1], index: 0, kind: input, shape index: {}]   ;;  %s2999_s11 = inlined_call_operand.vmem [shape: f32[32,32], index: 11, kind: input, shape index: {}]   ;;  %s3000_s4 = inlined_call_operand.vmem [shape: f32[16,32], index: 4, kind: input, shape index: {}]   ;;  %s3001_s3 = inlined_call_operand.vmem [shape: f32[32,8], index: 3, kind: input, shape index: {}]   ;;  %s3002_s5 = inlined_call_operand.vmem [shape: bf16[8,32], index: 5, kind: input, shape index: {}]   ;;  %s3003_s7 = inlined_call_operand.vmem [shape: bf16[32,1024], index: 7, kind: input, shape index: {}]   ;;  %s3004_s12 = inlined_call_operand.vmem [shape: f32[1,32], index: 12, kind: input, shape index: {}]   ;;  %s3005_s6 = inlined_call_operand.vmem [shape: f32[1,32], index: 6, kind: input, shape index: {}]   ;;  %s3006_s13 = inlined_call_operand.vmem [shape: f32[16,32], index: 13, kind: output, shape index: {}]   ;;  %s3007_s8 = inlined_call_operand.vmem [shape: bf16[32,1024], index: 8, kind: input, shape index: {}]   ;;  %s3008_s10 = inlined_call_operand.vmem [shape: f32[32,32], index: 10, kind: input, shape index: {}]   ;;  %s3009_s9 = inlined_call_operand.vmem [shape: bf16[1024,32], index: 9, kind: input, shape index: {}]   ;;  %s3010_s1 = inlined_call_operand.vmem [shape: s32[1,32], index: 1, kind: input, shape index: {}]   ;;  %s3011_s2 = inlined_call_operand.vmem [shape: f32[1,32], index: 2, kind: input, shape index: {}]  }
   0x1   :  { %2312 = vset.pattern.permute.xlu0 %v2378_v0  ;;  %v148_v1 = vld [vmem:[%s2998_s0] sm:$0xff]  ;;  %v149_v2 = vld [vmem:[%s2998_s0 + $0x8] sm:$0xff]  ;;  %2313 = vset.pattern.permute.xlu1 %v2378_v0  ;;  %v150_v3 = vld [vmem:[%s2998_s0 + $0x10] sm:$0xff]  ;;  %v146_v40 = vlaneseq  ;;  %vm178_vm3 = vcmask 130048   ;;  %v2379_v44 = vmov 0.0  }
   0x2   :  { %153 = vperm.xlu0 %2312, %v148_v1   ;;  %159 = vperm.xlu1 %2313, %v150_v3   ;;  %v151_v4 = vld [vmem:[%s2998_s0 + $0x18] sm:$0xff]  ;;  %v51_v5 = vld [vmem:[%s2999_s11] sm:$0xff]  ;;  %v52_v6 = vld [vmem:[%s2999_s11 + $0x8] sm:$0xff] }
   0x3   :  { %v2281_v7 = vpack.c.bf16 %v52_v6, %v51_v5  ;;  %v53_v8 = vld [vmem:[%s2999_s11 + $0x10] sm:$0xff]  ;;  %v54_v9 = vld [vmem:[%s2999_s11 + $0x18] sm:$0xff]  ;;  %v49_v10 = vld [vmem:[%s3000_s4] sm:$0xff]  ;;  %v147_v41 = vand.u32 127, %v146_v40 }
   0x4   :  { %v2285_v11 = vpack.c.bf16 %v54_v9, %v53_v8  ;;  %2237 = vmatprep.mubr.msk.f32.mxu0 %vm62_vm0, %v49_v10  ;;  %v50_v12 = vld [vmem:[%s3000_s4 + $0x8] sm:$0xff]  ;;  %v276_v14 = vld [vmem:[%s3001_s3] sm:$0xff]  ;;  %v278_v18 = vld [vmem:[%s3001_s3 + $0x10] sm:$0xff] }
   0x5   :  { %2282 = vmatprep.subr.bf16.mxu0 %v2281_v7  ;;  %v2289_v13 = vpack.c.bf16 %v50_v12, %v49_v10  ;;  %v277_v15 = vld [vmem:[%s3001_s3 + $0x8] sm:$0xff]  ;;  %v282_v16 = vld [vmem:[%s3002_s5] sm:$0xf]  ;;  %v279_v19 = vld [vmem:[%s3001_s3 + $0x18] sm:$0xff] }
   0x6   :  { %156 = vperm.xlu0 %2312, %v149_v2   ;;  %162 = vperm.xlu1 %2313, %v151_v4   ;;  %v280_v17 = vpack.c.bf16 %v277_v15, %v276_v14  ;;  %v299_v20 = vsel %vm297_vm1, %v282_v16, 0  ;;  %v281_v21 = vpack.c.bf16 %v279_v19, %v278_v18  ;;  %v356_v22 = vld [vmem:[%s3003_s7] sm:$0xff]  ;;  %v357_v24 = vld [vmem:[%s3003_s7 + $0x8] sm:$0xff]  ;;  %v2521_v33 = vld [vmem:[%s3003_s7 + $0x10] sm:$0xff] }
   0x7   :  { %2284 = vmatpush3.bf16.msra.mxu0 %v2281_v7  ;;  %2290 = vmatprep.subr.bf16.mxu1 %v2289_v13  ;;  %v360_v23 = vld [vmem:[%s3003_s7 + $0x20] sm:$0xff]  ;;  %v361_v26 = vld [vmem:[%s3003_s7 + $0x28] sm:$0xff]  ;;  %v2526_v34 = vld [vmem:[%s3003_s7 + $0x30] sm:$0xff] }
   0x8   :  { %2286 = vmatprep.subr.bf16.mxu0 %v2285_v11  ;;  %2292 = vmatpush3.bf16.msra.mxu1 %v2289_v13  ;;  %v1969_v25 = vcombine.high %v356_v22, %v360_v23  ;;  %v1970_v27 = vcombine.low %v357_v24, %v361_v26  ;;  %v1971_v28 = vcombine.high %v357_v24, %v361_v26  ;;  %v365_v29 = vld [vmem:[%s3003_s7 + $0x48] sm:$0xff]  ;;  %v2531_v35 = vld [vmem:[%s3003_s7 + $0x18] sm:$0xff]  ;;  %v364_v46 = vld [vmem:[%s3003_s7 + $0x40] sm:$0xff] }
   0x9   :  { %v369_v30 = vld [vmem:[%s3003_s7 + $0x68] sm:$0xff]  ;;  %v1972_v36 = vcombine.low %v2521_v33, %v2526_v34  ;;  %v2538_v37 = vld [vmem:[%s3003_s7 + $0x38] sm:$0xff]  ;;  %v368_v47 = vld [vmem:[%s3003_s7 + $0x60] sm:$0xff]  ;;  %v1968_v50 = vcombine.low %v356_v22, %v360_v23  ;;  %v1973_v56 = vcombine.high %v2521_v33, %v2526_v34 }
   0xa   :  { %459 = vmatprep.subr.bf16.mxu1 %v1969_v25  ;;  %v1979_v31 = vcombine.high %v365_v29, %v369_v30  ;;  %v1978_v32 = vcombine.low %v365_v29, %v369_v30  ;;  %v1974_v38 = vcombine.low %v2531_v35, %v2538_v37  ;;  %v1975_v39 = vcombine.high %v2531_v35, %v2538_v37  ;;  %v1954_v57 = vld [vmem:[%s3004_s12] ss:$0 sm:$0xff]  ;;  %v2571_v63 = vld [vmem:[%s3007_s8 + $0x10] sm:$0xff]  ;;  %v2581_v2 = vld [vmem:[%s3007_s8 + $0x18] sm:$0xff] }
   0xb   :  { %2288 = vmatpush3.bf16.msra.mxu0 %v2285_v11  ;;  %v1977_v52 = vcombine.high %v364_v46, %v368_v47  ;;  %v1976_v55 = vcombine.low %v364_v46, %v368_v47  ;;  %v1965_v62 = vld [vmem:[%s3005_s6] ss:$0 sm:$0xff]  ;;  %v2576_v1 = vld [vmem:[%s3007_s8 + $0x30] sm:$0xff]  ;;  %v2590_v4 = vld [vmem:[%s3007_s8 + $0x38] sm:$0xff] }
   0xc   :  { %2309 = vmatprep.subr.msk.bf16.mxu0 %vm297_vm1, %v282_v16  ;;  %v1996_v7 = vcombine.low %v2571_v63, %v2576_v1  ;;  %v1998_v8 = vcombine.low %v2581_v2, %v2590_v4  ;;  %v370_v19 = vld [vmem:[%s3003_s7 + $0x70] sm:$0xff]  ;;  %v673_v26 = vld [vmem:[%s3007_s8] sm:$0xff]  ;;  %v678_v29 = vld [vmem:[%s3007_s8 + $0x28] sm:$0xff]  ;;  %v1999_v46 = vcombine.high %v2581_v2, %v2590_v4 }
   0xd   :  { %v681_v33 = vld [vmem:[%s3007_s8 + $0x40] sm:$0xff]  ;;  %v682_v35 = vld [vmem:[%s3007_s8 + $0x48] sm:$0xff]  ;;  %v683_v47 = vld [vmem:[%s3007_s8 + $0x50] sm:$0xff] }
   0xe   :  { %2238 = vmatmul.mubr.msk.f32.vlgmr.msra.gmra.mrb[0].mxu0 %vm62_vm0, %v50_v12  ;;  %v685_v34 = vld [vmem:[%s3007_s8 + $0x60] sm:$0xff] }
   0xf   :  { %2251 = vmatpush3.bf16.msra.mxu0 %v299_v20  ;;  %2252 = vmatprep.mubr.msk.bf16.mxu0 %vm290_vm2, %v280_v17  ;;  %v366_v17 = vld [vmem:[%s3003_s7 + $0x50] sm:$0xff]  ;;  %v367_v20 = vld [vmem:[%s3003_s7 + $0x58] sm:$0xff]  ;;  %v2316_v2 = vld [vmem:[%s3009_s9] sm:$0xff]  }
  0x10   :  { %512 = vmatprep.subr.bf16.mxu0 %v1971_v28  ;;  %v1981_v24 = vcombine.high %v366_v17, %v370_v19  ;;  %v674_v28 = vld [vmem:[%s3007_s8 + $0x8] sm:$0xff]  ;;  %v1980_v30 = vcombine.low %v366_v17, %v370_v19 }
  0x11   :  { %v2321_v17 = vld [vmem:[%s3009_s9 + $0x88] sm:$0xff]  }
  0x12   :  { %2253 = vmatmul.mubr.msk.bf16.vlgmr.msra.gmra.mrb[4].mxu0 %vm290_vm2, %v281_v21  ;;  %v371_v21 = vld [vmem:[%s3003_s7 + $0x78] sm:$0xff]  ;;  %v2336_v19 = vld [vmem:[%s3009_s9 + $0x28] sm:$0xff]  }
  0x13   :  { %544 = vmatprep.mubr.bf16.mxu0 %v2378_v0  ;;  %513 = vmatpush1.bf16.msra.mxu0 %v1970_v27  ;;  %v1983_v25 = vcombine.high %v367_v20, %v371_v21  ;;  %v677_v27 = vld [vmem:[%s3007_s8 + $0x20] sm:$0xff] }
  0x14   :  { %514 = vmatprep.subr.bf16.mxu0 %v1979_v31  ;;  %v1982_v31 = vcombine.low %v367_v20, %v371_v21  ;;  %v1992_v37 = vcombine.low %v673_v26, %v677_v27  ;;  %v2325_v20 = vld [vmem:[%s3009_s9 + $0x90] sm:$0xff]   ;;  %v2327_v21 = vld [vmem:[%s3009_s9 + $0xd8] sm:$0xff]  }
  0x17   :  { %515 = vmatpush1.bf16.msra.mxu0 %v1978_v32  ;;  %v1993_v32 = vcombine.high %v673_v26, %v677_v27  ;;  %v2337_v26 = vld [vmem:[%s3009_s9 + $0xa8] sm:$0xff]   ;;  %v2338_v27 = vld [vmem:[%s3009_s9 + $0x70] sm:$0xff]  }
  0x18   :  { %618 = vmatprep.subr.bf16.mxu0 %v1975_v39  ;;  %v1995_v39 = vcombine.high %v674_v28, %v678_v29 }
  0x81   :  { %v154_v42 = vpop.permute.xlu0 %153  ;;  %v160_v43 = vpop.permute.xlu1 %159 }
  0x82   :  { %vm164_vm4 = vcmp.eq.s32.totalorder %v147_v41, %v154_v42  ;;  %vm166_vm5 = vcmp.eq.s32.totalorder %v147_v41, %v160_v43  ;;  %v2000_v43 = vcombine.low %v681_v33, %v685_v34 }
  0x83   :  { %v1957_v45 = vsel %vm164_vm4, 1.0, %v2379_v44  ;;  %v1959_v51 = vsel %vm166_vm5, 1.0, %v2379_v44 }
  0x84   :  { %2244 = vmatprep.mubr.msk.f32.mxu1 %vm178_vm3, %v1957_v45  ;;  %v1997_v45 = vcombine.high %v2571_v63, %v2576_v1  ;;  %v1165_v63 = vld [vmem:[%s3008_s10 + $0x10] sm:$0xff]  ;;  %v1166_v1 = vld [vmem:[%s3008_s10 + $0x18] sm:$0xff] }
  0x85   :  { %v157_v48 = vpop.permute.xlu0 %156  ;;  %v163_v49 = vpop.permute.xlu1 %162  ;;  %v2297_v4 = vpack.c.bf16 %v1166_v1, %v1165_v63 }
  0x86   :  { %vm165_vm6 = vcmp.eq.s32.totalorder %v147_v41, %v157_v48  ;;  %vm167_vm7 = vcmp.eq.s32.totalorder %v147_v41, %v163_v49  ;;  %v2001_v41 = vcombine.high %v681_v33, %v685_v34  ;;  %v687_v49 = vld [vmem:[%s3007_s8 + $0x70] sm:$0xff]  ;;  %v2345_v33 = vld [vmem:[%s3009_s9 + $0xb8] sm:$0xff]   ;;  %v2346_v34 = vld [vmem:[%s3009_s9 + $0x140] sm:$0xff]  }
  0x87   :  { %v1958_v53 = vsel %vm165_vm6, 1.0, %v2379_v44  ;;  %v1960_v54 = vsel %vm167_vm7, 1.0, %v2379_v44 }
  0x88   :  { %2245 = vmatmul.mubr.msk.f32.vlgmr.msra.gmra.mrb[0].mxu1 %vm178_vm3, %v1958_v53 }
  0x89   :  { %2247 = vmatprep.mubr.msk.f32.mxu1 %vm178_vm3, %v1959_v51  ;;  %460 = vmatpush1.bf16.msra.mxu1 %v1968_v50  ;;  %v684_v50 = vld [vmem:[%s3007_s8 + $0x58] sm:$0xff] }
  0x8a   :  { %461 = vmatprep.subr.bf16.mxu1 %v1977_v52  ;;  %v688_v51 = vld [vmem:[%s3007_s8 + $0x78] sm:$0xff] }
  0x8c   :  { %2248 = vmatmul.mubr.msk.f32.gmra.mrb[2].mxu1 %vm178_vm3, %v1960_v54  ;;  %v2005_v54 = vcombine.high %v683_v47, %v687_v49 }
  0x8d   :  { %462 = vmatpush1.bf16.msra.mxu1 %v1976_v55  ;;  %491 = vmatprep.mubr.bf16.mxu1 %v2378_v0  ;;  %v2007_v55 = vcombine.high %v684_v50, %v688_v51 }
  0x8e   :  { %565 = vmatprep.subr.bf16.mxu1 %v1973_v56  ;;  %v1163_v56 = vld [vmem:[%s3008_s10] sm:$0xff] }
  0xe1   :  { %v2239_v58 = vpop.f32.mrb[0].mxu0 }
  0xe2   :  { %v141_v59 = vadd.f32 %v2239_v58, %v1954_v57  ;;  %v135_v60 = vpop.f32.mrb[1].mxu0  ;;  %v1164_v58 = vld [vmem:[%s3008_s10 + $0x8] sm:$0xff] }
  0xe3   :  { %v136_v61 = vadd.f32 %v1954_v57, %v135_v60 }
  0xe4   :  { %145 = vst.msk [vmem:[%s3006_s13 + $0x8] sm:$0xff] %vm62_vm0, %v141_v59 }
  0xe5   :  { %144 = vst.msk [vmem:[%s3006_s13] sm:$0xff] %vm62_vm0, %v136_v61  ;;  %v2254_v3 = vpop.f32.mrb[4].mxu0  ;;  %v2004_v61 = vcombine.low %v683_v47, %v687_v49 }
  0xe6   :  { %v344_v5 = vadd.f32 %v2254_v3, %v1965_v62  ;;  %v335_v6 = vpop.f32.mrb[5].mxu0  ;;  %v2293_v3 = vpack.c.bf16 %v1164_v58, %v1163_v56 }
  0xe7   :  { %v336_v9 = vadd.f32 %v1965_v62, %v335_v6  ;;  %v2255_v10 = vpop.f32.mrb[6].mxu0  ;;  %v2318_v6 = vld [vmem:[%s3009_s9 + $0x48] sm:$0xff]  }
  0xe8   :  { %v352_v11 = vmax.f32 %v344_v5, 0.0  ;;  %v347_v12 = vadd.f32 %v2255_v10, %v1965_v62  ;;  %v338_v13 = vpop.f32.mrb[7].mxu0  ;;  %v2314_v5 = vld [vmem:[%s3009_s9 + $0x40] sm:$0xff]   ;;  %v2326_v10 = vld [vmem:[%s3009_s9 + $0x58] sm:$0xff]  }
  0xe9   :  { %v350_v14 = vmax.f32 %v336_v9, 0.0  ;;  %v339_v15 = vadd.f32 %v1965_v62, %v338_v13  ;;  %v2006_v62 = vcombine.low %v684_v50, %v688_v51  ;;  %v2322_v9 = vld [vmem:[%s3009_s9 + $0x50] sm:$0xff]   ;;  %v2317_v13 = vld [vmem:[%s3009_s9 + $0x80] sm:$0xff]  }
  0xea   :  { %v353_v16 = vmax.f32 %v347_v12, 0.0  ;;  %v2330_v12 = vld [vmem:[%s3009_s9 + $0x60] sm:$0xff]  }
  0xeb   :  { %v351_v18 = vmax.f32 %v339_v15, 0.0  ;;  %v2332_v15 = vld [vmem:[%s3009_s9 + $0x20] sm:$0xff]  }
  0xec   :  { %v355_v22 = vpack.c.bf16 %v353_v16, %v352_v11  ;;  %v2328_v11 = vld [vmem:[%s3009_s9 + $0x18] sm:$0xff]   ;;  %v2334_v16 = vld [vmem:[%s3009_s9 + $0x68] sm:$0xff]  }
  0xed   :  { %v354_v23 = vpack.c.bf16 %v351_v18, %v350_v14  ;;  %v2319_v14 = vld [vmem:[%s3009_s9 + $0xc8] sm:$0xff]   ;;  %v2323_v18 = vld [vmem:[%s3009_s9 + $0xd0] sm:$0xff]  }
  0xef   :  { %1984 = vmatmul.mubr.msk.bf16.vlgmr.msra.gmra.mrb[4].mxu1 %vm62_vm0, %v354_v23  ;;  %1986 = vmatmul.mubr.msk.bf16.vlgmr.msra.gmra.mrb[8].mxu0 %vm62_vm0, %v354_v23 }
  0xf0   :  { %501 = vmatprep.mubr.bf16.mxu1 %v2378_v0  ;;  %554 = vmatprep.mubr.bf16.mxu0 %v2378_v0 }
  0xf1   :  { %566 = vmatpush1.bf16.msra.mxu1 %v1972_v36  ;;  %619 = vmatpush1.bf16.msra.mxu0 %v1974_v38  ;;  %v686_v36 = vld [vmem:[%s3007_s8 + $0x68] sm:$0xff]  ;;  %v1994_v38 = vcombine.low %v674_v28, %v678_v29  ;;  %v2339_v28 = vld [vmem:[%s3009_s9 + $0xf0] sm:$0xff]  }
  0xf2   :  { %567 = vmatprep.subr.bf16.mxu1 %v1981_v24  ;;  %620 = vmatprep.subr.bf16.mxu0 %v1983_v25  ;;  %v2003_v42 = vcombine.high %v682_v35, %v686_v36  ;;  %v2002_v44 = vcombine.low %v682_v35, %v686_v36  ;;  %v2333_v24 = vld [vmem:[%s3009_s9 + $0xa0] sm:$0xff]   ;;  %v2335_v25 = vld [vmem:[%s3009_s9 + $0xe8] sm:$0xff]   ;;  %v2340_v29 = vld [vmem:[%s3009_s9 + $0x30] sm:$0xff]  }
  0xf3   :  { %v2347_v35 = vld [vmem:[%s3009_s9 + $0x1c0] sm:$0xff]  }
  0xf5   :  { %568 = vmatpush1.bf16.msra.mxu1 %v1980_v30  ;;  %621 = vmatpush1.bf16.msra.mxu0 %v1982_v31  ;;  %v2341_v30 = vld [vmem:[%s3009_s9 + $0xb0] sm:$0xff]   ;;  %v2342_v31 = vld [vmem:[%s3009_s9 + $0x78] sm:$0xff]  }
  0xf6   :  { %775 = vmatprep.subr.bf16.mxu1 %v1993_v32  ;;  %828 = vmatprep.subr.bf16.mxu0 %v1995_v39  ;;  %v2343_v32 = vld [vmem:[%s3009_s9 + $0xf8] sm:$0xff]  }
  0xf7   :  { %1985 = vmatmul.mubr.msk.bf16.gmra.mrb[8].mxu1 %vm62_vm0, %v355_v22  ;;  %1987 = vmatmul.mubr.msk.bf16.gmra.mrb[12].mxu0 %vm62_vm0, %v355_v22  ;;  %v2344_v39 = vld [vmem:[%s3009_s9 + $0x38] sm:$0xff]  }
  0xf8   :  { %597 = vmatprep.mubr.bf16.mxu1 %v2378_v0  ;;  %650 = vmatprep.mubr.bf16.mxu0 %v2378_v0 }
  0xff   :  { %1988 = vmatmul.mubr.msk.bf16.vlgmr.msra.gmra.mrb[12].mxu1 %vm62_vm0, %v354_v23  ;;  %1990 = vmatmul.mubr.msk.bf16.vlgmr.msra.gmra.mrb[16].mxu0 %vm62_vm0, %v354_v23  ;;  %v2331_v23 = vld [vmem:[%s3009_s9 + $0xe0] sm:$0xff]  }
 0x100   :  { %607 = vmatprep.mubr.bf16.mxu1 %v2378_v0  ;;  %660 = vmatprep.mubr.bf16.mxu0 %v2378_v0 }
 0x101   :  { %776 = vmatpush1.bf16.msra.mxu1 %v1992_v37  ;;  %829 = vmatpush1.bf16.msra.mxu0 %v1994_v38 }
 0x102   :  { %777 = vmatprep.subr.bf16.mxu1 %v2001_v41  ;;  %830 = vmatprep.subr.bf16.mxu0 %v2003_v42 }
 0x105   :  { %778 = vmatpush1.bf16.msra.mxu1 %v2000_v43  ;;  %831 = vmatpush1.bf16.msra.mxu0 %v2002_v44 }
 0x106   :  { %881 = vmatprep.subr.bf16.mxu1 %v1997_v45  ;;  %934 = vmatprep.subr.bf16.mxu0 %v1999_v46 }
 0x107   :  { %1989 = vmatmul.mubr.msk.bf16.gmra.mrb[16].mxu1 %vm62_vm0, %v355_v22  ;;  %1991 = vmatmul.mubr.msk.bf16.gmra.mrb[20].mxu0 %vm62_vm0, %v355_v22  ;;  %v2329_v22 = vld [vmem:[%s3009_s9 + $0x98] sm:$0xff]  }
 0x108   :  { %807 = vmatprep.mubr.bf16.mxu1 %v2378_v0  ;;  %860 = vmatprep.mubr.bf16.mxu0 %v2378_v0 }
 0x15b   :  { %v2661_v48 = vpop.f32.mrb[0].mxu1 }
 0x15c   :  { %v257_v52 = vpop.f32.mrb[1].mxu1 }
 0x15d   :  { %v671_v53 = vpack.c.bf16 %v2661_v48, %v257_v52 }
 0x15f   :  { %2008 = vmatmul.mubr.msk.bf16.vlgmr.msra.gmra.mrb[20].mxu1 %vm62_vm0, %v671_v53  ;;  %2010 = vmatmul.mubr.msk.bf16.vlgmr.msra.gmra.mrb[24].mxu0 %vm62_vm0, %v671_v53  ;;  %v2678_v57 = vpop.f32.mrb[2].mxu1 }
 0x160   :  { %v267_v59 = vpop.f32.mrb[3].mxu1  ;;  %817 = vmatprep.mubr.bf16.mxu1 %v2378_v0  ;;  %870 = vmatprep.mubr.bf16.mxu0 %v2378_v0 }
 0x161   :  { %v672_v60 = vpack.c.bf16 %v2678_v57, %v267_v59  ;;  %882 = vmatpush1.bf16.msra.mxu1 %v1996_v7  ;;  %935 = vmatpush1.bf16.msra.mxu0 %v1998_v8  ;;  %v2315_v7 = vld [vmem:[%s3009_s9 + $0xc0] sm:$0xff]   ;;  %v2320_v8 = vld [vmem:[%s3009_s9 + $0x8] sm:$0xff]  }
 0x162   :  { %883 = vmatprep.subr.bf16.mxu1 %v2005_v54  ;;  %936 = vmatprep.subr.bf16.mxu0 %v2007_v55 }
 0x165   :  { %884 = vmatpush1.bf16.msra.mxu1 %v2004_v61  ;;  %937 = vmatpush1.bf16.msra.mxu0 %v2006_v62 }
 0x166   :  { %2294 = vmatprep.subr.bf16.mxu1 %v2293_v3  ;;  %2111 = vmatprep.subr.bf16.mxu0 %v2314_v5 }
 0x167   :  { %2009 = vmatmul.mubr.msk.bf16.gmra.mrb[24].mxu1 %vm62_vm0, %v672_v60  ;;  %2011 = vmatmul.mubr.msk.bf16.gmra.mrb[28].mxu0 %vm62_vm0, %v672_v60 }
 0x168   :  { %913 = vmatprep.mubr.bf16.mxu1 %v2378_v0  ;;  %966 = vmatprep.mubr.bf16.mxu0 %v2378_v0 }
 0x16f   :  { %2012 = vmatmul.mubr.msk.bf16.vlgmr.msra.gmra.mrb[28].mxu1 %vm62_vm0, %v671_v53  ;;  %2014 = vmatmul.mubr.msk.bf16.vlgmr.msra.gmra.mrb[32].mxu0 %vm62_vm0, %v671_v53 }
 0x170   :  { %923 = vmatprep.mubr.bf16.mxu1 %v2378_v0  ;;  %976 = vmatprep.mubr.bf16.mxu0 %v2378_v0  ;;  %v2324_v0 = vld [vmem:[%s3009_s9 + $0x10] sm:$0xff]  }
 0x171   :  { %2296 = vmatpush3.bf16.msra.mxu1 %v2293_v3  ;;  %2112 = vmatpush3.bf16.msra.mxu0 %v2316_v2 }
 0x172   :  { %2298 = vmatprep.subr.bf16.mxu1 %v2297_v4  ;;  %2113 = vmatprep.subr.bf16.mxu0 %v2318_v6 }
 0x175   :  { %2300 = vmatpush3.bf16.msra.mxu1 %v2297_v4  ;;  %2114 = vmatpush3.bf16.msra.mxu0 %v2320_v8 }
 0x176   :  { %2139 = vmatprep.subr.bf16.mxu1 %v2315_v7  ;;  %2115 = vmatprep.subr.bf16.mxu0 %v2322_v9 }
 0x177   :  { %2013 = vmatmul.mubr.msk.bf16.gmra.mrb[32].mxu1 %vm62_vm0, %v672_v60  ;;  %2015 = vmatmul.mubr.msk.bf16.gmra.mrb[36].mxu0 %vm62_vm0, %v672_v60 }
 0x178   :  { %2264 = vmatprep.mubr.msk.f32.mxu1 %vm62_vm0, %v257_v52 }
 0x179   :  { %2116 = vmatpush3.bf16.msra.mxu0 %v2324_v0 }
 0x17a   :  { %2117 = vmatprep.subr.bf16.mxu0 %v2326_v10 }
 0x17d   :  { %2118 = vmatpush3.bf16.msra.mxu0 %v2328_v11 }
 0x17e   :  { %2119 = vmatprep.subr.bf16.mxu0 %v2330_v12 }
 0x17f   :  { %2265 = vmatmul.mubr.msk.f32.vlgmr.msra.gmra.mrb[36].mxu1 %vm62_vm0, %v2661_v48 }
 0x180   :  { %2267 = vmatprep.mubr.msk.f32.mxu1 %vm62_vm0, %v267_v59  ;;  %2140 = vmatpush3.bf16.msra.mxu1 %v2317_v13 }
 0x181   :  { %2141 = vmatprep.subr.bf16.mxu1 %v2319_v14  ;;  %2120 = vmatpush3.bf16.msra.mxu0 %v2332_v15 }
 0x182   :  { %2121 = vmatprep.subr.bf16.mxu0 %v2334_v16 }
 0x183   :  { %2268 = vmatmul.mubr.msk.f32.gmra.mrb[38].mxu1 %vm62_vm0, %v2678_v57 }
 0x184   :  { %2142 = vmatpush3.bf16.msra.mxu1 %v2321_v17 }
 0x185   :  { %2143 = vmatprep.subr.bf16.mxu1 %v2323_v18  ;;  %2122 = vmatpush3.bf16.msra.mxu0 %v2336_v19 }
 0x186   :  { %2123 = vmatprep.subr.bf16.mxu0 %v2338_v27  ;;  %v2349_v27 = vld [vmem:[%s3009_s9 + $0x180] sm:$0xff]  }
 0x188   :  { %2144 = vmatpush3.bf16.msra.mxu1 %v2325_v20 }
 0x189   :  { %2145 = vmatprep.subr.bf16.mxu1 %v2327_v21  ;;  %2124 = vmatpush3.bf16.msra.mxu0 %v2340_v29  ;;  %v2351_v29 = vld [vmem:[%s3009_s9 + $0x1c8] sm:$0xff]  }
 0x18a   :  { %2125 = vmatprep.subr.bf16.mxu0 %v2342_v31 }
 0x18c   :  { %2146 = vmatpush3.bf16.msra.mxu1 %v2329_v22 }
 0x18d   :  { %2147 = vmatprep.subr.bf16.mxu1 %v2331_v23  ;;  %2126 = vmatpush3.bf16.msra.mxu0 %v2344_v39 }
 0x18e   :  { %2167 = vmatprep.subr.bf16.mxu0 %v2346_v34 }
 0x190   :  { %2148 = vmatpush3.bf16.msra.mxu1 %v2333_v24 }
 0x191   :  { %2149 = vmatprep.subr.bf16.mxu1 %v2335_v25 }
 0x194   :  { %2150 = vmatpush3.bf16.msra.mxu1 %v2337_v26  ;;  %v2348_v26 = vld [vmem:[%s3009_s9 + $0x100] sm:$0xff]  }
 0x195   :  { %2151 = vmatprep.subr.bf16.mxu1 %v2339_v28  ;;  %v2350_v28 = vld [vmem:[%s3009_s9 + $0x148] sm:$0xff]  }
 0x198   :  { %2152 = vmatpush3.bf16.msra.mxu1 %v2341_v30 }
 0x199   :  { %2153 = vmatprep.subr.bf16.mxu1 %v2343_v32 }
 0x19c   :  { %2154 = vmatpush3.bf16.msra.mxu1 %v2345_v33 }
 0x19d   :  { %2195 = vmatprep.subr.bf16.mxu1 %v2347_v35 }
 0x1c2   :  { %v493_v36 = vpop.f32.mrb[4].mxu1  ;;  %v546_v37 = vpop.f32.mrb[8].mxu0 }
 0x1c3   :  { %v495_v38 = vpop.f32.mrb[5].mxu1  ;;  %v548_v41 = vpop.f32.mrb[9].mxu0 }
 0x1c4   :  { %v497_v42 = vpop.f32.mrb[6].mxu1  ;;  %v550_v43 = vpop.f32.mrb[10].mxu0 }
 0x1c5   :  { %v499_v44 = vpop.f32.mrb[7].mxu1  ;;  %v552_v45 = vpop.f32.mrb[11].mxu0 }
 0x1ca   :  { %v503_v46 = vpop.f32.mrb[8].mxu1  ;;  %v556_v47 = vpop.f32.mrb[12].mxu0 }
 0x1cb   :  { %v505_v48 = vpop.f32.mrb[9].mxu1  ;;  %v558_v49 = vpop.f32.mrb[13].mxu0 }
 0x1cc   :  { %v507_v50 = vpop.f32.mrb[10].mxu1  ;;  %v560_v51 = vpop.f32.mrb[14].mxu0 }
 0x1cd   :  { %v2816_v52 = vpop.f32.mrb[11].mxu1  ;;  %v2818_v53 = vpop.f32.mrb[15].mxu0 }
 0x1d2   :  { %v2820_v54 = vpop.f32.mrb[12].mxu1  ;;  %v2822_v55 = vpop.f32.mrb[16].mxu0 }
 0x1d3   :  { %v2824_v56 = vpop.f32.mrb[13].mxu1  ;;  %v2826_v57 = vpop.f32.mrb[17].mxu0 }
 0x1d4   :  { %v2828_v58 = vpop.f32.mrb[14].mxu1  ;;  %v2830_v59 = vpop.f32.mrb[18].mxu0 }
 0x1d5   :  { %v2832_v60 = vpop.f32.mrb[15].mxu1  ;;  %v2834_v61 = vpop.f32.mrb[19].mxu0 }
 0x1da   :  { %v2836_v62 = vpop.f32.mrb[16].mxu1  ;;  %v2838_v3 = vpop.f32.mrb[20].mxu0 }
 0x1db   :  { %v2840_v5 = vpop.f32.mrb[17].mxu1  ;;  %v2842_v63 = vpop.f32.mrb[21].mxu0 }
 0x1dc   :  { %v2844_v1 = vpop.f32.mrb[18].mxu1  ;;  %v2846_v2 = vpop.f32.mrb[22].mxu0 }
 0x1dd   :  { %v2848_v4 = vpop.f32.mrb[19].mxu1  ;;  %v2850_v6 = vpop.f32.mrb[23].mxu0 }
 0x232   :  { %v809_v7 = vpop.f32.mrb[20].mxu1  ;;  %v862_v8 = vpop.f32.mrb[24].mxu0 }
 0x233   :  { %v987_v9 = vmul.f32 %v809_v7, %v493_v36  ;;  %v989_v0 = vmul.f32 %v862_v8, %v546_v37  ;;  %v811_v10 = vpop.f32.mrb[21].mxu1  ;;  %v864_v11 = vpop.f32.mrb[25].mxu0 }
 0x234   :  { %v988_v12 = vmul.f32 %v811_v10, %v495_v38  ;;  %v990_v13 = vmul.f32 %v864_v11, %v548_v41  ;;  %v813_v14 = vpop.f32.mrb[22].mxu1  ;;  %v866_v15 = vpop.f32.mrb[26].mxu0  ;;  %v2352_v41 = vld [vmem:[%s3009_s9 + $0x108] sm:$0xff]   ;;  %v2357_v10 = vld [vmem:[%s3009_s9 + $0x190] sm:$0xff]  }
 0x235   :  { %v995_v16 = vmul.f32 %v813_v14, %v497_v42  ;;  %v997_v17 = vmul.f32 %v866_v15, %v550_v43  ;;  %v815_v18 = vpop.f32.mrb[23].mxu1  ;;  %v868_v19 = vpop.f32.mrb[27].mxu0  ;;  %v2353_v42 = vld [vmem:[%s3009_s9 + $0x188] sm:$0xff]  }
 0x236   :  { %v996_v20 = vmul.f32 %v815_v18, %v499_v44  ;;  %v998_v21 = vmul.f32 %v868_v19, %v552_v45 }
 0x237   :  { %v1019_v22 = vpack.c.bf16 %v995_v16, %v987_v9  ;;  %v1021_v23 = vpack.c.bf16 %v997_v17, %v989_v0  ;;  %v2356_v0 = vld [vmem:[%s3009_s9 + $0x110] sm:$0xff]  }
 0x238   :  { %v1020_v24 = vpack.c.bf16 %v996_v20, %v988_v12  ;;  %v1022_v25 = vpack.c.bf16 %v998_v21, %v990_v13 }
 0x23a   :  { %v819_v30 = vpop.f32.mrb[24].mxu1  ;;  %v872_v31 = vpop.f32.mrb[28].mxu0  ;;  %1680 = vmatprep.mubr.bf16.mxu0 %v1020_v24  ;;  %1729 = vmatprep.mubr.bf16.mxu1 %v1022_v25  ;;  %v2363_v24 = vld [vmem:[%s3009_s9 + $0x1e0] sm:$0xff]  }
 0x23b   :  { %v1003_v32 = vmul.f32 %v819_v30, %v503_v46  ;;  %v1005_v39 = vmul.f32 %v872_v31, %v556_v47  ;;  %v821_v33 = vpop.f32.mrb[25].mxu1  ;;  %v874_v34 = vpop.f32.mrb[29].mxu0  ;;  %1681 = vmatmul.mubr.bf16.vlgmr.msra.gmra.mrb[40].mxu0 %v1019_v22  ;;  %1730 = vmatmul.mubr.bf16.vlgmr.msra.gmra.mrb[40].mxu1 %v1021_v23  ;;  %v2354_v47 = vld [vmem:[%s3009_s9 + $0x150] sm:$0xff]   ;;  %v2362_v23 = vld [vmem:[%s3009_s9 + $0x160] sm:$0xff]   ;;  %v2367_v30 = vld [vmem:[%s3009_s9 + $0x1e8] sm:$0xff]  }
 0x23c   :  { %v1004_v35 = vmul.f32 %v821_v33, %v505_v48  ;;  %v1006_v36 = vmul.f32 %v874_v34, %v558_v49  ;;  %2168 = vmatpush3.bf16.msra.mxu0 %v2348_v26  ;;  %2196 = vmatpush3.bf16.msra.mxu1 %v2349_v27  ;;  %v823_v37 = vpop.f32.mrb[26].mxu1  ;;  %v876_v38 = vpop.f32.mrb[30].mxu0  ;;  %v2355_v48 = vld [vmem:[%s3009_s9 + $0x1d0] sm:$0xff]  }
 0x23d   :  { %v1011_v43 = vmul.f32 %v823_v37, %v507_v50  ;;  %v1013_v44 = vmul.f32 %v876_v38, %v560_v51  ;;  %v825_v45 = vpop.f32.mrb[27].mxu1  ;;  %v878_v46 = vpop.f32.mrb[31].mxu0  ;;  %2169 = vmatprep.subr.bf16.mxu0 %v2350_v28  ;;  %2197 = vmatprep.subr.bf16.mxu1 %v2351_v29  ;;  %v2364_v29 = vld [vmem:[%s3009_s9 + $0x120] sm:$0xff]  }
 0x23e   :  { %v1012_v49 = vmul.f32 %v825_v45, %v2816_v52  ;;  %v1014_v7 = vmul.f32 %v878_v46, %v2818_v53  ;;  %v2358_v52 = vld [vmem:[%s3009_s9 + $0x158] sm:$0xff]   ;;  %v2371_v45 = vld [vmem:[%s3009_s9 + $0x1f0] sm:$0xff]  }
 0x23f   :  { %v1027_v8 = vpack.c.bf16 %v1011_v43, %v1003_v32  ;;  %v1029_v9 = vpack.c.bf16 %v1013_v44, %v1005_v39  ;;  %v2359_v53 = vld [vmem:[%s3009_s9 + $0x1d8] sm:$0xff]  }
 0x240   :  { %v1028_v50 = vpack.c.bf16 %v1012_v49, %v1004_v35  ;;  %v1030_v51 = vpack.c.bf16 %v1014_v7, %v1006_v36  ;;  %2170 = vmatpush3.bf16.msra.mxu0 %v2352_v41  ;;  %2198 = vmatpush3.bf16.msra.mxu1 %v2353_v42  ;;  %v2368_v42 = vld [vmem:[%s3009_s9 + $0x128] sm:$0xff]   ;;  %v2372_v7 = vld [vmem:[%s3009_s9 + $0x130] sm:$0xff]  }
 0x241   :  { %2171 = vmatprep.subr.bf16.mxu0 %v2354_v47  ;;  %2199 = vmatprep.subr.bf16.mxu1 %v2355_v48 }
 0x242   :  { %v915_v11 = vpop.f32.mrb[28].mxu1  ;;  %v968_v12 = vpop.f32.mrb[32].mxu0  ;;  %1688 = vmatprep.mubr.bf16.mxu0 %v1028_v50  ;;  %1737 = vmatprep.mubr.bf16.mxu1 %v1030_v51  ;;  %v2376_v51 = vld [vmem:[%s3009_s9 + $0x138] sm:$0xff]  }
 0x243   :  { %v2891_v13 = vmul.f32 %v915_v11, %v2820_v54  ;;  %v2894_v14 = vmul.f32 %v968_v12, %v2822_v55  ;;  %v917_v15 = vpop.f32.mrb[29].mxu1  ;;  %v970_v16 = vpop.f32.mrb[33].mxu0  ;;  %1689 = vmatmul.mubr.bf16.gmra.mrb[44].mxu0 %v1027_v8  ;;  %1738 = vmatmul.mubr.bf16.gmra.mrb[44].mxu1 %v1029_v9  ;;  %v2360_v54 = vld [vmem:[%s3009_s9 + $0x118] sm:$0xff]   ;;  %v2373_v8 = vld [vmem:[%s3009_s9 + $0x1b0] sm:$0xff]   ;;  %v2084_v12 = vld [vmem:[%s3010_s1] ss:$0 sm:$0xff] }
 0x244   :  { %v992_v17 = vmul.f32 %v917_v15, %v2824_v56  ;;  %v994_v18 = vmul.f32 %v970_v16, %v2826_v57  ;;  %2172 = vmatpush3.bf16.msra.mxu0 %v2356_v0  ;;  %2200 = vmatpush3.bf16.msra.mxu1 %v2357_v10  ;;  %v919_v19 = vpop.f32.mrb[30].mxu1  ;;  %v972_v20 = vpop.f32.mrb[34].mxu0  ;;  %v2361_v55 = vld [vmem:[%s3009_s9 + $0x198] sm:$0xff]  }
 0x245   :  { %v2905_v21 = vmul.f32 %v919_v19, %v2828_v58  ;;  %v2908_v22 = vmul.f32 %v972_v20, %v2830_v59  ;;  %v921_v56 = vpop.f32.mrb[31].mxu1  ;;  %v974_v57 = vpop.f32.mrb[35].mxu0  ;;  %2173 = vmatprep.subr.bf16.mxu0 %v2358_v52  ;;  %2201 = vmatprep.subr.bf16.mxu1 %v2359_v53  ;;  %v2377_v0 = vld [vmem:[%s3009_s9 + $0x1b8] sm:$0xff]   ;;  %v1845_v53 = vshrl.u32 %v146_v40, 7 }
 0x246   :  { %v1000_v25 = vmul.f32 %v921_v56, %v2832_v60  ;;  %v1002_v58 = vmul.f32 %v974_v57, %v2834_v61  ;;  %v2365_v60 = vld [vmem:[%s3009_s9 + $0x1a0] sm:$0xff]   ;;  %v2366_v61 = vld [vmem:[%s3009_s9 + $0x168] sm:$0xff]  }
 0x247   :  { %v1023_v59 = vpack.c.bf16 %v2905_v21, %v2891_v13  ;;  %v1025_v26 = vpack.c.bf16 %v2908_v22, %v2894_v14  ;;  %v1846_v11 = vadd.s32 8, %v1845_v53  ;;  %vm1852_vm8 = vcmp.eq.s32.totalorder %v1845_v53, %v2084_v12  ;;  %v2085_v13 = vld [vmem:[%s3011_s2] ss:$0 sm:$0xff] }
 0x248   :  { %v1024_v27 = vpack.c.bf16 %v1000_v25, %v992_v17  ;;  %v1026_v28 = vpack.c.bf16 %v1002_v58, %v994_v18  ;;  %2174 = vmatpush3.bf16.msra.mxu0 %v2360_v54  ;;  %2202 = vmatpush3.bf16.msra.mxu1 %v2361_v55  ;;  %v1861_v14 = vsel %vm1852_vm8, %v2085_v13, 0.0 }
 0x249   :  { %2175 = vmatprep.subr.bf16.mxu0 %v2362_v23  ;;  %2203 = vmatprep.subr.bf16.mxu1 %v2363_v24  ;;  %vm1853_vm9 = vcmp.eq.s32.totalorder %v1846_v11, %v2084_v12 }
 0x24a   :  { %v925_v31 = vpop.f32.mrb[32].mxu1  ;;  %v978_v32 = vpop.f32.mrb[36].mxu0  ;;  %1778 = vmatprep.mubr.bf16.mxu0 %v1024_v27  ;;  %1827 = vmatprep.mubr.bf16.mxu1 %v1026_v28  ;;  %v2979_v15 = vsel %vm1853_vm9, %v2085_v13, 0.0 }
 0x24b   :  { %v1007_v39 = vmul.f32 %v925_v31, %v2836_v62  ;;  %v1009_v33 = vmul.f32 %v978_v32, %v2838_v3  ;;  %v927_v34 = vpop.f32.mrb[33].mxu1  ;;  %v980_v35 = vpop.f32.mrb[37].mxu0  ;;  %v2369_v62 = vld [vmem:[%s3009_s9 + $0x1a8] sm:$0xff]  }
 0x24c   :  { %v1008_v36 = vmul.f32 %v927_v34, %v2840_v5  ;;  %v1010_v37 = vmul.f32 %v980_v35, %v2842_v63  ;;  %2176 = vmatpush3.bf16.msra.mxu0 %v2364_v29  ;;  %2204 = vmatpush3.bf16.msra.mxu1 %v2365_v60  ;;  %v929_v38 = vpop.f32.mrb[34].mxu1  ;;  %v982_v41 = vpop.f32.mrb[38].mxu0  ;;  %v2370_v63 = vld [vmem:[%s3009_s9 + $0x170] sm:$0xff]  }
 0x24d   :  { %v1015_v3 = vmul.f32 %v929_v38, %v2844_v1  ;;  %v1017_v43 = vmul.f32 %v982_v41, %v2846_v2  ;;  %v931_v44 = vpop.f32.mrb[35].mxu1  ;;  %v984_v5 = vpop.f32.mrb[39].mxu0  ;;  %2177 = vmatprep.subr.bf16.mxu0 %v2366_v61  ;;  %2205 = vmatprep.subr.bf16.mxu1 %v2367_v30 }
 0x24e   :  { %v1016_v46 = vmul.f32 %v931_v44, %v2848_v4  ;;  %v1018_v47 = vmul.f32 %v984_v5, %v2850_v6  ;;  %v2374_v4 = vld [vmem:[%s3009_s9 + $0x178] sm:$0xff]  }
 0x24f   :  { %v1031_v48 = vpack.c.bf16 %v1015_v3, %v1007_v39  ;;  %v1033_v1 = vpack.c.bf16 %v1017_v43, %v1009_v33  ;;  %v2375_v6 = vld [vmem:[%s3009_s9 + $0x1f8] sm:$0xff]  }
 0x250   :  { %v1032_v49 = vpack.c.bf16 %v1016_v46, %v1008_v36  ;;  %v1034_v2 = vpack.c.bf16 %v1018_v47, %v1010_v37  ;;  %2178 = vmatpush3.bf16.msra.mxu0 %v2368_v42  ;;  %2206 = vmatpush3.bf16.msra.mxu1 %v2369_v62 }
 0x251   :  { %2179 = vmatprep.subr.bf16.mxu0 %v2370_v63  ;;  %2207 = vmatprep.subr.bf16.mxu1 %v2371_v45 }
 0x252   :  { %v2266_v9 = vpop.f32.mrb[36].mxu1 }
 0x253   :  { %v1245_v50 = vpop.f32.mrb[37].mxu1 }
 0x254   :  { %2180 = vmatpush3.bf16.msra.mxu0 %v2372_v7  ;;  %2208 = vmatpush3.bf16.msra.mxu1 %v2373_v8 }
 0x255   :  { %2181 = vmatprep.subr.bf16.mxu0 %v2374_v4  ;;  %2209 = vmatprep.subr.bf16.mxu1 %v2375_v6 }
 0x256   :  { %v2269_v10 = vpop.f32.mrb[38].mxu1 }
 0x257   :  { %v1255_v52 = vpop.f32.mrb[39].mxu1 }
 0x258   :  { %2182 = vmatpush3.bf16.msra.mxu0 %v2376_v51  ;;  %2210 = vmatpush3.bf16.msra.mxu1 %v2377_v0 }
 0x25b   :  { %1779 = vmatmul.mubr.bf16.vlgmr.msra.gmra.mrb[48].mxu0 %v1023_v59  ;;  %1828 = vmatmul.mubr.bf16.vlgmr.msra.gmra.mrb[48].mxu1 %v1025_v26 }
 0x25c   :  { %1786 = vmatprep.mubr.bf16.mxu0 %v1032_v49  ;;  %1835 = vmatprep.mubr.bf16.mxu1 %v1034_v2 }
 0x263   :  { %1787 = vmatmul.mubr.bf16.gmra.mrb[52].mxu0 %v1031_v48  ;;  %1836 = vmatmul.mubr.bf16.gmra.mrb[52].mxu1 %v1033_v1 }
 0x264   :  { %2278 = vmatprep.mubr.msk.f32.mxu0 %vm62_vm0, %v1861_v14 }
 0x30e   :  { %v2127_v16 = vpop.f32.mrb[40].mxu0  ;;  %v2155_v17 = vpop.f32.mrb[40].mxu1 }
 0x30f   :  { %v2128_v18 = vpop.f32.mrb[41].mxu0  ;;  %v2156_v40 = vpop.f32.mrb[41].mxu1 }
 0x310   :  { %v2129_v19 = vadd.f32 %v2128_v18, %v2127_v16  ;;  %v2157_v20 = vadd.f32 %v2156_v40, %v2155_v17  ;;  %v2130_v54 = vpop.f32.mrb[42].mxu0  ;;  %v2158_v55 = vpop.f32.mrb[42].mxu1  ;;  %v1864_v40 = vld [vmem:[%s3006_s13 + $0x8] sm:$0xff] }
 0x311   :  { %v2131_v21 = vpop.f32.mrb[43].mxu0  ;;  %v2159_v22 = vpop.f32.mrb[43].mxu1 }
 0x312   :  { %v1683_v56 = vadd.f32 %v2129_v19, %v1245_v50  ;;  %v2132_v57 = vadd.f32 %v2131_v21, %v2130_v54  ;;  %v2160_v23 = vadd.f32 %v2159_v22, %v2158_v55  ;;  %v1863_v54 = vld [vmem:[%s3006_s13] sm:$0xff] }
 0x314   :  { %v1732_v24 = vadd.f32 %v2157_v20, %v1683_v56  ;;  %v1686_v25 = vadd.f32 %v2266_v9, %v2132_v57 }
 0x316   :  { %v1735_v58 = vadd.f32 %v2160_v23, %v1686_v25  ;;  %v2133_v59 = vpop.f32.mrb[44].mxu0  ;;  %v2161_v26 = vpop.f32.mrb[44].mxu1 }
 0x317   :  { %v2134_v27 = vpop.f32.mrb[45].mxu0  ;;  %v2162_v28 = vpop.f32.mrb[45].mxu1 }
 0x318   :  { %v2135_v29 = vadd.f32 %v2134_v27, %v2133_v59  ;;  %v2163_v60 = vadd.f32 %v2162_v28, %v2161_v26  ;;  %v2136_v61 = vpop.f32.mrb[46].mxu0  ;;  %v2164_v30 = vpop.f32.mrb[46].mxu1 }
 0x319   :  { %v2137_v31 = vpop.f32.mrb[47].mxu0  ;;  %v2165_v32 = vpop.f32.mrb[47].mxu1 }
 0x31a   :  { %v1691_v39 = vadd.f32 %v2135_v29, %v1255_v52  ;;  %v2138_v33 = vadd.f32 %v2137_v31, %v2136_v61  ;;  %v2166_v34 = vadd.f32 %v2165_v32, %v2164_v30 }
 0x31c   :  { %v1740_v35 = vadd.f32 %v2163_v60, %v1691_v39  ;;  %v1694_v36 = vadd.f32 %v2269_v10, %v2138_v33 }
 0x31e   :  { %v1743_v37 = vadd.f32 %v2166_v34, %v1694_v36 }
 0x32e   :  { %v2183_v38 = vpop.f32.mrb[48].mxu0  ;;  %v2211_v41 = vpop.f32.mrb[48].mxu1 }
 0x32f   :  { %v2184_v42 = vpop.f32.mrb[49].mxu0  ;;  %v2212_v62 = vpop.f32.mrb[49].mxu1 }
 0x330   :  { %v2185_v3 = vadd.f32 %v2184_v42, %v2183_v38  ;;  %v2213_v43 = vadd.f32 %v2212_v62, %v2211_v41  ;;  %v2186_v44 = vpop.f32.mrb[50].mxu0  ;;  %v2214_v5 = vpop.f32.mrb[50].mxu1 }
 0x331   :  { %v2187_v63 = vpop.f32.mrb[51].mxu0  ;;  %v2215_v45 = vpop.f32.mrb[51].mxu1 }
 0x332   :  { %v1781_v46 = vadd.f32 %v2185_v3, %v1732_v24  ;;  %v2188_v47 = vadd.f32 %v2187_v63, %v2186_v44  ;;  %v2216_v48 = vadd.f32 %v2215_v45, %v2214_v5 }
 0x334   :  { %v1830_v1 = vadd.f32 %v2213_v43, %v1781_v46  ;;  %v1784_v49 = vadd.f32 %v2188_v47, %v1735_v58 }
 0x336   :  { %v1833_v2 = vadd.f32 %v2216_v48, %v1784_v49  ;;  %v2189_v7 = vpop.f32.mrb[52].mxu0  ;;  %v2217_v8 = vpop.f32.mrb[52].mxu1 }
 0x337   :  { %v2190_v4 = vpop.f32.mrb[53].mxu0  ;;  %v2218_v6 = vpop.f32.mrb[53].mxu1 }
 0x338   :  { %v2191_v9 = vadd.f32 %v2190_v4, %v2189_v7  ;;  %v2219_v50 = vadd.f32 %v2218_v6, %v2217_v8  ;;  %v2192_v51 = vpop.f32.mrb[54].mxu0  ;;  %v2220_v0 = vpop.f32.mrb[54].mxu1  ;;  %v2301_v10 = vpack.c.bf16 %v1833_v2, %v1830_v1 }
 0x339   :  { %v2193_v52 = vpop.f32.mrb[55].mxu0  ;;  %v2221_v53 = vpop.f32.mrb[55].mxu1 }
 0x33a   :  { %v1789_v11 = vadd.f32 %v2191_v9, %v1740_v35  ;;  %v2194_v12 = vadd.f32 %v2193_v52, %v2192_v51  ;;  %v2222_v13 = vadd.f32 %v2221_v53, %v2220_v0  ;;  %2302 = vmatprep.subr.bf16.mxu0 %v2301_v10 }
 0x33b   :  { %2304 = vmatpush3.bf16.msra.mxu0 %v2301_v10 }
 0x33c   :  { %v1838_v14 = vadd.f32 %v2219_v50, %v1789_v11  ;;  %v1792_v16 = vadd.f32 %v2194_v12, %v1743_v37 }
 0x33e   :  { %v1841_v17 = vadd.f32 %v2222_v13, %v1792_v16 }
 0x340   :  { %v2305_v18 = vpack.c.bf16 %v1841_v17, %v1838_v14 }
 0x342   :  { %2306 = vmatprep.subr.bf16.mxu0 %v2305_v18 }
 0x343   :  { %2308 = vmatpush3.bf16.msra.mxu0 %v2305_v18 }
 0x346   :  { %2279 = vmatmul.mubr.msk.f32.vlgmr.msra.gmra.mrb[2].mxu0 %vm62_vm0, %v2979_v15 }
 0x419   :  { %v2280_v19 = vpop.f32.mrb[2].mxu0 }
 0x41a   :  { %v1947_v20 = vadd.f32 %v2280_v19, %v1864_v40  ;;  %v1937_v55 = vpop.f32.mrb[3].mxu0 }
 0x41b   :  { %v1946_v21 = vadd.f32 %v1937_v55, %v1863_v54 }
 0x41c   :  { %1949 = vst.msk [vmem:[%s3006_s13 + $0x8] sm:$0xff] %vm62_vm0, %v1947_v20 }
 0x41d   :  { %1948 = vst.msk [vmem:[%s3006_s13] sm:$0xff] %vm62_vm0, %v1946_v21 }

// kernel: mpnn_bayes_forward.15
= control target key start
LH: loop header
LB: loop body
LE: loop exit
PB: predicated region body
PF: predicated region fallthrough
CT: control target
= control target key end

     0   :  { %v28_v0 = vlaneseq  ;;  %v363_v1 = vmov 0.0|0.0   ;;  %vm364_vm0 = vmmov 0   ;;  %v365_v4 = vmov 0.0   ;;  %s456_s2 = inlined_call_operand.vmem [shape: f32[16,32], index: 2, kind: input, shape index: {}]   ;;  %s457_s0 = inlined_call_operand.vmem [shape: s32[1,16], index: 0, kind: input, shape index: {}]   ;;  %s458_s1 = inlined_call_operand.vmem [shape: f32[1,16], index: 1, kind: input, shape index: {}]   ;;  %s459_s3 = inlined_call_operand.vmem [shape: f32[32,32], index: 3, kind: input, shape index: {}]   ;;  %s460_s5 = inlined_call_operand.vmem [shape: f32[32,1], index: 5, kind: input, shape index: {}]   ;;  %s461_s6 = inlined_call_operand.<no memory space> [shape: f32[1,1], index: 6, kind: input, shape index: {}]   ;;  %s462_s4 = inlined_call_operand.vmem [shape: f32[1,32], index: 4, kind: input, shape index: {}]   ;;  %s463_s7 = inlined_call_operand.vmem [shape: f32[2,1], index: 7, kind: output, shape index: {}]  }
   0x1   :  { %345 = vmatprep.subr.bf16.mxu0 %v363_v1  ;;  %v44_v2 = vld [vmem:[%s456_s2] sm:$0xff]  ;;  %v45_v3 = vld [vmem:[%s456_s2 + $0x8] sm:$0xff]  ;;  %320 = vmatprep.mubr.msk.f32.mxu0 %vm364_vm0, %v365_v4  ;;  %v122_v12 = vld [vmem:[%s459_s3 + $0x10] sm:$0xff]  ;;  %vm46_vm2 = vcmask 130048   ;;  %vm131_vm3 = vcmask 261120   ;;  %v12_v24 = vstv %s461_s6  ;;  %vm290_vm4 = vcmask 1024  }
   0x2   :  { %v296_v5 = vld [vmem:[%s457_s0] ss:$0 sm:$0xff]  ;;  %v346_v6 = vpack.c.bf16 %v45_v3, %v44_v2  ;;  %v29_v7 = vshrl.u32 %v28_v0, 7  ;;  %348 = vmatprep.subr.bf16.mxu1 %v363_v1  ;;  %v121_v10 = vld [vmem:[%s459_s3 + $0x8] sm:$0xff]  ;;  %331 = vmatprep.mubr.msk.f32.mxu1 %vm364_vm0, %v365_v4  ;;  %v123_v13 = vld [vmem:[%s459_s3 + $0x18] sm:$0xff] }
   0x3   :  { %v297_v8 = vld [vmem:[%s458_s1] ss:$0 sm:$0xff]  ;;  %v352_v15 = vpack.c.bf16 %v123_v13, %v122_v12  ;;  %v207_v17 = vld [vmem:[%s460_s5 + $0x8] sm:$0xff]  ;;  %v208_v21 = vld [vmem:[%s460_s5 + $0x10] sm:$0xff]  ;;  %13 = vst [vmem:[#allocation2] sm:$0x1] %v12_v24 }
   0x4   :  { %v120_v9 = vld [vmem:[%s459_s3] sm:$0xff]  ;;  %347 = vmatpush3.bf16.msra.mxu0 %v346_v6  ;;  %vm35_vm1 = vcmp.eq.s32.totalorder %v29_v7, %v296_v5  ;;  %v209_v22 = vld [vmem:[%s460_s5 + $0x18] sm:$0xff] }
   0x5   :  { %v349_v11 = vpack.c.bf16 %v121_v10, %v120_v9  ;;  %v43_v14 = vsel %vm35_vm1, %v297_v8, 0.0  ;;  %354 = vmatprep.subr.bf16.mxu0 %v363_v1  ;;  %v206_v16 = vld [vmem:[%s460_s5] sm:$0xff]  ;;  %v358_v23 = vpack.c.bf16 %v209_v22, %v208_v21 }
   0x6   :  { %v355_v18 = vpack.c.bf16 %v207_v17, %v206_v16  ;;  %v299_v25 = vld [vmem:[%s462_s4] ss:$0 sm:$0xff] }
   0x7   :  { %350 = vmatpush3.bf16.msra.mxu1 %v349_v11  ;;  %321 = vmatmul.mubr.msk.f32.vlgmr.msra.gmra.mrb[0].mxu0 %vm46_vm2, %v43_v14 }
   0x8   :  { %351 = vmatprep.subr.bf16.mxu1 %v363_v1  ;;  %342 = vmatprep.mubr.msk.f32.mxu0 %vm364_vm0, %v365_v4 }
   0x9   :  { %356 = vmatpush3.bf16.msra.mxu0 %v355_v18 }
   0xa   :  { %357 = vmatprep.subr.bf16.mxu0 %v363_v1  ;;  %v301_v30 = vld [vmem:[#allocation2] ss:$0 sm:$0xff] }
   0xb   :  { %353 = vmatpush3.bf16.msra.mxu1 %v352_v15 }
   0xd   :  { %359 = vmatpush3.bf16.msra.mxu0 %v358_v23 }
  0xda   :  { %v116_v19 = vpop.f32.mrb[0].mxu0 }
  0xdb   :  { %v322_v20 = vpop.f32.mrb[1].mxu0  ;;  %332 = vmatmul.mubr.msk.f32.vlgmr.msra.gmra.mrb[0].mxu1 %vm131_vm3, %v116_v19 }
 0x1ae   :  { %v201_v26 = vpop.f32.mrb[0].mxu1 }
 0x1af   :  { %v202_v27 = vadd.f32 %v299_v25, %v201_v26  ;;  %v333_v28 = vpop.f32.mrb[1].mxu1 }
 0x1b1   :  { %v205_v29 = vmax.f32 %v202_v27, 0.0 }
 0x1b3   :  { %343 = vmatmul.mubr.msk.f32.vlgmr.msra.gmra.mrb[2].mxu0 %vm131_vm3, %v205_v29 }
 0x286   :  { %v286_v31 = vpop.f32.mrb[2].mxu0 }
 0x287   :  { %v287_v32 = vadd.f32 %v301_v30, %v286_v31  ;;  %v344_v33 = vpop.f32.mrb[3].mxu0 }
 0x289   :  { %291 = vst.msk [vmem:[%s463_s7] sm:$0x3] %vm290_vm4, %v287_v32 }

</bundles_post_ra>
